<compile_context>
chip_gen: v6e
topology: v6e:2x2x1
jax: 0.10.0
libtpu: 0.0.40
codegen_flags: <defaults>
</compile_context>

<pallas_src>
import functools

import jax
import jax.numpy as jnp
from jax.experimental import pallas as pl
from jax.experimental.pallas import tpu as pltpu

_LN_EPS = 1e-5
_HI = jax.lax.Precision.HIGHEST
# Active taps (ky, kx) of a 3x3 mask-'B' convolution: the full row above plus
# the left neighbour and the centre of the current row.
_TAPS = ((0, 0), (0, 1), (0, 2), (1, 0), (1, 1))


def _layer_norm(h, gamma, beta):
    """Channel LayerNorm, one-pass E[x]/E[x^2] formulation (f32)."""
    mu = jnp.mean(h, axis=-1, keepdims=True)
    m2 = jnp.mean(h * h, axis=-1, keepdims=True)
    var = jnp.maximum(m2 - mu * mu, 0.0)
    return (h - mu) * jax.lax.rsqrt(var + _LN_EPS) * gamma + beta


def _fused_kernel(x_ref, xh_ref, g1_ref, b1_ref, w1_ref, c1_ref, g2_ref,
                  b2_ref, w3_ref, c3_ref, g3_ref, b3_ref, w4_ref, c4_ref,
                  o_ref):
    """Whole residual block for one (batch, row-block) tile, all in VMEM."""
    th, w, c = x_ref.shape
    c2 = w1_ref.shape[1]
    bf16 = jnp.bfloat16

    x = x_ref[...]                                    # (TH, W, C)  f32
    xh = xh_ref[...]                                  # (1,  W, C)  f32

    # ---- stage 1 (pointwise): LN -> ReLU -> 1x1 (C->C/2) -> LN -> ReLU -----
    # The halo row and the main rows share one lane-dense matmul.
    z = jnp.concatenate([xh, x], axis=0).reshape((th + 1) * w, c)
    h = jnp.maximum(_layer_norm(z, g1_ref[...], b1_ref[...]), 0.0)
    h = jnp.dot(h.astype(bf16), w1_ref[...],
                preferred_element_type=jnp.float32) + c1_ref[...]
    h = jnp.maximum(_layer_norm(h, g2_ref[...], b2_ref[...]), 0.0)
    h = h.reshape(th + 1, w, c2)

    # The reference zero-pads the *stage-1 activation*: kill the halo row when
    # this is the top row-block of its image (grid axis 1 = row-block index).
    keep = (pl.program_id(1) > 0).astype(jnp.float32)
    halo = (h[0:1] * keep).astype(bf16)               # (1,  W, C2)
    main = h[1:].astype(bf16)                         # (TH, W, C2)

    # ---- stage 2: mask-'B' 3x3 conv as one packed matmul over the 5 taps ---
    zcol = jnp.zeros((th + 1, 1, c2), bf16)
    h2p = jnp.concatenate(
        [zcol, jnp.concatenate([halo, main], axis=0), zcol], axis=1)
    hcat = jnp.concatenate(
        [h2p[ky:ky + th, kx:kx + w] for (ky, kx) in _TAPS],
        axis=-1).reshape(th * w, 5 * c2)

    s = jnp.dot(hcat, w3_ref[...],
                preferred_element_type=jnp.float32) + c3_ref[...]
    s = jnp.maximum(_layer_norm(s, g3_ref[...], b3_ref[...]), 0.0)
    s = jnp.dot(s.astype(bf16), w4_ref[...],
                preferred_element_type=jnp.float32) + c4_ref[...]

    # Residual add in f32.
    o_ref[...] = x + s.reshape(th, w, c)


def _row_block(h, w, c, batch, vmem_budget_bytes=12 << 20):
    """Largest divisor of H whose (rows x W) tile fits the VMEM budget."""
    # ~32*C bytes of VMEM live per pixel per grid step (double-buffered f32
    # I/O tiles plus f32/bf16 intermediates).
    target_px = max(w, vmem_budget_bytes // (32 * c))
    best = 1
    for th in range(1, h + 1):
        if h % th == 0 and th * w <= target_px:
            best = th
    # v7x has 2 TensorCores: keep at least two parallel grid steps.
    while batch * (h // best) < 2 and best % 2 == 0:
        best //= 2
    return best


def _const_spec(shape):
    # Full-array block, resident in VMEM across all grid steps.
    return pl.BlockSpec(shape, lambda b, j: (0,) * len(shape))


@functools.partial(jax.jit, static_argnums=(2,))
def _forward(x_nchw, p, row_block):
    b, c, hh, ww = x_nchw.shape
    half = c // 2
    kdim = 5 * half
    bf16 = jnp.bfloat16
    th = int(row_block)
    nblk = hh // th

    x = jnp.transpose(x_nchw, (0, 2, 3, 1)).astype(jnp.float32)   # NHWC

    # Tiny side input: image row (j*TH - 1) for every row-block j (zeros for
    # j == 0); the kernel recomputes its single stage-1 halo row from it.
    zero_row = jnp.zeros((b, 1, ww, c), jnp.float32)
    if nblk > 1:
        halo = jnp.concatenate([zero_row, x[:, th - 1:hh - 1:th]], axis=1)
    else:
        halo = zero_row

    n_px = b * hh * ww
    cost = pl.CostEstimate(
        flops=int(n_px * (2 * c * half + 10 * half * half + 2 * half * c
                          + 16 * c + 24 * half)),
        transcendentals=int(3 * n_px),
        bytes_accessed=int(4 * (2 * n_px * c + b * nblk * ww * c)
                           + 2 * (c * half + kdim * half + half * c)),
    )

    y = pl.pallas_call(
        _fused_kernel,
        out_shape=jax.ShapeDtypeStruct((b, hh, ww, c), jnp.float32),
        grid=(b, nblk),
        in_specs=[
            pl.BlockSpec((None, th, ww, c), lambda bi, j: (bi, j, 0, 0)),
            pl.BlockSpec((None, 1, ww, c), lambda bi, j: (bi, j, 0, 0)),
            _const_spec((1, c)), _const_spec((1, c)),
            _const_spec((c, half)), _const_spec((1, half)),
            _const_spec((1, half)), _const_spec((1, half)),
            _const_spec((kdim, half)), _const_spec((1, half)),
            _const_spec((1, half)), _const_spec((1, half)),
            _const_spec((half, c)), _const_spec((1, c)),
        ],
        out_specs=pl.BlockSpec((None, th, ww, c), lambda bi, j: (bi, j, 0, 0)),
        input_output_aliases={0: 0},
        compiler_params=pltpu.CompilerParams(
            dimension_semantics=("parallel", "parallel"),
            vmem_limit_bytes=32 * 1024 * 1024),
        cost_estimate=cost,
    )(x, halo,
      p["ln1_g"], p["ln1_b"], p["w1"].astype(bf16), p["c1"],
      p["ln2_g"], p["ln2_b"], p["w3_cat"].astype(bf16), p["c3"],
      p["ln3_g"], p["ln3_b"], p["w4"].astype(bf16), p["c4"])

    return jnp.transpose(y, (0, 3, 1, 2))


class PixelCNNResBlock:
    """JAX/Pallas port of the PyTorch PixelCNNResBlock (forward pass only)."""

    def __init__(self, dim, key):
        assert dim % 2 == 0
        self.dim = dim
        half = dim // 2
        ks = jax.random.split(key, 12)

        def uni(k, shape, fan_in):
            bound = 1.0 / float(fan_in) ** 0.5
            return jax.random.uniform(k, shape, jnp.float32, -bound, bound)

        # LayerNorm affine params (PyTorch inits 1/0; use non-trivial values so
        # the affine path is exercised by the self-test).
        self.ln1_g = 1.0 + 0.1 * jax.random.normal(ks[0], (1, dim), jnp.float32)
        self.ln1_b = 0.05 * jax.random.normal(ks[1], (1, dim), jnp.float32)
        self.ln2_g = 1.0 + 0.1 * jax.random.normal(ks[2], (1, half), jnp.float32)
        self.ln2_b = 0.05 * jax.random.normal(ks[3], (1, half), jnp.float32)
        self.ln3_g = 1.0 + 0.1 * jax.random.normal(ks[4], (1, half), jnp.float32)
        self.ln3_b = 0.05 * jax.random.normal(ks[5], (1, half), jnp.float32)
        # MaskConv2d('B', dim, dim//2, 1): a 1x1 'B'-masked conv is dense.
        self.w1 = uni(ks[6], (dim, half), dim)                 # (Cin, Cout)
        self.c1 = uni(ks[7], (1, half), dim)
        # MaskConv2d('B', dim//2, dim//2, 3, padding=1): weights kept in HWIO.
        self.w3_hwio = uni(ks[8], (3, 3, half, half), half * 9)
        self.c3 = uni(ks[9], (1, half), half * 9)
        # MaskConv2d('B', dim//2, dim, 1).
        self.w4 = uni(ks[10], (half, dim), half)
        self.c4 = uni(ks[11], (1, dim), half)
        # Pack the 5 active mask-'B' taps into one (5*half, half) matmul weight
        # (same tap order as the in-kernel window gather).
        self.w3_cat = jnp.concatenate(
            [self.w3_hwio[ky, kx] for (ky, kx) in _TAPS], axis=0)

    def params(self):
        return {
            "ln1_g": self.ln1_g, "ln1_b": self.ln1_b,
            "ln2_g": self.ln2_g, "ln2_b": self.ln2_b,
            "ln3_g": self.ln3_g, "ln3_b": self.ln3_b,
            "w1": self.w1, "c1": self.c1,
            "w3_hwio": self.w3_hwio, "w3_cat": self.w3_cat, "c3": self.c3,
            "w4": self.w4, "c4": self.c4,
        }

    def __call__(self, x):
        b, c, hh, ww = x.shape
        return _forward(x, self.params(), _row_block(hh, ww, c, b))


def _reference_forward(x_nchw, p):
    """Straightforward JAX/NHWC reference (lax.conv for the masked 3x3)."""
    x = jnp.transpose(x_nchw, (0, 2, 3, 1)).astype(jnp.float32)

    def ln(t, g, b):
        mu = jnp.mean(t, axis=-1, keepdims=True)
        var = jnp.mean(jnp.square(t - mu), axis=-1, keepdims=True)
        return (t - mu) / jnp.sqrt(var + _LN_EPS) * g + b

    h = jax.nn.relu(ln(x, p["ln1_g"], p["ln1_b"]))
    h = jnp.dot(h, p["w1"], precision=_HI) + p["c1"]
    h = jax.nn.relu(ln(h, p["ln2_g"], p["ln2_b"]))
    mask = jnp.zeros((3, 3, 1, 1), jnp.float32)
    for (ky, kx) in _TAPS:
        mask = mask.at[ky, kx].set(1.0)
    h = jax.lax.conv_general_dilated(
        h, p["w3_hwio"] * mask, window_strides=(1, 1), padding="SAME",
        dimension_numbers=("NHWC", "HWIO", "NHWC"), precision=_HI) + p["c3"]
    h = jax.nn.relu(ln(h, p["ln3_g"], p["ln3_b"]))
    h = jnp.dot(h, p["w4"], precision=_HI) + p["c4"]
    return x_nchw.astype(jnp.float32) + jnp.transpose(h, (0, 3, 1, 2))


if __name__ == "__main__":
    root = jax.random.PRNGKey(0)

    def check(y, y_ref, tag):
        diff = jnp.abs(y - y_ref)
        # bf16 MXU operands (f32 accumulation) vs. an f32 HIGHEST-precision
        # reference: allow a modest elementwise tolerance plus a tight mean.
        ok_elem = bool(jnp.all(diff <= 1e-1 + 5e-2 * jnp.abs(y_ref)))
        ok_mean = bool(jnp.mean(diff) < 2e-2)
        assert ok_elem and ok_mean, (
            f"{tag}: Pallas PixelCNNResBlock mismatch "
            f"(max={float(jnp.max(diff)):.4f}, mean={float(jnp.mean(diff)):.5f})")

    B, DIM, H, W = 2, 128, 16, 16
    k_param, k_x = jax.random.split(root)
    block = PixelCNNResBlock(DIM, k_param)
    x = jax.random.normal(k_x, (B, DIM, H, W), dtype=jnp.float32)

    # Case 1: default tiling (whole image per row-block, zero halo path).
    y = block(x)
    jax.block_until_ready(y)
    assert y.shape == (B, DIM, H, W)
    y_ref = _reference_forward(x, block.params())
    check(y, y_ref, "whole-image tile")

    # Case 2: force multiple row-blocks per image so the in-kernel halo-row
    # recompute (and its zero top padding) is exercised.
    y2 = _forward(x, block.params(), 8)
    jax.block_until_ready(y2)
    check(y2, y_ref, "row-block halo tile")

    print("KERNEL_OK")
</pallas_src>

<mosaic_0001>
module attributes {stable_mosaic.version = 11 : i64} {
  func.func @_fused_kernel(%arg0: i32, %arg1: i32, %arg2: memref<1x16x16x128xf32, #tpu.memory_space<vmem>>, %arg3: memref<1x1x16x128xf32, #tpu.memory_space<vmem>>, %arg4: memref<1x128xf32, #tpu.memory_space<vmem>>, %arg5: memref<1x128xf32, #tpu.memory_space<vmem>>, %arg6: memref<128x64xbf16, #tpu.memory_space<vmem>>, %arg7: memref<1x64xf32, #tpu.memory_space<vmem>>, %arg8: memref<1x64xf32, #tpu.memory_space<vmem>>, %arg9: memref<1x64xf32, #tpu.memory_space<vmem>>, %arg10: memref<320x64xbf16, #tpu.memory_space<vmem>>, %arg11: memref<1x64xf32, #tpu.memory_space<vmem>>, %arg12: memref<1x64xf32, #tpu.memory_space<vmem>>, %arg13: memref<1x64xf32, #tpu.memory_space<vmem>>, %arg14: memref<64x128xbf16, #tpu.memory_space<vmem>>, %arg15: memref<1x128xf32, #tpu.memory_space<vmem>>, %arg16: memref<1x16x16x128xf32, #tpu.memory_space<vmem>>) attributes {dimension_semantics = [#tpu.dimension_semantics<parallel>, #tpu.dimension_semantics<parallel>], iteration_bounds = array<i64: 2, 1>, scalar_prefetch = 0 : i64, scratch_operands = 0 : i64, tpu.core_type = #tpu.core_type<tc>, window_params = [{transform_indices = @transform_0, window_bounds = array<i64: 1, 16, 16, 128>}, {transform_indices = @transform_1, window_bounds = array<i64: 1, 1, 16, 128>}, {pipeline_mode = #tpu.pipeline_mode<synchronous>, transform_indices = @transform_2, window_bounds = array<i64: 1, 128>}, {pipeline_mode = #tpu.pipeline_mode<synchronous>, transform_indices = @transform_3, window_bounds = array<i64: 1, 128>}, {pipeline_mode = #tpu.pipeline_mode<synchronous>, transform_indices = @transform_4, window_bounds = array<i64: 128, 64>}, {pipeline_mode = #tpu.pipeline_mode<synchronous>, transform_indices = @transform_5, window_bounds = array<i64: 1, 64>}, {pipeline_mode = #tpu.pipeline_mode<synchronous>, transform_indices = @transform_6, window_bounds = array<i64: 1, 64>}, {pipeline_mode = #tpu.pipeline_mode<synchronous>, transform_indices = @transform_7, window_bounds = array<i64: 1, 64>}, {pipeline_mode = #tpu.pipeline_mode<synchronous>, transform_indices = @transform_8, window_bounds = array<i64: 320, 64>}, {pipeline_mode = #tpu.pipeline_mode<synchronous>, transform_indices = @transform_9, window_bounds = array<i64: 1, 64>}, {pipeline_mode = #tpu.pipeline_mode<synchronous>, transform_indices = @transform_10, window_bounds = array<i64: 1, 64>}, {pipeline_mode = #tpu.pipeline_mode<synchronous>, transform_indices = @transform_11, window_bounds = array<i64: 1, 64>}, {pipeline_mode = #tpu.pipeline_mode<synchronous>, transform_indices = @transform_12, window_bounds = array<i64: 64, 128>}, {pipeline_mode = #tpu.pipeline_mode<synchronous>, transform_indices = @transform_13, window_bounds = array<i64: 1, 128>}, {transform_indices = @transform_14, window_bounds = array<i64: 1, 16, 16, 128>}]} {
    %c0 = arith.constant 0 : index
    %c0_0 = arith.constant 0 : index
    %c0_1 = arith.constant 0 : index
    %c0_2 = arith.constant 0 : index
    %0 = vector.load %arg2[%c0, %c0_0, %c0_1, %c0_2] : memref<1x16x16x128xf32, #tpu.memory_space<vmem>>, vector<1x16x16x128xf32>
    %1 = vector.shape_cast %0 : vector<1x16x16x128xf32> to vector<16x16x128xf32>
    %c0_3 = arith.constant 0 : index
    %c0_4 = arith.constant 0 : index
    %c0_5 = arith.constant 0 : index
    %c0_6 = arith.constant 0 : index
    %2 = vector.load %arg3[%c0_3, %c0_4, %c0_5, %c0_6] : memref<1x1x16x128xf32, #tpu.memory_space<vmem>>, vector<1x1x16x128xf32>
    %3 = vector.shape_cast %2 : vector<1x1x16x128xf32> to vector<1x16x128xf32>
    %4 = tpu.concatenate %3, %1 in 0 : vector<1x16x128xf32>, vector<16x16x128xf32> -> vector<17x16x128xf32>
    %5 = vector.shape_cast %4 : vector<17x16x128xf32> to vector<272x128xf32>
    %c0_7 = arith.constant 0 : index
    %c0_8 = arith.constant 0 : index
    %6 = vector.load %arg4[%c0_7, %c0_8] : memref<1x128xf32, #tpu.memory_space<vmem>>, vector<1x128xf32>
    %c0_9 = arith.constant 0 : index
    %c0_10 = arith.constant 0 : index
    %7 = vector.load %arg5[%c0_9, %c0_10] : memref<1x128xf32, #tpu.memory_space<vmem>>, vector<1x128xf32>
    %cst = arith.constant dense<0.000000e+00> : vector<272xf32>
    %8 = vector.multi_reduction <add>, %5, %cst [1] : vector<272x128xf32> to vector<272xf32>
    %9 = vector.shape_cast %8 : vector<272xf32> to vector<272x1xf32>
    %cst_11 = arith.constant 1.280000e+02 : f32
    %10 = vector.broadcast %cst_11 : f32 to vector<272x1xf32>
    %11 = arith.divf %9, %10 : vector<272x1xf32>
    %12 = arith.mulf %5, %5 : vector<272x128xf32>
    %cst_12 = arith.constant dense<0.000000e+00> : vector<272xf32>
    %13 = vector.multi_reduction <add>, %12, %cst_12 [1] : vector<272x128xf32> to vector<272xf32>
    %14 = vector.shape_cast %13 : vector<272xf32> to vector<272x1xf32>
    %cst_13 = arith.constant 1.280000e+02 : f32
    %15 = vector.broadcast %cst_13 : f32 to vector<272x1xf32>
    %16 = arith.divf %14, %15 : vector<272x1xf32>
    %17 = arith.mulf %11, %11 : vector<272x1xf32>
    %18 = arith.subf %16, %17 : vector<272x1xf32>
    %cst_14 = arith.constant 0.000000e+00 : f32
    %19 = vector.broadcast %cst_14 : f32 to vector<272x1xf32>
    %20 = arith.maximumf %18, %19 : vector<272x1xf32>
    %21 = vector.broadcast %11 : vector<272x1xf32> to vector<272x128xf32>
    %22 = arith.subf %5, %21 : vector<272x128xf32>
    %cst_15 = arith.constant 9.99999974E-6 : f32
    %23 = vector.broadcast %cst_15 : f32 to vector<272x1xf32>
    %24 = arith.addf %20, %23 : vector<272x1xf32>
    %25 = math.rsqrt %24 : vector<272x1xf32>
    %26 = vector.broadcast %25 : vector<272x1xf32> to vector<272x128xf32>
    %27 = arith.mulf %22, %26 : vector<272x128xf32>
    %28 = vector.broadcast %6 : vector<1x128xf32> to vector<272x128xf32>
    %29 = arith.mulf %27, %28 : vector<272x128xf32>
    %30 = vector.broadcast %7 : vector<1x128xf32> to vector<272x128xf32>
    %31 = arith.addf %29, %30 : vector<272x128xf32>
    %cst_16 = arith.constant 0.000000e+00 : f32
    %32 = vector.broadcast %cst_16 : f32 to vector<272x128xf32>
    %33 = arith.maximumf %31, %32 : vector<272x128xf32>
    %34 = arith.truncf %33 : vector<272x128xf32> to vector<272x128xbf16>
    %c0_17 = arith.constant 0 : index
    %c0_18 = arith.constant 0 : index
    %35 = vector.load %arg6[%c0_17, %c0_18] : memref<128x64xbf16, #tpu.memory_space<vmem>>, vector<128x64xbf16>
    %cst_19 = arith.constant dense<0.000000e+00> : vector<272x64xf32>
    %36 = tpu.matmul %34, %35, %cst_19 {dimension_numbers = #tpu.dot_dimension_numbers<[1], [0], [0], [1], [0, 0, 1, 1], [], []>} : vector<272x128xbf16>, vector<128x64xbf16>, vector<272x64xf32> -> vector<272x64xf32>
    %c0_20 = arith.constant 0 : index
    %c0_21 = arith.constant 0 : index
    %37 = vector.load %arg7[%c0_20, %c0_21] : memref<1x64xf32, #tpu.memory_space<vmem>>, vector<1x64xf32>
    %38 = vector.broadcast %37 : vector<1x64xf32> to vector<272x64xf32>
    %39 = arith.addf %36, %38 : vector<272x64xf32>
    %c0_22 = arith.constant 0 : index
    %c0_23 = arith.constant 0 : index
    %40 = vector.load %arg8[%c0_22, %c0_23] : memref<1x64xf32, #tpu.memory_space<vmem>>, vector<1x64xf32>
    %c0_24 = arith.constant 0 : index
    %c0_25 = arith.constant 0 : index
    %41 = vector.load %arg9[%c0_24, %c0_25] : memref<1x64xf32, #tpu.memory_space<vmem>>, vector<1x64xf32>
    %cst_26 = arith.constant dense<0.000000e+00> : vector<272xf32>
    %42 = vector.multi_reduction <add>, %39, %cst_26 [1] : vector<272x64xf32> to vector<272xf32>
    %43 = vector.shape_cast %42 : vector<272xf32> to vector<272x1xf32>
    %cst_27 = arith.constant 6.400000e+01 : f32
    %44 = vector.broadcast %cst_27 : f32 to vector<272x1xf32>
    %45 = arith.divf %43, %44 : vector<272x1xf32>
    %46 = arith.mulf %39, %39 : vector<272x64xf32>
    %cst_28 = arith.constant dense<0.000000e+00> : vector<272xf32>
    %47 = vector.multi_reduction <add>, %46, %cst_28 [1] : vector<272x64xf32> to vector<272xf32>
    %48 = vector.shape_cast %47 : vector<272xf32> to vector<272x1xf32>
    %cst_29 = arith.constant 6.400000e+01 : f32
    %49 = vector.broadcast %cst_29 : f32 to vector<272x1xf32>
    %50 = arith.divf %48, %49 : vector<272x1xf32>
    %51 = arith.mulf %45, %45 : vector<272x1xf32>
    %52 = arith.subf %50, %51 : vector<272x1xf32>
    %cst_30 = arith.constant 0.000000e+00 : f32
    %53 = vector.broadcast %cst_30 : f32 to vector<272x1xf32>
    %54 = arith.maximumf %52, %53 : vector<272x1xf32>
    %55 = vector.broadcast %45 : vector<272x1xf32> to vector<272x64xf32>
    %56 = arith.subf %39, %55 : vector<272x64xf32>
    %cst_31 = arith.constant 9.99999974E-6 : f32
    %57 = vector.broadcast %cst_31 : f32 to vector<272x1xf32>
    %58 = arith.addf %54, %57 : vector<272x1xf32>
    %59 = math.rsqrt %58 : vector<272x1xf32>
    %60 = vector.broadcast %59 : vector<272x1xf32> to vector<272x64xf32>
    %61 = arith.mulf %56, %60 : vector<272x64xf32>
    %62 = vector.broadcast %40 : vector<1x64xf32> to vector<272x64xf32>
    %63 = arith.mulf %61, %62 : vector<272x64xf32>
    %64 = vector.broadcast %41 : vector<1x64xf32> to vector<272x64xf32>
    %65 = arith.addf %63, %64 : vector<272x64xf32>
    %cst_32 = arith.constant 0.000000e+00 : f32
    %66 = vector.broadcast %cst_32 : f32 to vector<272x64xf32>
    %67 = arith.maximumf %65, %66 : vector<272x64xf32>
    %68 = vector.shape_cast %67 : vector<272x64xf32> to vector<17x16x64xf32>
    %c0_i32 = arith.constant 0 : i32
    %69 = arith.cmpi sgt, %arg1, %c0_i32 : i32
    %70 = arith.extui %69 : i1 to i32
    %71 = arith.sitofp %70 : i32 to f32
    %72 = vector.extract_strided_slice %68 {offsets = [0, 0, 0], sizes = [1, 16, 64], strides = [1, 1, 1]} : vector<17x16x64xf32> to vector<1x16x64xf32>
    %73 = vector.broadcast %71 : f32 to vector<1x16x64xf32>
    %74 = arith.mulf %72, %73 : vector<1x16x64xf32>
    %75 = arith.truncf %74 : vector<1x16x64xf32> to vector<1x16x64xbf16>
    %76 = vector.extract_strided_slice %68 {offsets = [1, 0, 0], sizes = [16, 16, 64], strides = [1, 1, 1]} : vector<17x16x64xf32> to vector<16x16x64xf32>
    %77 = arith.truncf %76 : vector<16x16x64xf32> to vector<16x16x64xbf16>
    %cst_33 = arith.constant 0.000000e+00 : bf16
    %78 = vector.broadcast %cst_33 : bf16 to vector<17x1x64xbf16>
    %79 = tpu.concatenate %75, %77 in 0 : vector<1x16x64xbf16>, vector<16x16x64xbf16> -> vector<17x16x64xbf16>
    %80 = tpu.concatenate %78, %79, %78 in 1 : vector<17x1x64xbf16>, vector<17x16x64xbf16>, vector<17x1x64xbf16> -> vector<17x18x64xbf16>
    %81 = vector.extract_strided_slice %80 {offsets = [0, 0, 0], sizes = [16, 16, 64], strides = [1, 1, 1]} : vector<17x18x64xbf16> to vector<16x16x64xbf16>
    %82 = vector.extract_strided_slice %80 {offsets = [0, 1, 0], sizes = [16, 16, 64], strides = [1, 1, 1]} : vector<17x18x64xbf16> to vector<16x16x64xbf16>
    %83 = vector.extract_strided_slice %80 {offsets = [0, 2, 0], sizes = [16, 16, 64], strides = [1, 1, 1]} : vector<17x18x64xbf16> to vector<16x16x64xbf16>
    %84 = vector.extract_strided_slice %80 {offsets = [1, 0, 0], sizes = [16, 16, 64], strides = [1, 1, 1]} : vector<17x18x64xbf16> to vector<16x16x64xbf16>
    %85 = vector.extract_strided_slice %80 {offsets = [1, 1, 0], sizes = [16, 16, 64], strides = [1, 1, 1]} : vector<17x18x64xbf16> to vector<16x16x64xbf16>
    %86 = tpu.concatenate %81, %82, %83, %84, %85 in 2 : vector<16x16x64xbf16>, vector<16x16x64xbf16>, vector<16x16x64xbf16>, vector<16x16x64xbf16>, vector<16x16x64xbf16> -> vector<16x16x320xbf16>
    %87 = vector.shape_cast %86 : vector<16x16x320xbf16> to vector<256x320xbf16>
    %c0_34 = arith.constant 0 : index
    %c0_35 = arith.constant 0 : index
    %88 = vector.load %arg10[%c0_34, %c0_35] : memref<320x64xbf16, #tpu.memory_space<vmem>>, vector<320x64xbf16>
    %cst_36 = arith.constant dense<0.000000e+00> : vector<256x64xf32>
    %89 = tpu.matmul %87, %88, %cst_36 {dimension_numbers = #tpu.dot_dimension_numbers<[1], [0], [0], [1], [0, 0, 1, 1], [], []>} : vector<256x320xbf16>, vector<320x64xbf16>, vector<256x64xf32> -> vector<256x64xf32>
    %c0_37 = arith.constant 0 : index
    %c0_38 = arith.constant 0 : index
    %90 = vector.load %arg11[%c0_37, %c0_38] : memref<1x64xf32, #tpu.memory_space<vmem>>, vector<1x64xf32>
    %91 = vector.broadcast %90 : vector<1x64xf32> to vector<256x64xf32>
    %92 = arith.addf %89, %91 : vector<256x64xf32>
    %c0_39 = arith.constant 0 : index
    %c0_40 = arith.constant 0 : index
    %93 = vector.load %arg12[%c0_39, %c0_40] : memref<1x64xf32, #tpu.memory_space<vmem>>, vector<1x64xf32>
    %c0_41 = arith.constant 0 : index
    %c0_42 = arith.constant 0 : index
    %94 = vector.load %arg13[%c0_41, %c0_42] : memref<1x64xf32, #tpu.memory_space<vmem>>, vector<1x64xf32>
    %cst_43 = arith.constant dense<0.000000e+00> : vector<256xf32>
    %95 = vector.multi_reduction <add>, %92, %cst_43 [1] : vector<256x64xf32> to vector<256xf32>
    %96 = vector.shape_cast %95 : vector<256xf32> to vector<256x1xf32>
    %cst_44 = arith.constant 6.400000e+01 : f32
    %97 = vector.broadcast %cst_44 : f32 to vector<256x1xf32>
    %98 = arith.divf %96, %97 : vector<256x1xf32>
    %99 = arith.mulf %92, %92 : vector<256x64xf32>
    %cst_45 = arith.constant dense<0.000000e+00> : vector<256xf32>
    %100 = vector.multi_reduction <add>, %99, %cst_45 [1] : vector<256x64xf32> to vector<256xf32>
    %101 = vector.shape_cast %100 : vector<256xf32> to vector<256x1xf32>
    %cst_46 = arith.constant 6.400000e+01 : f32
    %102 = vector.broadcast %cst_46 : f32 to vector<256x1xf32>
    %103 = arith.divf %101, %102 : vector<256x1xf32>
    %104 = arith.mulf %98, %98 : vector<256x1xf32>
    %105 = arith.subf %103, %104 : vector<256x1xf32>
    %cst_47 = arith.constant 0.000000e+00 : f32
    %106 = vector.broadcast %cst_47 : f32 to vector<256x1xf32>
    %107 = arith.maximumf %105, %106 : vector<256x1xf32>
    %108 = vector.broadcast %98 : vector<256x1xf32> to vector<256x64xf32>
    %109 = arith.subf %92, %108 : vector<256x64xf32>
    %cst_48 = arith.constant 9.99999974E-6 : f32
    %110 = vector.broadcast %cst_48 : f32 to vector<256x1xf32>
    %111 = arith.addf %107, %110 : vector<256x1xf32>
    %112 = math.rsqrt %111 : vector<256x1xf32>
    %113 = vector.broadcast %112 : vector<256x1xf32> to vector<256x64xf32>
    %114 = arith.mulf %109, %113 : vector<256x64xf32>
    %115 = vector.broadcast %93 : vector<1x64xf32> to vector<256x64xf32>
    %116 = arith.mulf %114, %115 : vector<256x64xf32>
    %117 = vector.broadcast %94 : vector<1x64xf32> to vector<256x64xf32>
    %118 = arith.addf %116, %117 : vector<256x64xf32>
    %cst_49 = arith.constant 0.000000e+00 : f32
    %119 = vector.broadcast %cst_49 : f32 to vector<256x64xf32>
    %120 = arith.maximumf %118, %119 : vector<256x64xf32>
    %121 = arith.truncf %120 : vector<256x64xf32> to vector<256x64xbf16>
    %c0_50 = arith.constant 0 : index
    %c0_51 = arith.constant 0 : index
    %122 = vector.load %arg14[%c0_50, %c0_51] : memref<64x128xbf16, #tpu.memory_space<vmem>>, vector<64x128xbf16>
    %cst_52 = arith.constant dense<0.000000e+00> : vector<256x128xf32>
    %123 = tpu.matmul %121, %122, %cst_52 {dimension_numbers = #tpu.dot_dimension_numbers<[1], [0], [0], [1], [0, 0, 1, 1], [], []>} : vector<256x64xbf16>, vector<64x128xbf16>, vector<256x128xf32> -> vector<256x128xf32>
    %c0_53 = arith.constant 0 : index
    %c0_54 = arith.constant 0 : index
    %124 = vector.load %arg15[%c0_53, %c0_54] : memref<1x128xf32, #tpu.memory_space<vmem>>, vector<1x128xf32>
    %125 = vector.broadcast %124 : vector<1x128xf32> to vector<256x128xf32>
    %126 = arith.addf %123, %125 : vector<256x128xf32>
    %127 = vector.shape_cast %126 : vector<256x128xf32> to vector<16x16x128xf32>
    %128 = arith.addf %1, %127 : vector<16x16x128xf32>
    %c0_55 = arith.constant 0 : index
    %c0_56 = arith.constant 0 : index
    %c0_57 = arith.constant 0 : index
    %c0_58 = arith.constant 0 : index
    %129 = vector.load %arg16[%c0_55, %c0_56, %c0_57, %c0_58] : memref<1x16x16x128xf32, #tpu.memory_space<vmem>>, vector<1x16x16x128xf32>
    %130 = vector.shape_cast %129 : vector<1x16x16x128xf32> to vector<16x16x128xf32>
    %131 = vector.shape_cast %128 : vector<16x16x128xf32> to vector<1x16x16x128xf32>
    tpu.vector_store %arg16[%c0_55, %c0_56, %c0_57, %c0_58], %131 {strides = array<i32>} : memref<1x16x16x128xf32, #tpu.memory_space<vmem>>, vector<1x16x16x128xf32>,
    return
  }
  func.func @transform_0(%arg0: i32, %arg1: i32) -> (i32, i32, i32, i32) {
    %c0_i32 = arith.constant 0 : i32
    %c0_i32_0 = arith.constant 0 : i32
    %c0_i32_1 = arith.constant 0 : i32
    return %arg0, %arg1, %c0_i32, %c0_i32_0 : i32, i32, i32, i32
  }
  func.func @transform_1(%arg0: i32, %arg1: i32) -> (i32, i32, i32, i32) {
    %c0_i32 = arith.constant 0 : i32
    %c0_i32_0 = arith.constant 0 : i32
    %c0_i32_1 = arith.constant 0 : i32
    return %arg0, %arg1, %c0_i32, %c0_i32_0 : i32, i32, i32, i32
  }
  func.func @transform_2(%arg0: i32, %arg1: i32) -> (i32, i32) {
    %c0_i32 = arith.constant 0 : i32
    %c0_i32_0 = arith.constant 0 : i32
    %c0_i32_1 = arith.constant 0 : i32
    return %c0_i32, %c0_i32_0 : i32, i32
  }
  func.func @transform_3(%arg0: i32, %arg1: i32) -> (i32, i32) {
    %c0_i32 = arith.constant 0 : i32
    %c0_i32_0 = arith.constant 0 : i32
    %c0_i32_1 = arith.constant 0 : i32
    return %c0_i32, %c0_i32_0 : i32, i32
  }
  func.func @transform_4(%arg0: i32, %arg1: i32) -> (i32, i32) {
    %c0_i32 = arith.constant 0 : i32
    %c0_i32_0 = arith.constant 0 : i32
    %c0_i32_1 = arith.constant 0 : i32
    return %c0_i32, %c0_i32_0 : i32, i32
  }
  func.func @transform_5(%arg0: i32, %arg1: i32) -> (i32, i32) {
    %c0_i32 = arith.constant 0 : i32
    %c0_i32_0 = arith.constant 0 : i32
    %c0_i32_1 = arith.constant 0 : i32
    return %c0_i32, %c0_i32_0 : i32, i32
  }
  func.func @transform_6(%arg0: i32, %arg1: i32) -> (i32, i32) {
    %c0_i32 = arith.constant 0 : i32
    %c0_i32_0 = arith.constant 0 : i32
    %c0_i32_1 = arith.constant 0 : i32
    return %c0_i32, %c0_i32_0 : i32, i32
  }
  func.func @transform_7(%arg0: i32, %arg1: i32) -> (i32, i32) {
    %c0_i32 = arith.constant 0 : i32
    %c0_i32_0 = arith.constant 0 : i32
    %c0_i32_1 = arith.constant 0 : i32
    return %c0_i32, %c0_i32_0 : i32, i32
  }
  func.func @transform_8(%arg0: i32, %arg1: i32) -> (i32, i32) {
    %c0_i32 = arith.constant 0 : i32
    %c0_i32_0 = arith.constant 0 : i32
    %c0_i32_1 = arith.constant 0 : i32
    return %c0_i32, %c0_i32_0 : i32, i32
  }
  func.func @transform_9(%arg0: i32, %arg1: i32) -> (i32, i32) {
    %c0_i32 = arith.constant 0 : i32
    %c0_i32_0 = arith.constant 0 : i32
    %c0_i32_1 = arith.constant 0 : i32
    return %c0_i32, %c0_i32_0 : i32, i32
  }
  func.func @transform_10(%arg0: i32, %arg1: i32) -> (i32, i32) {
    %c0_i32 = arith.constant 0 : i32
    %c0_i32_0 = arith.constant 0 : i32
    %c0_i32_1 = arith.constant 0 : i32
    return %c0_i32, %c0_i32_0 : i32, i32
  }
  func.func @transform_11(%arg0: i32, %arg1: i32) -> (i32, i32) {
    %c0_i32 = arith.constant 0 : i32
    %c0_i32_0 = arith.constant 0 : i32
    %c0_i32_1 = arith.constant 0 : i32
    return %c0_i32, %c0_i32_0 : i32, i32
  }
  func.func @transform_12(%arg0: i32, %arg1: i32) -> (i32, i32) {
    %c0_i32 = arith.constant 0 : i32
    %c0_i32_0 = arith.constant 0 : i32
    %c0_i32_1 = arith.constant 0 : i32
    return %c0_i32, %c0_i32_0 : i32, i32
  }
  func.func @transform_13(%arg0: i32, %arg1: i32) -> (i32, i32) {
    %c0_i32 = arith.constant 0 : i32
    %c0_i32_0 = arith.constant 0 : i32
    %c0_i32_1 = arith.constant 0 : i32
    return %c0_i32, %c0_i32_0 : i32, i32
  }
  func.func @transform_14(%arg0: i32, %arg1: i32) -> (i32, i32, i32, i32) {
    %c0_i32 = arith.constant 0 : i32
    %c0_i32_0 = arith.constant 0 : i32
    %c0_i32_1 = arith.constant 0 : i32
    return %arg0, %arg1, %c0_i32, %c0_i32_0 : i32, i32, i32, i32
  }
}

</mosaic_0001>

<bundles_post_ra>
// kernel: _forward.1
= control target key start
LH: loop header
LB: loop body
LE: loop exit
PB: predicated region body
PF: predicated region fallthrough
CT: control target
= control target key end

     0   :  { %s5173_s29 = smov 0   ;;  %s5175_s30 = smov 0   ;;  %s7678_s0 = inlined_call_operand.vmem [shape: f32[2,16,16,128], index: 0, kind: input, shape index: {}, may-alias: {0,14}]   ;;  %s7679_s1 = inlined_call_operand.vmem [shape: f32[2,1,16,128], index: 1, kind: input, shape index: {}]   ;;  %s7680_s2 = inlined_call_operand.vmem [shape: f32[1,128], index: 2, kind: input, shape index: {}]   ;;  %s7681_s3 = inlined_call_operand.vmem [shape: f32[1,128], index: 3, kind: input, shape index: {}]   ;;  %s7682_s4 = inlined_call_operand.vmem [shape: bf16[128,64], index: 4, kind: input, shape index: {}]   ;;  %s7683_s5 = inlined_call_operand.vmem [shape: f32[1,64], index: 5, kind: input, shape index: {}]   ;;  %s7684_s6 = inlined_call_operand.vmem [shape: f32[1,64], index: 6, kind: input, shape index: {}]   ;;  %s7685_s7 = inlined_call_operand.vmem [shape: f32[1,64], index: 7, kind: input, shape index: {}]   ;;  %s7686_s8 = inlined_call_operand.vmem [shape: bf16[320,64], index: 8, kind: input, shape index: {}]   ;;  %s7687_s9 = inlined_call_operand.vmem [shape: f32[1,64], index: 9, kind: input, shape index: {}]   ;;  %s7688_s10 = inlined_call_operand.vmem [shape: f32[1,64], index: 10, kind: input, shape index: {}]   ;;  %s7689_s11 = inlined_call_operand.vmem [shape: f32[1,64], index: 11, kind: input, shape index: {}]   ;;  %s7690_s12 = inlined_call_operand.vmem [shape: bf16[64,128], index: 12, kind: input, shape index: {}]   ;;  %s7691_s13 = inlined_call_operand.vmem [shape: f32[1,128], index: 13, kind: input, shape index: {}]   ;;  %s7692_s14 = inlined_call_operand.vmem [shape: f32[2,16,16,128], index: 14, kind: output, shape index: {}, may-alias: {0,14}]  }
   0x1   :  { %s5177_s15 = smov 0  }
   0x2 LB: > { %s36_s16 = sadd.s32 1, %s5089_s30  ;;  %p4377_p0 = scmp.ge.s32.totalorder %s5093_s15, 1  ;;  %s5093_s15 = sphi %s5177_s15, %s24_s15   ;;  %s5089_s30 = sphi %s5175_s30, %s7834_s30   ;;  %s5085_s29 = sphi %s5173_s29, %s7833_s29  }
   0x3   : > { %p38_p1 = scmp.ge.s32.totalorder %s36_s16, 2  ;;  %p450_p2 = scmp.lt.s32.totalorder %s5093_s15, 3 }
   0x5   : > { %s7836_s16 = smov (%p38_p1, %s36_s16), 0  ;;  %p451_p3 = pnand %p4377_p0, %p450_p2 }
   0x7   : > { %454 = sbr.rel (%p451_p3) target bundleno = 1632 (0x660), region = 76 }
   0xc   : > { %p516_p4 = scmp.lt.s32.totalorder %s5085_s29, 1  ;;  %v4830_v10 = vld [vmem:[%s7682_s4 + $0x38] sm:$0xff]   ;;  %v5095_v12 = vmov 0.0   ;;  %v4831_v15 = vld [vmem:[%s7682_s4 + $0x30] sm:$0xff]   ;;  %v4832_v18 = vld [vmem:[%s7682_s4 + $0x28] sm:$0xff]   ;;  %vm5096_vm0 = vmmov 0  }
   0xd   : > { %4639 = vmatprep.subr.bf16.mxu0 %v5095_v12  ;;  %v4833_v20 = vld [vmem:[%s7682_s4 + $0x20] sm:$0xff]   ;;  %v4834_v24 = vld [vmem:[%s7682_s4 + $0x18] sm:$0xff]   ;;  %v4835_v26 = vld [vmem:[%s7682_s4 + $0x10] sm:$0xff]   ;;  %4655 = vmatprep.mubr.msk.bf16.mxu0 %vm5096_vm0, %v5095_v12  ;;  %vm1433_vm1 = vcmask 523264   ;;  %vm2269_vm2 = vcmask 1040384   ;;  %s5097_s19 = smov 64  }
   0xe   : > { %s7838_s29 = smov (!%p516_p4, %s5085_s29), 1  ;;  %4640 = vmatpush3.bf16.msra.mxu0 %v4830_v10  ;;  %v4836_v30 = vld [vmem:[%s7682_s4 + $0x8] sm:$0xff]   ;;  %v4837_v32 = vld [vmem:[%s7682_s4] sm:$0xff]   ;;  %vm2270_vm3 = vsmask.f32 256  ;;  %vm2563_vm6 = vcmask 1046528  }
   0xf   : > { %s4460_s17 = sshll.u32 %s7838_s29, 4  ;;  %s4459_s21 = sshll.u32 %s7838_s29, 8  ;;  %4641 = vmatprep.subr.bf16.mxu0 %v5095_v12  ;;  %vm6117_vm4 = vmand %vm2269_vm2, %vm2270_vm3  ;;  %vm2306_vm5 = vsmask.f32 7424 }
  0x10   : > { %s534_s20 = scalar_lea.vmem %s7679_s1, %s4460_s17  ;;  %s5210_s24 = scalar_lea.vmem %s7678_s0, %s4459_s21 }
  0x11   : > { %v5197_v0 = vld [vmem:[%s534_s20] sm:$0xff]  ;;  %v5200_v1 = vld [vmem:[%s534_s20 + $0x8] sm:$0xff]  ;;  %v5228_v8 = vld [vmem:[%s5210_s24 + $0x10] sm:$0xff]  ;;  %s7572_s25 = scalar_lea.vmem %s7692_s14, %s4459_s21 }
  0x12   : > { %583 = vadd.xlane.f32.xlu0 %v5197_v0  ;;  %v686_v2 = vmul.f32 %v5197_v0, %v5197_v0  ;;  %v687_v3 = vmul.f32 %v5200_v1, %v5200_v1  ;;  %v5216_v4 = vld [vmem:[%s5210_s24] sm:$0xff]  ;;  %v5219_v5 = vld [vmem:[%s5210_s24 + $0x8] sm:$0xff]  ;;  %v5231_v9 = vld [vmem:[%s5210_s24 + $0x18] sm:$0xff]  ;;  %v690_v11 = vmul.f32 %v5228_v8, %v5228_v8  ;;  %4642 = vmatpush3.bf16.msra.mxu0 %v4831_v15 }
  0x13   : > { %7736 = vst [vmem:[#allocation2_spill] sm:$0xff] %v5216_v4  ;;  %7737 = vst [vmem:[#allocation3_spill] sm:$0xff] %v5219_v5  ;;  %v688_v6 = vmul.f32 %v5216_v4, %v5216_v4  ;;  %v689_v7 = vmul.f32 %v5219_v5, %v5219_v5  ;;  %v691_v13 = vmul.f32 %v5231_v9, %v5231_v9  ;;  %v5245_v14 = vld [vmem:[%s5210_s24 + $0x20] sm:$0xff]  ;;  %v5251_v16 = vld [vmem:[%s5210_s24 + $0x28] sm:$0xff]  ;;  %4643 = vmatprep.subr.bf16.mxu0 %v5095_v12 }
  0x14   : > { %720 = vadd.xlane.f32.xlu1 %v686_v2  ;;  %7738 = vst [vmem:[#allocation4_spill] sm:$0xff] %v5231_v9  ;;  %7739 = vst [vmem:[#allocation5_spill] sm:$0xff] %v5245_v14  ;;  %v692_v17 = vmul.f32 %v5245_v14, %v5245_v14  ;;  %v693_v19 = vmul.f32 %v5251_v16, %v5251_v16  ;;  %v5268_v21 = vld [vmem:[%s5210_s24 + $0x30] sm:$0xff]  ;;  %v5271_v22 = vld [vmem:[%s5210_s24 + $0x38] sm:$0xff] }
  0x15   : > { %7740 = vst [vmem:[#allocation6_spill] sm:$0xff] %v5251_v16  ;;  %7741 = vst [vmem:[#allocation7_spill] sm:$0xff] %v5268_v21  ;;  %v694_v23 = vmul.f32 %v5268_v21, %v5268_v21  ;;  %v695_v25 = vmul.f32 %v5271_v22, %v5271_v22  ;;  %v5288_v27 = vld [vmem:[%s5210_s24 + $0x40] sm:$0xff]  ;;  %v5291_v28 = vld [vmem:[%s5210_s24 + $0x48] sm:$0xff] }
  0x16   : > { %585 = vadd.xlane.f32.xlu0 %v5200_v1  ;;  %4644 = vmatpush3.bf16.msra.mxu0 %v4832_v18  ;;  %7742 = vst [vmem:[#allocation8_spill] sm:$0xff] %v5271_v22  ;;  %7743 = vst [vmem:[#allocation9_spill] sm:$0xff] %v5288_v27  ;;  %v696_v29 = vmul.f32 %v5288_v27, %v5288_v27  ;;  %v697_v31 = vmul.f32 %v5291_v28, %v5291_v28  ;;  %v5308_v33 = vld [vmem:[%s5210_s24 + $0x50] sm:$0xff]  ;;  %v5311_v34 = vld [vmem:[%s5210_s24 + $0x58] sm:$0xff] }
  0x17   : > { %4645 = vmatprep.subr.bf16.mxu0 %v5095_v12  ;;  %7744 = vst [vmem:[#allocation10_spill] sm:$0xff] %v5291_v28  ;;  %7745 = vst [vmem:[#allocation11_spill] sm:$0xff] %v5308_v33  ;;  %v698_v35 = vmul.f32 %v5308_v33, %v5308_v33  ;;  %v699_v36 = vmul.f32 %v5311_v34, %v5311_v34  ;;  %v5322_v37 = vld [vmem:[%s5210_s24 + $0x60] sm:$0xff]  ;;  %v5325_v38 = vld [vmem:[%s5210_s24 + $0x68] sm:$0xff] }
  0x18   : > { %722 = vadd.xlane.f32.xlu1 %v687_v3  ;;  %7746 = vst [vmem:[#allocation12_spill] sm:$0xff] %v5311_v34  ;;  %7747 = vst [vmem:[#allocation13_spill] sm:$0xff] %v5322_v37  ;;  %v700_v39 = vmul.f32 %v5322_v37, %v5322_v37  ;;  %v701_v40 = vmul.f32 %v5325_v38, %v5325_v38  ;;  %v5334_v41 = vld [vmem:[%s5210_s24 + $0x70] sm:$0xff]  ;;  %v5337_v42 = vld [vmem:[%s5210_s24 + $0x78] sm:$0xff] }
  0x19   : > { %7748 = vst [vmem:[#allocation14_spill] sm:$0xff] %v5325_v38  ;;  %7749 = vst [vmem:[#allocation15_spill] sm:$0xff] %v5334_v41  ;;  %v702_v43 = vmul.f32 %v5334_v41, %v5334_v41  ;;  %v703_v44 = vmul.f32 %v5337_v42, %v5337_v42  ;;  %v5346_v45 = vld [vmem:[%s5210_s24 + $0x80] sm:$0xff]  ;;  %v5349_v46 = vld [vmem:[%s5210_s24 + $0x88] sm:$0xff] }
  0x1a   : > { %587 = vadd.xlane.f32.xlu0 %v5216_v4  ;;  %4646 = vmatpush3.bf16.msra.mxu0 %v4833_v20  ;;  %7750 = vst [vmem:[#allocation16_spill] sm:$0xff] %v5337_v42  ;;  %7751 = vst [vmem:[#allocation17_spill] sm:$0xff] %v5346_v45  ;;  %v704_v47 = vmul.f32 %v5346_v45, %v5346_v45  ;;  %v705_v48 = vmul.f32 %v5349_v46, %v5349_v46  ;;  %v5358_v49 = vld [vmem:[%s5210_s24 + $0x90] sm:$0xff]  ;;  %v5361_v50 = vld [vmem:[%s5210_s24 + $0x98] sm:$0xff] }
  0x1b   : > { %4647 = vmatprep.subr.bf16.mxu0 %v5095_v12  ;;  %7752 = vst [vmem:[#allocation18_spill] sm:$0xff] %v5349_v46  ;;  %7753 = vst [vmem:[#allocation19_spill] sm:$0xff] %v5358_v49  ;;  %v706_v51 = vmul.f32 %v5358_v49, %v5358_v49  ;;  %v707_v52 = vmul.f32 %v5361_v50, %v5361_v50  ;;  %v5370_v53 = vld [vmem:[%s5210_s24 + $0xa0] sm:$0xff]  ;;  %v5373_v54 = vld [vmem:[%s5210_s24 + $0xa8] sm:$0xff] }
  0x1c   : > { %589 = vadd.xlane.f32.xlu1 %v5219_v5  ;;  %7754 = vst [vmem:[#allocation20_spill] sm:$0xff] %v5361_v50  ;;  %7755 = vst [vmem:[#allocation21_spill] sm:$0xff] %v5370_v53  ;;  %v708_v55 = vmul.f32 %v5370_v53, %v5370_v53  ;;  %v709_v56 = vmul.f32 %v5373_v54, %v5373_v54  ;;  %v5382_v57 = vld [vmem:[%s5210_s24 + $0xb0] sm:$0xff]  ;;  %v5385_v58 = vld [vmem:[%s5210_s24 + $0xb8] sm:$0xff] }
  0x1d   : > { %7756 = vst [vmem:[#allocation22_spill] sm:$0xff] %v5373_v54  ;;  %7757 = vst [vmem:[#allocation23_spill] sm:$0xff] %v5382_v57  ;;  %v710_v59 = vmul.f32 %v5382_v57, %v5382_v57  ;;  %v711_v60 = vmul.f32 %v5385_v58, %v5385_v58  ;;  %v5394_v61 = vld [vmem:[%s5210_s24 + $0xc0] sm:$0xff]  ;;  %v5397_v62 = vld [vmem:[%s5210_s24 + $0xc8] sm:$0xff] }
  0x1e   : > { %724 = vadd.xlane.f32.xlu0 %v688_v6  ;;  %4648 = vmatpush3.bf16.msra.mxu0 %v4834_v24  ;;  %7758 = vst [vmem:[#allocation24_spill] sm:$0xff] %v5385_v58  ;;  %7759 = vst [vmem:[#allocation25_spill] sm:$0xff] %v5394_v61  ;;  %v712_v63 = vmul.f32 %v5394_v61, %v5394_v61  ;;  %v713_v2 = vmul.f32 %v5397_v62, %v5397_v62  ;;  %v573_v3 = vld [vmem:[%s5210_s24 + $0xd0] sm:$0xff]  ;;  %v574_v6 = vld [vmem:[%s5210_s24 + $0xd8] sm:$0xff] }
  0x1f   : > { %4649 = vmatprep.subr.bf16.mxu0 %v5095_v12  ;;  %7760 = vst [vmem:[#allocation26_spill] sm:$0xff] %v5397_v62  ;;  %v715_v10 = vmul.f32 %v574_v6, %v574_v6  ;;  %v577_v18 = vld [vmem:[%s5210_s24 + $0xf0] sm:$0xff] }
  0x20   : > { %726 = vadd.xlane.f32.xlu1 %v689_v7  ;;  %v714_v7 = vmul.f32 %v573_v3, %v573_v3  ;;  %v718_v20 = vmul.f32 %v577_v18, %v577_v18 }
  0x22   : > { %591 = vadd.xlane.f32.xlu0 %v5228_v8  ;;  %4650 = vmatpush3.bf16.msra.mxu0 %v4835_v26 }
  0x23   : > { %4651 = vmatprep.subr.bf16.mxu0 %v5095_v12 }
  0x24   : > { %593 = vadd.xlane.f32.xlu1 %v5231_v9 }
  0x26   : > { %728 = vadd.xlane.f32.xlu0 %v690_v11  ;;  %4652 = vmatpush3.bf16.msra.mxu0 %v4836_v30  ;;  %v575_v11 = vld [vmem:[%s5210_s24 + $0xe0] sm:$0xff] }
  0x27   : > { %4653 = vmatprep.subr.bf16.mxu0 %v5095_v12  ;;  %v716_v15 = vmul.f32 %v575_v11, %v575_v11 }
  0x28   : > { %730 = vadd.xlane.f32.xlu1 %v691_v13  ;;  %v576_v13 = vld [vmem:[%s5210_s24 + $0xe8] sm:$0xff] }
  0x2a   : > { %595 = vadd.xlane.f32.xlu0 %v5245_v14  ;;  %4654 = vmatpush3.bf16.msra.mxu0 %v4837_v32 }
  0x2c   : > { %597 = vadd.xlane.f32.xlu1 %v5251_v16 }
  0x2e   : > { %732 = vadd.xlane.f32.xlu0 %v692_v17  ;;  %v717_v17 = vmul.f32 %v576_v13, %v576_v13 }
  0x30   : > { %734 = vadd.xlane.f32.xlu1 %v693_v19  ;;  %v578_v19 = vld [vmem:[%s5210_s24 + $0xf8] sm:$0xff] }
  0x32   : > { %599 = vadd.xlane.f32.xlu0 %v5268_v21 }
  0x34   : > { %601 = vadd.xlane.f32.xlu1 %v5271_v22 }
  0x36   : > { %736 = vadd.xlane.f32.xlu0 %v694_v23  ;;  %v719_v23 = vmul.f32 %v578_v19, %v578_v19 }
  0x38   : > { %738 = vadd.xlane.f32.xlu1 %v695_v25 }
  0x3a   : > { %603 = vadd.xlane.f32.xlu0 %v5288_v27 }
  0x3c   : > { %605 = vadd.xlane.f32.xlu1 %v5291_v28 }
  0x3e   : > { %740 = vadd.xlane.f32.xlu0 %v696_v29 }
  0x40   : > { %742 = vadd.xlane.f32.xlu1 %v697_v31 }
  0x42   : > { %607 = vadd.xlane.f32.xlu0 %v5308_v33 }
  0x44   : > { %609 = vadd.xlane.f32.xlu1 %v5311_v34 }
  0x46   : > { %744 = vadd.xlane.f32.xlu0 %v698_v35 }
  0x48   : > { %746 = vadd.xlane.f32.xlu1 %v699_v36 }
  0x4a   : > { %611 = vadd.xlane.f32.xlu0 %v5322_v37 }
  0x4c   : > { %613 = vadd.xlane.f32.xlu1 %v5325_v38 }
  0x4e   : > { %748 = vadd.xlane.f32.xlu0 %v700_v39 }
  0x50   : > { %750 = vadd.xlane.f32.xlu1 %v701_v40 }
  0x52   : > { %615 = vadd.xlane.f32.xlu0 %v5334_v41 }
  0x54   : > { %617 = vadd.xlane.f32.xlu1 %v5337_v42 }
  0x56   : > { %752 = vadd.xlane.f32.xlu0 %v702_v43 }
  0x58   : > { %754 = vadd.xlane.f32.xlu1 %v703_v44 }
  0x5a   : > { %619 = vadd.xlane.f32.xlu0 %v5346_v45 }
  0x5c   : > { %621 = vadd.xlane.f32.xlu1 %v5349_v46 }
  0x5e   : > { %756 = vadd.xlane.f32.xlu0 %v704_v47 }
  0x60   : > { %758 = vadd.xlane.f32.xlu1 %v705_v48 }
  0x62   : > { %623 = vadd.xlane.f32.xlu0 %v5358_v49 }
  0x64   : > { %625 = vadd.xlane.f32.xlu1 %v5361_v50 }
  0x66   : > { %760 = vadd.xlane.f32.xlu0 %v706_v51 }
  0x68   : > { %762 = vadd.xlane.f32.xlu1 %v707_v52 }
  0x6a   : > { %627 = vadd.xlane.f32.xlu0 %v5370_v53 }
  0x6c   : > { %629 = vadd.xlane.f32.xlu1 %v5373_v54 }
  0x6e   : > { %764 = vadd.xlane.f32.xlu0 %v708_v55 }
  0x70   : > { %766 = vadd.xlane.f32.xlu1 %v709_v56 }
  0x72   : > { %631 = vadd.xlane.f32.xlu0 %v5382_v57 }
  0x74   : > { %633 = vadd.xlane.f32.xlu1 %v5385_v58 }
  0x76   : > { %768 = vadd.xlane.f32.xlu0 %v710_v59 }
  0x78   : > { %770 = vadd.xlane.f32.xlu1 %v711_v60 }
  0x7a   : > { %635 = vadd.xlane.f32.xlu0 %v5394_v61 }
  0x7c   : > { %637 = vadd.xlane.f32.xlu1 %v5397_v62 }
  0x7e   : > { %772 = vadd.xlane.f32.xlu0 %v712_v63 }
  0x80   : > { %774 = vadd.xlane.f32.xlu1 %v713_v2 }
  0x82   : > { %639 = vadd.xlane.f32.xlu0 %v573_v3 }
  0x84   : > { %641 = vadd.xlane.f32.xlu1 %v574_v6 }
  0x86   : > { %776 = vadd.xlane.f32.xlu0 %v714_v7 }
  0x88   : > { %778 = vadd.xlane.f32.xlu1 %v715_v10 }
  0x8a   : > { %643 = vadd.xlane.f32.xlu0 %v575_v11 }
  0x8c   : > { %645 = vadd.xlane.f32.xlu1 %v576_v13 }
  0x8e   : > { %780 = vadd.xlane.f32.xlu0 %v716_v15 }
  0x90   : > { %782 = vadd.xlane.f32.xlu1 %v717_v17 }
  0x92   : > { %647 = vadd.xlane.f32.xlu0 %v577_v18 }
  0x94   : > { %649 = vadd.xlane.f32.xlu1 %v578_v19 }
  0x96   : > { %784 = vadd.xlane.f32.xlu0 %v718_v20 }
  0x98   : > { %786 = vadd.xlane.f32.xlu1 %v719_v23 }
  0x9b   : > { %v584_v24 = vpop.xlane.xlu0 %583 }
  0x9c   : > { %v652_v25 = vmul.f32 0.0078125, %v584_v24 }
  0x9d   : > { %v721_v26 = vpop.xlane.xlu1 %720 }
  0x9e   : > { %v822_v29 = vmul.f32 %v652_v25, %v652_v25  ;;  %v788_v30 = vmul.f32 0.0078125, %v721_v26 }
  0x9f   : > { %v586_v31 = vpop.xlane.xlu0 %585 }
  0xa0   : > { %v856_v32 = vsub.f32 %v788_v30, %v822_v29  ;;  %v5411_v35 = vmul.f32 0.0078125, %v586_v31 }
  0xa1   : > { %v723_v36 = vpop.xlane.xlu1 %722 }
  0xa2   : > { %v890_v39 = vmax.f32 %v856_v32, 0.0  ;;  %v823_v40 = vmul.f32 %v5411_v35, %v5411_v35  ;;  %v789_v43 = vmul.f32 0.0078125, %v723_v36  ;;  %v924_v36 = vsub.f32 %v5197_v0, %v652_v25 }
  0xa3   : > { %v588_v44 = vpop.xlane.xlu0 %587  ;;  %v925_v25 = vsub.f32 %v5200_v1, %v5411_v35 }
  0xa4   : > { %v958_v47 = vadd.f32 1e-05, %v890_v39  ;;  %v857_v48 = vsub.f32 %v789_v43, %v823_v40  ;;  %v5415_v51 = vmul.f32 0.0078125, %v588_v44 }
  0xa5   : > { %v590_v52 = vpop.xlane.xlu1 %589 }
  0xa6   : > { %4862 = vrsqrt.f32 %v958_v47  ;;  %v891_v55 = vmax.f32 %v857_v48, 0.0  ;;  %v824_v56 = vmul.f32 %v5415_v51, %v5415_v51  ;;  %v5419_v59 = vmul.f32 0.0078125, %v590_v52 }
  0xa7   : > { %v725_v60 = vpop.xlane.xlu0 %724 }
  0xa8   : > { %v959_v63 = vadd.f32 1e-05, %v891_v55  ;;  %v790_v2 = vmul.f32 0.0078125, %v725_v60  ;;  %v825_v6 = vmul.f32 %v5419_v59, %v5419_v59  ;;  %v5437_v55 = vld [vmem:[%s7680_s2] ss:$0 sm:$0xff] }
  0xa9   : > { %v727_v3 = vpop.xlane.xlu1 %726 }
  0xaa   : > { %4864 = vrsqrt.f32 %v959_v63  ;;  %v858_v7 = vsub.f32 %v790_v2, %v824_v56  ;;  %v791_v10 = vmul.f32 0.0078125, %v727_v3 }
  0xab   : > { %v592_v11 = vpop.xlane.xlu0 %591 }
  0xac   : > { %v892_v13 = vmax.f32 %v858_v7, 0.0  ;;  %v859_v15 = vsub.f32 %v791_v10, %v825_v6  ;;  %v5423_v17 = vmul.f32 0.0078125, %v592_v11 }
  0xad   : > { %v594_v18 = vpop.xlane.xlu1 %593 }
  0xae   : > { %v960_v19 = vadd.f32 1e-05, %v892_v13  ;;  %v893_v20 = vmax.f32 %v859_v15, 0.0  ;;  %v826_v23 = vmul.f32 %v5423_v17, %v5423_v17  ;;  %v5427_v24 = vmul.f32 0.0078125, %v594_v18  ;;  %v5451_v15 = vld [vmem:[%s7681_s3] ss:$0 sm:$0xff] }
  0xaf   : > { %v729_v26 = vpop.xlane.xlu0 %728 }
  0xb0   : > { %4866 = vrsqrt.f32 %v960_v19  ;;  %v961_v29 = vadd.f32 1e-05, %v893_v20  ;;  %v792_v30 = vmul.f32 0.0078125, %v729_v26  ;;  %v827_v31 = vmul.f32 %v5427_v24, %v5427_v24 }
  0xb1   : > { %v731_v32 = vpop.xlane.xlu1 %730 }
  0xb2   : > { %4868 = vrsqrt.f32 %v961_v29  ;;  %v860_v39 = vsub.f32 %v792_v30, %v826_v23  ;;  %v793_v40 = vmul.f32 0.0078125, %v731_v32 }
  0xb3   : > { %v4863_v43 = vpop.eup %4862  ;;  %v596_v44 = vpop.xlane.xlu0 %595 }
  0xb4   : > { %v894_v47 = vmax.f32 %v860_v39, 0.0  ;;  %v861_v48 = vsub.f32 %v793_v40, %v827_v31  ;;  %v5432_v52 = vmul.f32 0.0078125, %v596_v44  ;;  %v1026_v56 = vmul.f32 %v4863_v43, %v924_v36 }
  0xb5   : > { %v598_v60 = vpop.xlane.xlu1 %597  ;;  %v926_v36 = vsub.f32 %v5216_v4, %v5415_v51  ;;  %v927_v44 = vsub.f32 %v5219_v5, %v5419_v59 }
  0xb6   : > { %v962_v63 = vadd.f32 1e-05, %v894_v47  ;;  %v895_v2 = vmax.f32 %v861_v48, 0.0  ;;  %v5439_v3 = vmul.f32 0.0078125, %v598_v60  ;;  %v828_v6 = vmul.f32 %v5432_v52, %v5432_v52 }
  0xb7   : > { %v4865_v0 = vpop.eup %4864  ;;  %v733_v7 = vpop.xlane.xlu0 %732  ;;  %v1066_v10 = vmul.f32 %v5437_v55, %v1026_v56 }
  0xb8   : > { %4870 = vrsqrt.f32 %v962_v63  ;;  %v963_v11 = vadd.f32 1e-05, %v895_v2  ;;  %v829_v13 = vmul.f32 %v5439_v3, %v5439_v3  ;;  %v794_v19 = vmul.f32 0.0078125, %v733_v7 }
  0xb9   : > { %v735_v18 = vpop.xlane.xlu1 %734  ;;  %v1027_v20 = vmul.f32 %v4865_v0, %v925_v25  ;;  %v1106_v29 = vadd.f32 %v5451_v15, %v1066_v10 }
  0xba   : > { %4872 = vrsqrt.f32 %v963_v11  ;;  %v795_v1 = vmul.f32 0.0078125, %v735_v18  ;;  %v862_v35 = vsub.f32 %v794_v19, %v828_v6 }
  0xbb   : > { %v600_v23 = vpop.xlane.xlu0 %599  ;;  %v1067_v26 = vmul.f32 %v5437_v55, %v1027_v20  ;;  %v1140_v0 = vmax.f32 %v1106_v29, 0.0 }
  0xbc   : > { %v863_v30 = vsub.f32 %v795_v1, %v829_v13  ;;  %v5455_v31 = vmul.f32 0.0078125, %v600_v23  ;;  %v896_v39 = vmax.f32 %v862_v35, 0.0 }
  0xbd   : > { %v4867_v32 = vpop.eup %4866  ;;  %v602_v40 = vpop.xlane.xlu1 %601  ;;  %v1107_v43 = vadd.f32 %v5451_v15, %v1067_v26 }
  0xbe   : > { %v897_v47 = vmax.f32 %v863_v30, 0.0  ;;  %v5462_v48 = vmul.f32 0.0078125, %v602_v40  ;;  %v830_v56 = vmul.f32 %v5455_v31, %v5455_v31  ;;  %v964_v63 = vadd.f32 1e-05, %v896_v39 }
  0xbf   : > { %v4869_v60 = vpop.eup %4868  ;;  %v737_v2 = vpop.xlane.xlu0 %736  ;;  %v1141_v25 = vmax.f32 %v1107_v43, 0.0  ;;  %v1028_v6 = vmul.f32 %v4867_v32, %v926_v36  ;;  %v928_v36 = vsub.f32 %v5228_v8, %v5423_v17  ;;  %v929_v43 = vsub.f32 %v5231_v9, %v5427_v24 }
  0xc0   : > { %v965_v51 = vadd.f32 1e-05, %v897_v47  ;;  %v831_v7 = vmul.f32 %v5462_v48, %v5462_v48  ;;  %v796_v10 = vmul.f32 0.0078125, %v737_v2  ;;  %4874 = vrsqrt.f32 %v964_v63 }
  0xc1   : > { %v739_v11 = vpop.xlane.xlu1 %738  ;;  %v1174_v59 = vpack.c.bf16 %v1141_v25, %v1140_v0  ;;  %v1029_v13 = vmul.f32 %v4869_v60, %v927_v44  ;;  %v1068_v18 = vmul.f32 %v5437_v55, %v1028_v6 }
  0xc2   : > { %4876 = vrsqrt.f32 %v965_v51  ;;  %v797_v19 = vmul.f32 0.0078125, %v739_v11  ;;  %v864_v20 = vsub.f32 %v796_v10, %v830_v56 }
  0xc3   : > { %4656 = vmatmul.mubr.bf16.vlgmr.msra.gmra.mxu0 %v1174_v59  ;;  %v604_v1 = vpop.xlane.xlu0 %603  ;;  %v1069_v35 = vmul.f32 %v5437_v55, %v1029_v13  ;;  %v1108_v23 = vadd.f32 %v5451_v15, %v1068_v18  ;;  %v930_v13 = vsub.f32 %v5245_v14, %v5432_v52 }
  0xc4   : > { %v865_v26 = vsub.f32 %v797_v19, %v831_v7  ;;  %v898_v29 = vmax.f32 %v864_v20, 0.0  ;;  %v5471_v30 = vmul.f32 0.0078125, %v604_v1  ;;  %4659 = vmatprep.mubr.msk.bf16.mxu0 %vm5096_vm0, %v5095_v12 }
  0xc5   : > { %v4871_v32 = vpop.eup %4870  ;;  %v606_v39 = vpop.xlane.xlu1 %605  ;;  %v1109_v40 = vadd.f32 %v5451_v15, %v1069_v35  ;;  %v1142_v0 = vmax.f32 %v1108_v23, 0.0 }
  0xc6   : > { %v899_v44 = vmax.f32 %v865_v26, 0.0  ;;  %v966_v47 = vadd.f32 1e-05, %v898_v29  ;;  %v5480_v56 = vmul.f32 0.0078125, %v606_v39  ;;  %v832_v63 = vmul.f32 %v5471_v30, %v5471_v30 }
  0xc7   : > { %v4873_v60 = vpop.eup %4872  ;;  %v741_v2 = vpop.xlane.xlu0 %740  ;;  %v1143_v25 = vmax.f32 %v1109_v40, 0.0  ;;  %v1030_v6 = vmul.f32 %v4871_v32, %v928_v36  ;;  %v931_v26 = vsub.f32 %v5251_v16, %v5439_v3 }
  0xc8   : > { %v967_v51 = vadd.f32 1e-05, %v899_v44  ;;  %4878 = vrsqrt.f32 %v966_v47  ;;  %v833_v8 = vmul.f32 %v5480_v56, %v5480_v56  ;;  %v798_v7 = vmul.f32 0.0078125, %v741_v2 }
  0xc9   : > { %v743_v17 = vpop.xlane.xlu1 %742  ;;  %v1175_v24 = vpack.c.bf16 %v1143_v25, %v1142_v0  ;;  %v1031_v10 = vmul.f32 %v4873_v60, %v929_v43  ;;  %v1070_v11 = vmul.f32 %v5437_v55, %v1030_v6 }
  0xca   : > { %4880 = vrsqrt.f32 %v967_v51  ;;  %v799_v59 = vmul.f32 0.0078125, %v743_v17  ;;  %v866_v18 = vsub.f32 %v798_v7, %v832_v63 }
  0xcb   : > { %4660 = vmatmul.mubr.bf16.gmra.mxu0 %v1175_v24  ;;  %v608_v19 = vpop.xlane.xlu0 %607  ;;  %v1071_v20 = vmul.f32 %v5437_v55, %v1031_v10  ;;  %v1110_v1 = vadd.f32 %v5451_v15, %v1070_v11  ;;  %v932_v11 = vsub.f32 %v5268_v21, %v5455_v31 }
  0xcc   : > { %v867_v35 = vsub.f32 %v799_v59, %v833_v8  ;;  %v5491_v23 = vmul.f32 0.0078125, %v608_v19  ;;  %4663 = vmatprep.mubr.msk.bf16.mxu0 %vm5096_vm0, %v5095_v12  ;;  %v900_v29 = vmax.f32 %v866_v18, 0.0 }
  0xcd   : > { %v610_v32 = vpop.xlane.xlu1 %609  ;;  %v1111_v52 = vadd.f32 %v5451_v15, %v1071_v20  ;;  %v4875_v36 = vpop.eup %4874  ;;  %v1144_v63 = vmax.f32 %v1110_v1, 0.0 }
  0xce   : > { %v901_v39 = vmax.f32 %v867_v35, 0.0  ;;  %v5498_v40 = vmul.f32 0.0078125, %v610_v32  ;;  %v834_v43 = vmul.f32 %v5491_v23, %v5491_v23  ;;  %v968_v47 = vadd.f32 1e-05, %v900_v29 }
  0xcf   : > { %v4877_v44 = vpop.eup %4876  ;;  %v745_v60 = vpop.xlane.xlu0 %744  ;;  %v1145_v2 = vmax.f32 %v1111_v52, 0.0  ;;  %v1032_v0 = vmul.f32 %v4875_v36, %v930_v13 }
  0xd0   : > { %v969_v25 = vadd.f32 1e-05, %v901_v39  ;;  %v835_v3 = vmul.f32 %v5498_v40, %v5498_v40  ;;  %v800_v6 = vmul.f32 0.0078125, %v745_v60  ;;  %4882 = vrsqrt.f32 %v968_v47 }
  0xd1   : > { %v747_v51 = vpop.xlane.xlu1 %746  ;;  %v1176_v8 = vpack.c.bf16 %v1145_v2, %v1144_v63  ;;  %v1033_v17 = vmul.f32 %v4877_v44, %v931_v26  ;;  %v1072_v7 = vmul.f32 %v5437_v55, %v1032_v0  ;;  %v933_v26 = vsub.f32 %v5271_v22, %v5462_v48 }
  0xd2   : > { %4884 = vrsqrt.f32 %v969_v25  ;;  %v801_v24 = vmul.f32 0.0078125, %v747_v51  ;;  %v868_v10 = vsub.f32 %v800_v6, %v834_v43 }
  0xd3   : > { %4664 = vmatmul.mubr.bf16.gmra.mxu0 %v1176_v8  ;;  %v612_v59 = vpop.xlane.xlu0 %611  ;;  %v1073_v13 = vmul.f32 %v5437_v55, %v1033_v17  ;;  %v1112_v18 = vadd.f32 %v5451_v15, %v1072_v7  ;;  %v934_v17 = vsub.f32 %v5288_v27, %v5471_v30 }
  0xd4   : > { %v869_v19 = vsub.f32 %v801_v24, %v835_v3  ;;  %v902_v20 = vmax.f32 %v868_v10, 0.0  ;;  %v5509_v1 = vmul.f32 0.0078125, %v612_v59  ;;  %4667 = vmatprep.mubr.msk.bf16.mxu0 %vm5096_vm0, %v5095_v12 }
  0xd5   : > { %v4879_v35 = vpop.eup %4878  ;;  %v614_v29 = vpop.xlane.xlu1 %613  ;;  %v1113_v31 = vadd.f32 %v5451_v15, %v1073_v13  ;;  %v1146_v32 = vmax.f32 %v1112_v18, 0.0  ;;  %v935_v18 = vsub.f32 %v5291_v28, %v5480_v56 }
  0xd6   : > { %v903_v52 = vmax.f32 %v869_v19, 0.0  ;;  %v970_v36 = vadd.f32 1e-05, %v902_v20  ;;  %v5516_v39 = vmul.f32 0.0078125, %v614_v29  ;;  %v836_v44 = vmul.f32 %v5509_v1, %v5509_v1 }
  0xd7   : > { %v4881_v43 = vpop.eup %4880  ;;  %v749_v47 = vpop.xlane.xlu0 %748  ;;  %v1147_v60 = vmax.f32 %v1113_v31, 0.0  ;;  %v1034_v63 = vmul.f32 %v4879_v35, %v932_v11 }
  0xd8   : > { %v971_v2 = vadd.f32 1e-05, %v903_v52  ;;  %4886 = vrsqrt.f32 %v970_v36  ;;  %v837_v48 = vmul.f32 %v5516_v39, %v5516_v39  ;;  %v802_v25 = vmul.f32 0.0078125, %v749_v47 }
  0xd9   : > { %v751_v0 = vpop.xlane.xlu1 %750  ;;  %v1177_v3 = vpack.c.bf16 %v1147_v60, %v1146_v32  ;;  %v1035_v6 = vmul.f32 %v4881_v43, %v933_v26  ;;  %v1074_v51 = vmul.f32 %v5437_v55, %v1034_v63 }
  0xda   : > { %4888 = vrsqrt.f32 %v971_v2  ;;  %v803_v8 = vmul.f32 0.0078125, %v751_v0  ;;  %v870_v7 = vsub.f32 %v802_v25, %v836_v44 }
  0xdb   : > { %4668 = vmatmul.mubr.bf16.gmra.mxu0 %v1177_v3  ;;  %v616_v24 = vpop.xlane.xlu0 %615  ;;  %v1075_v10 = vmul.f32 %v5437_v55, %v1035_v6  ;;  %v1114_v11 = vadd.f32 %v5451_v15, %v1074_v51  ;;  %v936_v51 = vsub.f32 %v5308_v33, %v5491_v23 }
  0xdc   : > { %v871_v59 = vsub.f32 %v803_v8, %v837_v48  ;;  %v5527_v13 = vmul.f32 0.0078125, %v616_v24  ;;  %4671 = vmatprep.mubr.msk.bf16.mxu0 %vm5096_vm0, %v5095_v12  ;;  %v904_v19 = vmax.f32 %v870_v7, 0.0 }
  0xdd   : > { %v618_v20 = vpop.xlane.xlu1 %617  ;;  %v1115_v30 = vadd.f32 %v5451_v15, %v1075_v10  ;;  %v1148_v35 = vmax.f32 %v1114_v11, 0.0  ;;  %v4883_v26 = vpop.eup %4882 }
  0xde   : > { %v905_v29 = vmax.f32 %v871_v59, 0.0  ;;  %v5534_v31 = vmul.f32 0.0078125, %v618_v20  ;;  %v838_v32 = vmul.f32 %v5527_v13, %v5527_v13  ;;  %v972_v36 = vadd.f32 1e-05, %v904_v19 }
  0xdf   : > { %v4885_v52 = vpop.eup %4884  ;;  %v753_v43 = vpop.xlane.xlu0 %752  ;;  %v1149_v44 = vmax.f32 %v1115_v30, 0.0  ;;  %v1036_v47 = vmul.f32 %v4883_v26, %v934_v17 }
  0xe0   : > { %v973_v60 = vadd.f32 1e-05, %v905_v29  ;;  %v839_v56 = vmul.f32 %v5534_v31, %v5534_v31  ;;  %v804_v63 = vmul.f32 0.0078125, %v753_v43  ;;  %4890 = vrsqrt.f32 %v972_v36 }
  0xe1   : > { %v755_v2 = vpop.xlane.xlu1 %754  ;;  %v1178_v48 = vpack.c.bf16 %v1149_v44, %v1148_v35  ;;  %v1037_v0 = vmul.f32 %v4885_v52, %v935_v18  ;;  %v1076_v25 = vmul.f32 %v5437_v55, %v1036_v47  ;;  %v937_v18 = vsub.f32 %v5311_v34, %v5498_v40 }
  0xe2   : > { %4892 = vrsqrt.f32 %v973_v60  ;;  %v805_v3 = vmul.f32 0.0078125, %v755_v2  ;;  %v872_v6 = vsub.f32 %v804_v63, %v838_v32 }
  0xe3   : > { %4672 = vmatmul.mubr.bf16.gmra.mxu0 %v1178_v48  ;;  %v620_v8 = vpop.xlane.xlu0 %619  ;;  %v1077_v17 = vmul.f32 %v5437_v55, %v1037_v0  ;;  %v1116_v7 = vadd.f32 %v5451_v15, %v1076_v25  ;;  %v938_v0 = vsub.f32 %v5322_v37, %v5509_v1 }
  0xe4   : > { %v873_v24 = vsub.f32 %v805_v3, %v839_v56  ;;  %v906_v10 = vmax.f32 %v872_v6, 0.0  ;;  %v5545_v11 = vmul.f32 0.0078125, %v620_v8  ;;  %4675 = vmatprep.mubr.msk.bf16.mxu0 %vm5096_vm0, %v5095_v12 }
  0xe5   : > { %v4887_v59 = vpop.eup %4886  ;;  %v622_v19 = vpop.xlane.xlu1 %621  ;;  %v1117_v23 = vadd.f32 %v5451_v15, %v1077_v17  ;;  %v1150_v20 = vmax.f32 %v1116_v7, 0.0  ;;  %v939_v7 = vsub.f32 %v5325_v38, %v5516_v39 }
  0xe6   : > { %v907_v30 = vmax.f32 %v873_v24, 0.0  ;;  %v974_v35 = vadd.f32 1e-05, %v906_v10  ;;  %v5552_v26 = vmul.f32 0.0078125, %v622_v19  ;;  %v840_v32 = vmul.f32 %v5545_v11, %v5545_v11 }
  0xe7   : > { %v4889_v29 = vpop.eup %4888  ;;  %v757_v52 = vpop.xlane.xlu0 %756  ;;  %v1151_v36 = vmax.f32 %v1117_v23, 0.0  ;;  %v1038_v43 = vmul.f32 %v4887_v59, %v936_v51 }
  0xe8   : > { %v975_v44 = vadd.f32 1e-05, %v907_v30  ;;  %4894 = vrsqrt.f32 %v974_v35  ;;  %v841_v40 = vmul.f32 %v5552_v26, %v5552_v26  ;;  %v806_v60 = vmul.f32 0.0078125, %v757_v52 }
  0xe9   : > { %v759_v47 = vpop.xlane.xlu1 %758  ;;  %v1179_v56 = vpack.c.bf16 %v1151_v36, %v1150_v20  ;;  %v1039_v63 = vmul.f32 %v4889_v29, %v937_v18  ;;  %v1078_v2 = vmul.f32 %v5437_v55, %v1038_v43 }
  0xea   : > { %4896 = vrsqrt.f32 %v975_v44  ;;  %v807_v48 = vmul.f32 0.0078125, %v759_v47  ;;  %v874_v25 = vsub.f32 %v806_v60, %v840_v32 }
  0xeb   : > { %4676 = vmatmul.mubr.bf16.gmra.mxu0 %v1179_v56  ;;  %v624_v3 = vpop.xlane.xlu0 %623  ;;  %v1079_v6 = vmul.f32 %v5437_v55, %v1039_v63  ;;  %v1118_v51 = vadd.f32 %v5451_v15, %v1078_v2  ;;  %v940_v2 = vsub.f32 %v5334_v41, %v5527_v13 }
  0xec   : > { %v875_v8 = vsub.f32 %v807_v48, %v841_v40  ;;  %v5563_v17 = vmul.f32 0.0078125, %v624_v3  ;;  %4679 = vmatprep.mubr.msk.bf16.mxu0 %vm5096_vm0, %v5095_v12  ;;  %v908_v24 = vmax.f32 %v874_v25, 0.0 }
  0xed   : > { %v626_v10 = vpop.xlane.xlu1 %625  ;;  %v1119_v1 = vadd.f32 %v5451_v15, %v1079_v6  ;;  %v1152_v59 = vmax.f32 %v1118_v51, 0.0  ;;  %v4891_v18 = vpop.eup %4890 }
  0xee   : > { %v909_v19 = vmax.f32 %v875_v8, 0.0  ;;  %v5570_v23 = vmul.f32 0.0078125, %v626_v10  ;;  %v842_v20 = vmul.f32 %v5563_v17, %v5563_v17  ;;  %v976_v35 = vadd.f32 1e-05, %v908_v24 }
  0xef   : > { %v4893_v30 = vpop.eup %4892  ;;  %v761_v29 = vpop.xlane.xlu0 %760  ;;  %v1153_v32 = vmax.f32 %v1119_v1, 0.0  ;;  %v1040_v52 = vmul.f32 %v4891_v18, %v938_v0 }
  0xf0   : > { %v977_v36 = vadd.f32 1e-05, %v909_v19  ;;  %v843_v39 = vmul.f32 %v5570_v23, %v5570_v23  ;;  %v808_v43 = vmul.f32 0.0078125, %v761_v29  ;;  %4898 = vrsqrt.f32 %v976_v35 }
  0xf1   : > { %v763_v44 = vpop.xlane.xlu1 %762  ;;  %v1180_v40 = vpack.c.bf16 %v1153_v32, %v1152_v59  ;;  %v1041_v47 = vmul.f32 %v4893_v30, %v939_v7  ;;  %v1080_v60 = vmul.f32 %v5437_v55, %v1040_v52  ;;  %v941_v7 = vsub.f32 %v5337_v42, %v5534_v31 }
  0xf2   : > { %4900 = vrsqrt.f32 %v977_v36  ;;  %v809_v56 = vmul.f32 0.0078125, %v763_v44  ;;  %v876_v63 = vsub.f32 %v808_v43, %v842_v20 }
  0xf3   : > { %4680 = vmatmul.mubr.bf16.gmra.mxu0 %v1180_v40  ;;  %v628_v48 = vpop.xlane.xlu0 %627  ;;  %v1081_v0 = vmul.f32 %v5437_v55, %v1041_v47  ;;  %v1120_v25 = vadd.f32 %v5451_v15, %v1080_v60  ;;  %v942_v47 = vsub.f32 %v5346_v45, %v5545_v11 }
  0xf4   : > { %v877_v3 = vsub.f32 %v809_v56, %v843_v39  ;;  %v910_v6 = vmax.f32 %v876_v63, 0.0  ;;  %v5581_v51 = vmul.f32 0.0078125, %v628_v48  ;;  %4683 = vmatprep.mubr.msk.bf16.mxu0 %vm5096_vm0, %v5095_v12 }
  0xf5   : > { %v4895_v8 = vpop.eup %4894  ;;  %v630_v24 = vpop.xlane.xlu1 %629  ;;  %v1121_v13 = vadd.f32 %v5451_v15, %v1081_v0  ;;  %v1154_v10 = vmax.f32 %v1120_v25, 0.0  ;;  %v943_v25 = vsub.f32 %v5349_v46, %v5552_v26 }
  0xf6   : > { %v911_v1 = vmax.f32 %v877_v3, 0.0  ;;  %v978_v59 = vadd.f32 1e-05, %v910_v6  ;;  %v5588_v18 = vmul.f32 0.0078125, %v630_v24  ;;  %v844_v20 = vmul.f32 %v5581_v51, %v5581_v51 }
  0xf7   : > { %v4897_v19 = vpop.eup %4896  ;;  %v765_v30 = vpop.xlane.xlu0 %764  ;;  %v1155_v35 = vmax.f32 %v1121_v13, 0.0  ;;  %v1042_v29 = vmul.f32 %v4895_v8, %v940_v2 }
  0xf8   : > { %v979_v32 = vadd.f32 1e-05, %v911_v1  ;;  %4902 = vrsqrt.f32 %v978_v59  ;;  %v845_v31 = vmul.f32 %v5588_v18, %v5588_v18  ;;  %v810_v36 = vmul.f32 0.0078125, %v765_v30 }
  0xf9   : > { %v767_v52 = vpop.xlane.xlu1 %766  ;;  %v1181_v39 = vpack.c.bf16 %v1155_v35, %v1154_v10  ;;  %v1043_v43 = vmul.f32 %v4897_v19, %v941_v7  ;;  %v1082_v44 = vmul.f32 %v5437_v55, %v1042_v29 }
  0xfa   : > { %4904 = vrsqrt.f32 %v979_v32  ;;  %v811_v40 = vmul.f32 0.0078125, %v767_v52  ;;  %v878_v60 = vsub.f32 %v810_v36, %v844_v20 }
  0xfb   : > { %4684 = vmatmul.mubr.bf16.gmra.mxu0 %v1181_v39  ;;  %v632_v56 = vpop.xlane.xlu0 %631  ;;  %v1083_v63 = vmul.f32 %v5437_v55, %v1043_v43  ;;  %v1122_v2 = vadd.f32 %v5451_v15, %v1082_v44  ;;  %v944_v44 = vsub.f32 %v5358_v49, %v5563_v17 }
  0xfc   : > { %v879_v48 = vsub.f32 %v811_v40, %v845_v31  ;;  %v5599_v0 = vmul.f32 0.0078125, %v632_v56  ;;  %4687 = vmatprep.mubr.msk.bf16.mxu0 %vm5096_vm0, %v5095_v12  ;;  %v912_v3 = vmax.f32 %v878_v60, 0.0 }
  0xfd   : > { %v634_v6 = vpop.xlane.xlu1 %633  ;;  %v1123_v11 = vadd.f32 %v5451_v15, %v1083_v63  ;;  %v1156_v8 = vmax.f32 %v1122_v2, 0.0  ;;  %v4899_v7 = vpop.eup %4898 }
  0xfe   : > { %v913_v24 = vmax.f32 %v879_v48, 0.0  ;;  %v5606_v13 = vmul.f32 0.0078125, %v634_v6  ;;  %v846_v10 = vmul.f32 %v5599_v0, %v5599_v0  ;;  %v980_v59 = vadd.f32 1e-05, %v912_v3 }
  0xff   : > { %v4901_v1 = vpop.eup %4900  ;;  %v769_v19 = vpop.xlane.xlu0 %768  ;;  %v1157_v20 = vmax.f32 %v1123_v11, 0.0  ;;  %v1044_v30 = vmul.f32 %v4899_v7, %v942_v47 }
 0x100   : > { %v981_v35 = vadd.f32 1e-05, %v913_v24  ;;  %v847_v26 = vmul.f32 %v5606_v13, %v5606_v13  ;;  %v812_v29 = vmul.f32 0.0078125, %v769_v19  ;;  %4906 = vrsqrt.f32 %v980_v59 }
 0x101   : > { %v771_v32 = vpop.xlane.xlu1 %770  ;;  %v1182_v31 = vpack.c.bf16 %v1157_v20, %v1156_v8  ;;  %v1045_v52 = vmul.f32 %v4901_v1, %v943_v25  ;;  %v1084_v36 = vmul.f32 %v5437_v55, %v1044_v30  ;;  %v945_v25 = vsub.f32 %v5361_v50, %v5570_v23 }
 0x102   : > { %4908 = vrsqrt.f32 %v981_v35  ;;  %v813_v39 = vmul.f32 0.0078125, %v771_v32  ;;  %v880_v43 = vsub.f32 %v812_v29, %v846_v10 }
 0x103   : > { %4688 = vmatmul.mubr.bf16.gmra.mxu0 %v1182_v31  ;;  %v636_v40 = vpop.xlane.xlu0 %635  ;;  %v1085_v47 = vmul.f32 %v5437_v55, %v1045_v52  ;;  %v1124_v60 = vadd.f32 %v5451_v15, %v1084_v36  ;;  %v946_v52 = vsub.f32 %v5370_v53, %v5581_v51 }
 0x104   : > { %v881_v56 = vsub.f32 %v813_v39, %v847_v26  ;;  %v914_v63 = vmax.f32 %v880_v43, 0.0  ;;  %v5617_v2 = vmul.f32 0.0078125, %v636_v40  ;;  %4691 = vmatprep.mubr.msk.bf16.mxu0 %vm5096_vm0, %v5095_v12 }
 0x105   : > { %v4903_v48 = vpop.eup %4902  ;;  %v638_v3 = vpop.xlane.xlu1 %637  ;;  %v1125_v17 = vadd.f32 %v5451_v15, %v1085_v47  ;;  %v1158_v6 = vmax.f32 %v1124_v60, 0.0  ;;  %v947_v60 = vsub.f32 %v5373_v54, %v5588_v18 }
 0x106   : > { %v915_v11 = vmax.f32 %v881_v56, 0.0  ;;  %v982_v8 = vadd.f32 1e-05, %v914_v63  ;;  %v5624_v7 = vmul.f32 0.0078125, %v638_v3  ;;  %v848_v10 = vmul.f32 %v5617_v2, %v5617_v2 }
 0x107   : > { %v4905_v24 = vpop.eup %4904  ;;  %v773_v1 = vpop.xlane.xlu0 %772  ;;  %v1159_v59 = vmax.f32 %v1125_v17, 0.0  ;;  %v1046_v19 = vmul.f32 %v4903_v48, %v944_v44 }
 0x108   : > { %v983_v20 = vadd.f32 1e-05, %v915_v11  ;;  %4910 = vrsqrt.f32 %v982_v8  ;;  %v849_v23 = vmul.f32 %v5624_v7, %v5624_v7  ;;  %v814_v35 = vmul.f32 0.0078125, %v773_v1 }
 0x109   : > { %v775_v30 = vpop.xlane.xlu1 %774  ;;  %v1183_v26 = vpack.c.bf16 %v1159_v59, %v1158_v6  ;;  %v1047_v29 = vmul.f32 %v4905_v24, %v945_v25  ;;  %v1086_v32 = vmul.f32 %v5437_v55, %v1046_v19 }
 0x10a   : > { %4912 = vrsqrt.f32 %v983_v20  ;;  %v815_v31 = vmul.f32 0.0078125, %v775_v30  ;;  %v882_v36 = vsub.f32 %v814_v35, %v848_v10 }
 0x10b   : > { %4692 = vmatmul.mubr.bf16.gmra.mxu0 %v1183_v26  ;;  %v640_v39 = vpop.xlane.xlu0 %639  ;;  %v1087_v43 = vmul.f32 %v5437_v55, %v1047_v29  ;;  %v1126_v44 = vadd.f32 %v5451_v15, %v1086_v32  ;;  %v948_v32 = vsub.f32 %v5382_v57, %v5599_v0 }
 0x10c   : > { %v883_v40 = vsub.f32 %v815_v31, %v849_v23  ;;  %v5635_v47 = vmul.f32 0.0078125, %v640_v39  ;;  %4695 = vmatprep.mubr.msk.bf16.mxu0 %vm5096_vm0, %v5095_v12  ;;  %v916_v56 = vmax.f32 %v882_v36, 0.0 }
 0x10d   : > { %v642_v63 = vpop.xlane.xlu1 %641  ;;  %v1127_v51 = vadd.f32 %v5451_v15, %v1087_v43  ;;  %v1160_v48 = vmax.f32 %v1126_v44, 0.0  ;;  %v4907_v25 = vpop.eup %4906 }
 0x10e   : > { %v917_v3 = vmax.f32 %v883_v40, 0.0  ;;  %v5642_v17 = vmul.f32 0.0078125, %v642_v63  ;;  %v850_v6 = vmul.f32 %v5635_v47, %v5635_v47  ;;  %v984_v8 = vadd.f32 1e-05, %v916_v56 }
 0x10f   : > { %v4909_v11 = vpop.eup %4908  ;;  %v777_v24 = vpop.xlane.xlu0 %776  ;;  %v1161_v10 = vmax.f32 %v1127_v51, 0.0  ;;  %v1048_v1 = vmul.f32 %v4907_v25, %v946_v52 }
 0x110   : > { %v985_v59 = vadd.f32 1e-05, %v917_v3  ;;  %v851_v18 = vmul.f32 %v5642_v17, %v5642_v17  ;;  %v816_v19 = vmul.f32 0.0078125, %v777_v24  ;;  %4914 = vrsqrt.f32 %v984_v8 }
 0x111   : > { %v779_v20 = vpop.xlane.xlu1 %778  ;;  %v1184_v23 = vpack.c.bf16 %v1161_v10, %v1160_v48  ;;  %v1049_v30 = vmul.f32 %v4909_v11, %v947_v60  ;;  %v1088_v35 = vmul.f32 %v5437_v55, %v1048_v1  ;;  %v949_v60 = vsub.f32 %v5385_v58, %v5606_v13 }
 0x112   : > { %4916 = vrsqrt.f32 %v985_v59  ;;  %v817_v26 = vmul.f32 0.0078125, %v779_v20  ;;  %v884_v29 = vsub.f32 %v816_v19, %v850_v6 }
 0x113   : > { %4696 = vmatmul.mubr.bf16.gmra.mxu0 %v1184_v23  ;;  %v644_v31 = vpop.xlane.xlu0 %643  ;;  %v1089_v52 = vmul.f32 %v5437_v55, %v1049_v30  ;;  %v1128_v36 = vadd.f32 %v5451_v15, %v1088_v35  ;;  %v950_v30 = vsub.f32 %v5394_v61, %v5617_v2 }
 0x114   : > { %v885_v39 = vsub.f32 %v817_v26, %v851_v18  ;;  %v918_v43 = vmax.f32 %v884_v29, 0.0  ;;  %4699 = vmatprep.mubr.msk.bf16.mxu0 %vm5096_vm0, %v5095_v12  ;;  %v5655_v44 = vmul.f32 0.0078125, %v644_v31 }
 0x115   : > { %v4911_v40 = vpop.eup %4910  ;;  %v646_v56 = vpop.xlane.xlu1 %645  ;;  %v1129_v0 = vadd.f32 %v5451_v15, %v1089_v52  ;;  %v1162_v63 = vmax.f32 %v1128_v36, 0.0  ;;  %v951_v36 = vsub.f32 %v5397_v62, %v5624_v7 }
 0x116   : > { %v919_v51 = vmax.f32 %v885_v39, 0.0  ;;  %v986_v48 = vadd.f32 1e-05, %v918_v43  ;;  %v5660_v25 = vmul.f32 0.0078125, %v646_v56  ;;  %v852_v6 = vmul.f32 %v5655_v44, %v5655_v44 }
 0x117   : > { %v4913_v3 = vpop.eup %4912  ;;  %v1163_v11 = vmax.f32 %v1129_v0, 0.0  ;;  %v781_v8 = vpop.xlane.xlu0 %780  ;;  %v1050_v24 = vmul.f32 %v4911_v40, %v948_v32 }
 0x118   : > { %v987_v10 = vadd.f32 1e-05, %v919_v51  ;;  %4918 = vrsqrt.f32 %v986_v48  ;;  %v853_v13 = vmul.f32 %v5660_v25, %v5660_v25  ;;  %v818_v18 = vmul.f32 0.0078125, %v781_v8 }
 0x119   : > { %v1185_v1 = vpack.c.bf16 %v1163_v11, %v1162_v63  ;;  %v783_v59 = vpop.xlane.xlu1 %782  ;;  %v1051_v19 = vmul.f32 %v4913_v3, %v949_v60  ;;  %v1090_v20 = vmul.f32 %v5437_v55, %v1050_v24 }
 0x11a   : > { %4920 = vrsqrt.f32 %v987_v10  ;;  %v819_v23 = vmul.f32 0.0078125, %v783_v59  ;;  %v886_v35 = vsub.f32 %v818_v18, %v852_v6  ;;  %v5686_v18 = vld [vmem:[%s5210_s24 + $0xd0] sm:$0xff] }
 0x11b   : > { %4700 = vmatmul.mubr.bf16.gmra.mxu0 %v1185_v1  ;;  %v1091_v26 = vmul.f32 %v5437_v55, %v1051_v19  ;;  %v1130_v29 = vadd.f32 %v5451_v15, %v1090_v20  ;;  %v648_v32 = vpop.xlane.xlu0 %647  ;;  %7761 = vst [vmem:[#allocation27_spill] sm:$0xff] %v5686_v18  ;;  %v952_v19 = vsub.f32 %v5686_v18, %v5635_v47 }
 0x11c   : > { %v887_v31 = vsub.f32 %v819_v23, %v853_v13  ;;  %4703 = vmatprep.mubr.msk.bf16.mxu0 %vm5096_vm0, %v5095_v12  ;;  %v5673_v52 = vmul.f32 0.0078125, %v648_v32  ;;  %v920_v39 = vmax.f32 %v886_v35, 0.0 }
 0x11d   : > { %v1131_v43 = vadd.f32 %v5451_v15, %v1091_v26  ;;  %v1164_v2 = vmax.f32 %v1130_v29, 0.0  ;;  %v650_v40 = vpop.xlane.xlu1 %649  ;;  %v4915_v60 = vpop.eup %4914  ;;  %v5693_v26 = vld [vmem:[%s5210_s24 + $0xd8] sm:$0xff] }
 0x11e   : > { %v921_v56 = vmax.f32 %v887_v31, 0.0  ;;  %v5678_v0 = vmul.f32 0.0078125, %v650_v40  ;;  %v854_v63 = vmul.f32 %v5673_v52, %v5673_v52  ;;  %v988_v48 = vadd.f32 1e-05, %v920_v39  ;;  %7762 = vst [vmem:[#allocation28_spill] sm:$0xff] %v5693_v26 }
 0x11f   : > { %v4917_v51 = vpop.eup %4916  ;;  %v1165_v3 = vmax.f32 %v1131_v43, 0.0  ;;  %v785_v6 = vpop.xlane.xlu0 %784  ;;  %v1052_v11 = vmul.f32 %v4915_v60, %v950_v30  ;;  %v953_v29 = vsub.f32 %v5693_v26, %v5642_v17 }
 0x120   : > { %v989_v8 = vadd.f32 1e-05, %v921_v56  ;;  %v855_v7 = vmul.f32 %v5678_v0, %v5678_v0  ;;  %v820_v24 = vmul.f32 0.0078125, %v785_v6  ;;  %4922 = vrsqrt.f32 %v988_v48 }
 0x121   : > { %v1186_v10 = vpack.c.bf16 %v1165_v3, %v1164_v2  ;;  %v787_v13 = vpop.xlane.xlu1 %786  ;;  %v1053_v1 = vmul.f32 %v4917_v51, %v951_v36  ;;  %v1092_v59 = vmul.f32 %v5437_v55, %v1052_v11  ;;  %v5704_v11 = vld [vmem:[%s5210_s24 + $0xe0] sm:$0xff] }
 0x122   : > { %4924 = vrsqrt.f32 %v989_v8  ;;  %v821_v20 = vmul.f32 0.0078125, %v787_v13  ;;  %v888_v23 = vsub.f32 %v820_v24, %v854_v63  ;;  %7763 = vst [vmem:[#allocation29_spill] sm:$0xff] %v5704_v11  ;;  %v954_v8 = vsub.f32 %v5704_v11, %v5655_v44 }
 0x123   : > { %4704 = vmatmul.mubr.bf16.gmra.mxu0 %v1186_v10  ;;  %v1093_v30 = vmul.f32 %v5437_v55, %v1053_v1  ;;  %v1132_v35 = vadd.f32 %v5451_v15, %v1092_v59 }
 0x124   : > { %v889_v32 = vsub.f32 %v821_v20, %v855_v7  ;;  %4707 = vmatprep.mubr.msk.bf16.mxu0 %vm5096_vm0, %v5095_v12  ;;  %v922_v31 = vmax.f32 %v888_v23, 0.0  ;;  %v5709_v7 = vld [vmem:[%s5210_s24 + $0xe8] sm:$0xff] }
 0x125   : > { %v4919_v36 = vpop.eup %4918  ;;  %v1133_v47 = vadd.f32 %v5451_v15, %v1093_v30  ;;  %v1166_v39 = vmax.f32 %v1132_v35, 0.0  ;;  %7764 = vst [vmem:[#allocation30_spill] sm:$0xff] %v5709_v7  ;;  %v955_v24 = vsub.f32 %v5709_v7, %v5660_v25  ;;  %v5718_v35 = vld [vmem:[%s5210_s24 + $0xf0] sm:$0xff] }
 0x126   : > { %v923_v43 = vmax.f32 %v889_v32, 0.0  ;;  %v990_v2 = vadd.f32 1e-05, %v922_v31  ;;  %v1054_v40 = vmul.f32 %v4919_v36, %v952_v19  ;;  %7765 = vst [vmem:[#allocation31_spill] sm:$0xff] %v5718_v35  ;;  %v956_v25 = vsub.f32 %v5718_v35, %v5673_v52  ;;  %v5725_v31 = vld [vmem:[%s5210_s24 + $0xf8] sm:$0xff] }
 0x127   : > { %v4921_v60 = vpop.eup %4920  ;;  %v1167_v56 = vmax.f32 %v1133_v47, 0.0  ;;  %7766 = vst [vmem:[#allocation32_spill] sm:$0xff] %v5725_v31  ;;  %v957_v36 = vsub.f32 %v5725_v31, %v5678_v0 }
 0x128   : > { %v991_v63 = vadd.f32 1e-05, %v923_v43  ;;  %4926 = vrsqrt.f32 %v990_v2  ;;  %v1055_v51 = vmul.f32 %v4921_v60, %v953_v29  ;;  %v1094_v17 = vmul.f32 %v5437_v55, %v1054_v40 }
 0x129   : > { %v1187_v48 = vpack.c.bf16 %v1167_v56, %v1166_v39 }
 0x12a   : > { %4928 = vrsqrt.f32 %v991_v63  ;;  %v1095_v3 = vmul.f32 %v5437_v55, %v1055_v51  ;;  %v1134_v6 = vadd.f32 %v5451_v15, %v1094_v17 }
 0x12b   : > { %4708 = vmatmul.mubr.bf16.gmra.mxu0 %v1187_v48 }
 0x12c   : > { %4711 = vmatprep.mubr.msk.bf16.mxu0 %vm5096_vm0, %v5095_v12  ;;  %v1135_v10 = vadd.f32 %v5451_v15, %v1095_v3  ;;  %v1168_v13 = vmax.f32 %v1134_v6, 0.0 }
 0x12d   : > { %v4923_v1 = vpop.eup %4922 }
 0x12e   : > { %v1169_v59 = vmax.f32 %v1135_v10, 0.0  ;;  %v1056_v20 = vmul.f32 %v4923_v1, %v954_v8  ;;  %v5741_v8 = vld [vmem:[%s7683_s5] ss:$0 sm:$0xff] }
 0x12f   : > { %v4925_v19 = vpop.eup %4924 }
 0x130   : > { %v1188_v23 = vpack.c.bf16 %v1169_v59, %v1168_v13  ;;  %v1057_v30 = vmul.f32 %v4925_v19, %v955_v24  ;;  %v1096_v44 = vmul.f32 %v5437_v55, %v1056_v20 }
 0x132   : > { %v1097_v29 = vmul.f32 %v5437_v55, %v1057_v30  ;;  %v1136_v32 = vadd.f32 %v5451_v15, %v1096_v44 }
 0x133   : > { %4712 = vmatmul.mubr.bf16.gmra.mxu0 %v1188_v23 }
 0x134   : > { %4715 = vmatprep.mubr.msk.bf16.mxu0 %vm5096_vm0, %v5095_v12  ;;  %v1137_v47 = vadd.f32 %v5451_v15, %v1097_v29  ;;  %v1170_v43 = vmax.f32 %v1136_v32, 0.0 }
 0x135   : > { %v4927_v39 = vpop.eup %4926 }
 0x136   : > { %v1171_v2 = vmax.f32 %v1137_v47, 0.0  ;;  %v1058_v40 = vmul.f32 %v4927_v39, %v956_v25 }
 0x137   : > { %v4929_v52 = vpop.eup %4928 }
 0x138   : > { %v1189_v60 = vpack.c.bf16 %v1171_v2, %v1170_v43  ;;  %v1059_v56 = vmul.f32 %v4929_v52, %v957_v36  ;;  %v1098_v63 = vmul.f32 %v5437_v55, %v1058_v40 }
 0x13a   : > { %v1099_v51 = vmul.f32 %v5437_v55, %v1059_v56  ;;  %v1138_v17 = vadd.f32 %v5451_v15, %v1098_v63 }
 0x13b   : > { %4716 = vmatmul.mubr.bf16.gmra.mxu0 %v1189_v60 }
 0x13c   : > { %4719 = vmatprep.mubr.msk.bf16.mxu0 %vm5096_vm0, %v5095_v12  ;;  %v1139_v0 = vadd.f32 %v5451_v15, %v1099_v51  ;;  %v1172_v48 = vmax.f32 %v1138_v17, 0.0 }
 0x13e   : > { %v1173_v3 = vmax.f32 %v1139_v0, 0.0 }
 0x140   : > { %v1190_v6 = vpack.c.bf16 %v1173_v3, %v1172_v48 }
 0x143   : > { %4720 = vmatmul.mubr.bf16.gmra.mxu0 %v1190_v6 }
 0x183   : > { %v1296_v24 = vpop.f32.mrf.mxu0 }
 0x184   : > { %v5744_v55 = vadd.f32 %v5741_v8, %v1296_v24 }
 0x185   : > { %v4657_v10 = vpop.f32.mrf.mxu0 }
 0x186   : > { %v1434_v12 = vsel %vm1433_vm1, %v5744_v55, 0.0  ;;  %v1571_v15 = vmul.f32 %v5744_v55, %v5744_v55 }
 0x187   : > { %v1299_v13 = vpop.f32.mrf.mxu0  ;;  %1435 = vadd.xlane.f32.xlu0 %v1434_v12 }
 0x188   : > { %v5751_v1 = vadd.f32 %v5741_v8, %v1299_v13  ;;  %v1605_v20 = vsel %vm1433_vm1, %v1571_v15, 0.0 }
 0x189   : > { %v4658_v59 = vpop.f32.mrf.mxu0 }
 0x18a   : > { %v1437_v19 = vsel %vm1433_vm1, %v5751_v1, 0.0  ;;  %v1572_v23 = vmul.f32 %v5751_v1, %v5751_v1 }
 0x18b   : > { %1438 = vadd.xlane.f32.xlu1 %v1437_v19  ;;  %1606 = vadd.xlane.f32.xlu0 %v1605_v20  ;;  %v1304_v30 = vpop.f32.mrf.mxu0 }
 0x18c   : > { %v5759_v44 = vadd.f32 %v5741_v8, %v1304_v30  ;;  %v1608_v29 = vsel %vm1433_vm1, %v1572_v23, 0.0 }
 0x18d   : > { %v4661_v25 = vpop.f32.mrf.mxu0 }
 0x18e   : > { %v1440_v32 = vsel %vm1433_vm1, %v5759_v44, 0.0  ;;  %v1573_v36 = vmul.f32 %v5759_v44, %v5759_v44 }
 0x18f   : > { %1609 = vadd.xlane.f32.xlu1 %v1608_v29  ;;  %1441 = vadd.xlane.f32.xlu0 %v1440_v32  ;;  %v1307_v47 = vpop.f32.mrf.mxu0 }
 0x190   : > { %v5767_v39 = vadd.f32 %v5741_v8, %v1307_v47  ;;  %v1611_v2 = vsel %vm1433_vm1, %v1573_v36, 0.0 }
 0x191   : > { %v4662_v43 = vpop.f32.mrf.mxu0 }
 0x192   : > { %v1443_v40 = vsel %vm1433_vm1, %v5767_v39, 0.0  ;;  %v1574_v52 = vmul.f32 %v5767_v39, %v5767_v39 }
 0x193   : > { %1612 = vadd.xlane.f32.xlu0 %v1611_v2  ;;  %1444 = vadd.xlane.f32.xlu1 %v1443_v40  ;;  %v1312_v60 = vpop.f32.mrf.mxu0 }
 0x194   : > { %v5775_v56 = vadd.f32 %v5741_v8, %v1312_v60  ;;  %v1614_v51 = vsel %vm1433_vm1, %v1574_v52, 0.0 }
 0x195   : > { %v4665_v63 = vpop.f32.mrf.mxu0 }
 0x196   : > { %v1446_v17 = vsel %vm1433_vm1, %v5775_v56, 0.0  ;;  %v1575_v0 = vmul.f32 %v5775_v56, %v5775_v56 }
 0x197   : > { %1615 = vadd.xlane.f32.xlu1 %v1614_v51  ;;  %1447 = vadd.xlane.f32.xlu0 %v1446_v17  ;;  %v1315_v48 = vpop.f32.mrf.mxu0 }
 0x198   : > { %v5783_v3 = vadd.f32 %v5741_v8, %v1315_v48  ;;  %v1617_v24 = vsel %vm1433_vm1, %v1575_v0, 0.0 }
 0x199   : > { %v4666_v6 = vpop.f32.mrf.mxu0 }
 0x19a   : > { %v1449_v10 = vsel %vm1433_vm1, %v5783_v3, 0.0  ;;  %v1576_v12 = vmul.f32 %v5783_v3, %v5783_v3 }
 0x19b   : > { %1618 = vadd.xlane.f32.xlu0 %v1617_v24  ;;  %1450 = vadd.xlane.f32.xlu1 %v1449_v10  ;;  %v1320_v15 = vpop.f32.mrf.mxu0 }
 0x19c   : > { %v5791_v13 = vadd.f32 %v5741_v8, %v1320_v15  ;;  %v1620_v19 = vsel %vm1433_vm1, %v1576_v12, 0.0 }
 0x19d   : > { %v4669_v59 = vpop.f32.mrf.mxu0 }
 0x19e   : > { %v1452_v20 = vsel %vm1433_vm1, %v5791_v13, 0.0  ;;  %v1577_v23 = vmul.f32 %v5791_v13, %v5791_v13 }
 0x19f   : > { %1621 = vadd.xlane.f32.xlu1 %v1620_v19  ;;  %1453 = vadd.xlane.f32.xlu0 %v1452_v20  ;;  %v1323_v30 = vpop.f32.mrf.mxu0 }
 0x1a0   : > { %v5799_v25 = vadd.f32 %v5741_v8, %v1323_v30  ;;  %v1623_v29 = vsel %vm1433_vm1, %v1577_v23, 0.0 }
 0x1a1   : > { %v4670_v32 = vpop.f32.mrf.mxu0 }
 0x1a2   : > { %v1455_v36 = vsel %vm1433_vm1, %v5799_v25, 0.0  ;;  %v1578_v47 = vmul.f32 %v5799_v25, %v5799_v25 }
 0x1a3   : > { %1624 = vadd.xlane.f32.xlu0 %v1623_v29  ;;  %1456 = vadd.xlane.f32.xlu1 %v1455_v36  ;;  %v1328_v43 = vpop.f32.mrf.mxu0 }
 0x1a4   : > { %v5807_v2 = vadd.f32 %v5741_v8, %v1328_v43  ;;  %v1626_v40 = vsel %vm1433_vm1, %v1578_v47, 0.0 }
 0x1a5   : > { %v4673_v52 = vpop.f32.mrf.mxu0 }
 0x1a6   : > { %v1458_v60 = vsel %vm1433_vm1, %v5807_v2, 0.0  ;;  %v1579_v63 = vmul.f32 %v5807_v2, %v5807_v2 }
 0x1a7   : > { %1627 = vadd.xlane.f32.xlu1 %v1626_v40  ;;  %1459 = vadd.xlane.f32.xlu0 %v1458_v60  ;;  %v1331_v51 = vpop.f32.mrf.mxu0 }
 0x1a8   : > { %v5815_v17 = vadd.f32 %v5741_v8, %v1331_v51  ;;  %v1629_v0 = vsel %vm1433_vm1, %v1579_v63, 0.0 }
 0x1a9   : > { %v4674_v48 = vpop.f32.mrf.mxu0 }
 0x1aa   : > { %v1461_v6 = vsel %vm1433_vm1, %v5815_v17, 0.0  ;;  %v1580_v24 = vmul.f32 %v5815_v17, %v5815_v17 }
 0x1ab   : > { %1630 = vadd.xlane.f32.xlu0 %v1629_v0  ;;  %1462 = vadd.xlane.f32.xlu1 %v1461_v6  ;;  %v1336_v10 = vpop.f32.mrf.mxu0 }
 0x1ac   : > { %v5823_v12 = vadd.f32 %v5741_v8, %v1336_v10  ;;  %v1632_v15 = vsel %vm1433_vm1, %v1580_v24, 0.0 }
 0x1ad   : > { %v4677_v59 = vpop.f32.mrf.mxu0 }
 0x1ae   : > { %v1464_v19 = vsel %vm1433_vm1, %v5823_v12, 0.0  ;;  %v1581_v20 = vmul.f32 %v5823_v12, %v5823_v12 }
 0x1af   : > { %1633 = vadd.xlane.f32.xlu1 %v1632_v15  ;;  %1465 = vadd.xlane.f32.xlu0 %v1464_v19  ;;  %v1339_v23 = vpop.f32.mrf.mxu0 }
 0x1b0   : > { %v5831_v30 = vadd.f32 %v5741_v8, %v1339_v23  ;;  %v1635_v29 = vsel %vm1433_vm1, %v1581_v20, 0.0 }
 0x1b1   : > { %v4678_v32 = vpop.f32.mrf.mxu0 }
 0x1b2   : > { %v1467_v36 = vsel %vm1433_vm1, %v5831_v30, 0.0  ;;  %v1582_v47 = vmul.f32 %v5831_v30, %v5831_v30 }
 0x1b3   : > { %1636 = vadd.xlane.f32.xlu0 %v1635_v29  ;;  %1468 = vadd.xlane.f32.xlu1 %v1467_v36  ;;  %v1344_v43 = vpop.f32.mrf.mxu0 }
 0x1b4   : > { %v5839_v40 = vadd.f32 %v5741_v8, %v1344_v43  ;;  %v1638_v52 = vsel %vm1433_vm1, %v1582_v47, 0.0 }
 0x1b5   : > { %v4681_v60 = vpop.f32.mrf.mxu0 }
 0x1b6   : > { %v1470_v63 = vsel %vm1433_vm1, %v5839_v40, 0.0  ;;  %v1583_v51 = vmul.f32 %v5839_v40, %v5839_v40 }
 0x1b7   : > { %1639 = vadd.xlane.f32.xlu1 %v1638_v52  ;;  %1471 = vadd.xlane.f32.xlu0 %v1470_v63  ;;  %v1347_v0 = vpop.f32.mrf.mxu0 }
 0x1b8   : > { %v5847_v48 = vadd.f32 %v5741_v8, %v1347_v0  ;;  %v1641_v6 = vsel %vm1433_vm1, %v1583_v51, 0.0 }
 0x1b9   : > { %v4682_v24 = vpop.f32.mrf.mxu0 }
 0x1ba   : > { %v1473_v10 = vsel %vm1433_vm1, %v5847_v48, 0.0  ;;  %v1584_v15 = vmul.f32 %v5847_v48, %v5847_v48 }
 0x1bb   : > { %1642 = vadd.xlane.f32.xlu0 %v1641_v6  ;;  %1474 = vadd.xlane.f32.xlu1 %v1473_v10  ;;  %v1352_v59 = vpop.f32.mrf.mxu0 }
 0x1bc   : > { %v5855_v19 = vadd.f32 %v5741_v8, %v1352_v59  ;;  %v1644_v20 = vsel %vm1433_vm1, %v1584_v15, 0.0 }
 0x1bd   : > { %v4685_v23 = vpop.f32.mrf.mxu0 }
 0x1be   : > { %v1476_v29 = vsel %vm1433_vm1, %v5855_v19, 0.0  ;;  %v1585_v32 = vmul.f32 %v5855_v19, %v5855_v19 }
 0x1bf   : > { %1645 = vadd.xlane.f32.xlu1 %v1644_v20  ;;  %1477 = vadd.xlane.f32.xlu0 %v1476_v29  ;;  %v1355_v36 = vpop.f32.mrf.mxu0 }
 0x1c0   : > { %v5863_v47 = vadd.f32 %v5741_v8, %v1355_v36  ;;  %v1647_v43 = vsel %vm1433_vm1, %v1585_v32, 0.0 }
 0x1c1   : > { %v4686_v52 = vpop.f32.mrf.mxu0 }
 0x1c2   : > { %v1479_v60 = vsel %vm1433_vm1, %v5863_v47, 0.0  ;;  %v1586_v63 = vmul.f32 %v5863_v47, %v5863_v47 }
 0x1c3   : > { %1648 = vadd.xlane.f32.xlu0 %v1647_v43  ;;  %1480 = vadd.xlane.f32.xlu1 %v1479_v60  ;;  %v1360_v51 = vpop.f32.mrf.mxu0 }
 0x1c4   : > { %v5871_v0 = vadd.f32 %v5741_v8, %v1360_v51  ;;  %v1650_v6 = vsel %vm1433_vm1, %v1586_v63, 0.0 }
 0x1c5   : > { %v4689_v24 = vpop.f32.mrf.mxu0 }
 0x1c6   : > { %v1482_v10 = vsel %vm1433_vm1, %v5871_v0, 0.0  ;;  %v1587_v15 = vmul.f32 %v5871_v0, %v5871_v0 }
 0x1c7   : > { %1651 = vadd.xlane.f32.xlu1 %v1650_v6  ;;  %1483 = vadd.xlane.f32.xlu0 %v1482_v10  ;;  %v1363_v59 = vpop.f32.mrf.mxu0 }
 0x1c8   : > { %v5879_v20 = vadd.f32 %v5741_v8, %v1363_v59  ;;  %v1653_v23 = vsel %vm1433_vm1, %v1587_v15, 0.0 }
 0x1c9   : > { %v4690_v29 = vpop.f32.mrf.mxu0 }
 0x1ca   : > { %v1485_v32 = vsel %vm1433_vm1, %v5879_v20, 0.0  ;;  %v1588_v36 = vmul.f32 %v5879_v20, %v5879_v20 }
 0x1cb   : > { %1654 = vadd.xlane.f32.xlu0 %v1653_v23  ;;  %1486 = vadd.xlane.f32.xlu1 %v1485_v32  ;;  %v1368_v43 = vpop.f32.mrf.mxu0 }
 0x1cc   : > { %v5887_v52 = vadd.f32 %v5741_v8, %v1368_v43  ;;  %v1656_v60 = vsel %vm1433_vm1, %v1588_v36, 0.0 }
 0x1cd   : > { %v4693_v63 = vpop.f32.mrf.mxu0 }
 0x1ce   : > { %v1488_v51 = vsel %vm1433_vm1, %v5887_v52, 0.0  ;;  %v1589_v6 = vmul.f32 %v5887_v52, %v5887_v52 }
 0x1cf   : > { %1657 = vadd.xlane.f32.xlu1 %v1656_v60  ;;  %1489 = vadd.xlane.f32.xlu0 %v1488_v51  ;;  %v1371_v24 = vpop.f32.mrf.mxu0 }
 0x1d0   : > { %v5895_v10 = vadd.f32 %v5741_v8, %v1371_v24  ;;  %v1659_v15 = vsel %vm1433_vm1, %v1589_v6, 0.0 }
 0x1d1   : > { %v4694_v59 = vpop.f32.mrf.mxu0 }
 0x1d2   : > { %v1491_v23 = vsel %vm1433_vm1, %v5895_v10, 0.0  ;;  %v1590_v29 = vmul.f32 %v5895_v10, %v5895_v10 }
 0x1d3   : > { %1660 = vadd.xlane.f32.xlu0 %v1659_v15  ;;  %1492 = vadd.xlane.f32.xlu1 %v1491_v23  ;;  %v1376_v32 = vpop.f32.mrf.mxu0 }
 0x1d4   : > { %v5903_v36 = vadd.f32 %v5741_v8, %v1376_v32  ;;  %v1662_v43 = vsel %vm1433_vm1, %v1590_v29, 0.0 }
 0x1d5   : > { %v4697_v60 = vpop.f32.mrf.mxu0 }
 0x1d6   : > { %v1494_v63 = vsel %vm1433_vm1, %v5903_v36, 0.0  ;;  %v1591_v51 = vmul.f32 %v5903_v36, %v5903_v36 }
 0x1d7   : > { %1663 = vadd.xlane.f32.xlu1 %v1662_v43  ;;  %1495 = vadd.xlane.f32.xlu0 %v1494_v63  ;;  %v1379_v6 = vpop.f32.mrf.mxu0 }
 0x1d8   : > { %v5911_v24 = vadd.f32 %v5741_v8, %v1379_v6  ;;  %v1665_v15 = vsel %vm1433_vm1, %v1591_v51, 0.0 }
 0x1d9   : > { %v4698_v59 = vpop.f32.mrf.mxu0 }
 0x1da   : > { %v1497_v23 = vsel %vm1433_vm1, %v5911_v24, 0.0  ;;  %v1592_v29 = vmul.f32 %v5911_v24, %v5911_v24 }
 0x1db   : > { %1666 = vadd.xlane.f32.xlu0 %v1665_v15  ;;  %1498 = vadd.xlane.f32.xlu1 %v1497_v23  ;;  %v1384_v32 = vpop.f32.mrf.mxu0 }
 0x1dc   : > { %v5919_v60 = vadd.f32 %v5741_v8, %v1384_v32  ;;  %v1668_v43 = vsel %vm1433_vm1, %v1592_v29, 0.0 }
 0x1dd   : > { %v4701_v63 = vpop.f32.mrf.mxu0 }
 0x1de   : > { %v1500_v6 = vsel %vm1433_vm1, %v5919_v60, 0.0  ;;  %v1593_v51 = vmul.f32 %v5919_v60, %v5919_v60 }
 0x1df   : > { %1669 = vadd.xlane.f32.xlu1 %v1668_v43  ;;  %1501 = vadd.xlane.f32.xlu0 %v1500_v6  ;;  %v1387_v59 = vpop.f32.mrf.mxu0 }
 0x1e0   : > { %v5927_v7 = vadd.f32 %v5741_v8, %v1387_v59  ;;  %v1671_v15 = vsel %vm1433_vm1, %v1593_v51, 0.0 }
 0x1e1   : > { %v4702_v23 = vpop.f32.mrf.mxu0 }
 0x1e2   : > { %v1503_v32 = vsel %vm1433_vm1, %v5927_v7, 0.0  ;;  %v1594_v29 = vmul.f32 %v5927_v7, %v5927_v7 }
 0x1e3   : > { %1672 = vadd.xlane.f32.xlu0 %v1671_v15  ;;  %1504 = vadd.xlane.f32.xlu1 %v1503_v32  ;;  %v1392_v63 = vpop.f32.mrf.mxu0 }
 0x1e4   : > { %v5935_v31 = vadd.f32 %v5741_v8, %v1392_v63  ;;  %v1674_v43 = vsel %vm1433_vm1, %v1594_v29, 0.0 }
 0x1e5   : > { %v4705_v6 = vpop.f32.mrf.mxu0 }
 0x1e6   : > { %v1506_v59 = vsel %vm1433_vm1, %v5935_v31, 0.0  ;;  %v1595_v51 = vmul.f32 %v5935_v31, %v5935_v31 }
 0x1e7   : > { %1675 = vadd.xlane.f32.xlu1 %v1674_v43  ;;  %1507 = vadd.xlane.f32.xlu0 %v1506_v59  ;;  %v1395_v23 = vpop.f32.mrf.mxu0 }
 0x1e8   : > { %v5943_v11 = vadd.f32 %v5741_v8, %v1395_v23  ;;  %v1677_v15 = vsel %vm1433_vm1, %v1595_v51, 0.0 }
 0x1e9   : > { %v4706_v32 = vpop.f32.mrf.mxu0 }
 0x1ea   : > { %v1509_v63 = vsel %vm1433_vm1, %v5943_v11, 0.0  ;;  %v1596_v29 = vmul.f32 %v5943_v11, %v5943_v11 }
 0x1eb   : > { %1678 = vadd.xlane.f32.xlu0 %v1677_v15  ;;  %1510 = vadd.xlane.f32.xlu1 %v1509_v63  ;;  %v1400_v6 = vpop.f32.mrf.mxu0 }
 0x1ec   : > { %v5951_v35 = vadd.f32 %v5741_v8, %v1400_v6  ;;  %v1680_v43 = vsel %vm1433_vm1, %v1596_v29, 0.0 }
 0x1ed   : > { %v4709_v59 = vpop.f32.mrf.mxu0 }
 0x1ee   : > { %v1512_v23 = vsel %vm1433_vm1, %v5951_v35, 0.0  ;;  %v1597_v51 = vmul.f32 %v5951_v35, %v5951_v35 }
 0x1ef   : > { %1681 = vadd.xlane.f32.xlu1 %v1680_v43  ;;  %1513 = vadd.xlane.f32.xlu0 %v1512_v23  ;;  %v1403_v32 = vpop.f32.mrf.mxu0 }
 0x1f0   : > { %v5959_v62 = vadd.f32 %v5741_v8, %v1403_v32  ;;  %v1683_v15 = vsel %vm1433_vm1, %v1597_v51, 0.0 }
 0x1f1   : > { %v4710_v63 = vpop.f32.mrf.mxu0 }
 0x1f2   : > { %v1515_v6 = vsel %vm1433_vm1, %v5959_v62, 0.0  ;;  %v1598_v29 = vmul.f32 %v5959_v62, %v5959_v62 }
 0x1f3   : > { %1684 = vadd.xlane.f32.xlu0 %v1683_v15  ;;  %1516 = vadd.xlane.f32.xlu1 %v1515_v6  ;;  %v1408_v59 = vpop.f32.mrf.mxu0 }
 0x1f4   : > { %v5967_v26 = vadd.f32 %v5741_v8, %v1408_v59  ;;  %v1686_v43 = vsel %vm1433_vm1, %v1598_v29, 0.0 }
 0x1f5   : > { %v4713_v23 = vpop.f32.mrf.mxu0 }
 0x1f6   : > { %v1518_v32 = vsel %vm1433_vm1, %v5967_v26, 0.0  ;;  %v1599_v51 = vmul.f32 %v5967_v26, %v5967_v26 }
 0x1f7   : > { %1687 = vadd.xlane.f32.xlu1 %v1686_v43  ;;  %1519 = vadd.xlane.f32.xlu0 %v1518_v32  ;;  %v1411_v63 = vpop.f32.mrf.mxu0 }
 0x1f8   : > { %v5975_v61 = vadd.f32 %v5741_v8, %v1411_v63  ;;  %v1689_v15 = vsel %vm1433_vm1, %v1599_v51, 0.0 }
 0x1f9   : > { %v4714_v6 = vpop.f32.mrf.mxu0 }
 0x1fa   : > { %v1521_v59 = vsel %vm1433_vm1, %v5975_v61, 0.0  ;;  %v1600_v29 = vmul.f32 %v5975_v61, %v5975_v61 }
 0x1fb   : > { %1690 = vadd.xlane.f32.xlu0 %v1689_v15  ;;  %1522 = vadd.xlane.f32.xlu1 %v1521_v59  ;;  %v1416_v23 = vpop.f32.mrf.mxu0 }
 0x1fc   : > { %v1692_v18 = vsel %vm1433_vm1, %v1600_v29, 0.0  ;;  %v5984_v43 = vadd.f32 %v5741_v8, %v1416_v23 }
 0x1fd   : > { %v4717_v32 = vpop.f32.mrf.mxu0 }
 0x1fe   : > { %v1601_v63 = vmul.f32 %v5984_v43, %v5984_v43  ;;  %v1524_v6 = vsel %vm1433_vm1, %v5984_v43, 0.0 }
 0x1ff   : > { %1693 = vadd.xlane.f32.xlu1 %v1692_v18  ;;  %v1419_v51 = vpop.f32.mrf.mxu0 }
 0x200   : > { %v5991_v54 = vadd.f32 %v5741_v8, %v1419_v51  ;;  %v1695_v15 = vsel %vm1433_vm1, %v1601_v63, 0.0 }
 0x201   : > { %1696 = vadd.xlane.f32.xlu0 %v1695_v15  ;;  %v4718_v59 = vpop.f32.mrf.mxu0 }
 0x202   : > { %7767 = vst [vmem:[#allocation33_spill] sm:$0xff] %v5991_v54  ;;  %v1527_v23 = vsel %vm1433_vm1, %v5991_v54, 0.0  ;;  %v1602_v32 = vmul.f32 %v5991_v54, %v5991_v54 }
 0x203   : > { %1525 = vadd.xlane.f32.xlu1 %v1524_v6  ;;  %v1424_v29 = vpop.f32.mrf.mxu0 }
 0x204   : > { %v1698_v53 = vsel %vm1433_vm1, %v1602_v32, 0.0  ;;  %v6000_v51 = vadd.f32 %v5741_v8, %v1424_v29 }
 0x205   : > { %v4721_v18 = vpop.f32.mrf.mxu0 }
 0x206   : > { %7768 = vst [vmem:[#allocation34_spill] sm:$0xff] %v6000_v51  ;;  %v1530_v63 = vsel %vm1433_vm1, %v6000_v51, 0.0 }
 0x207   : > { %1528 = vadd.xlane.f32.xlu1 %v1527_v23  ;;  %v1427_v58 = vpop.f32.mrf.mxu0 }
 0x208   : > { %v6005_v6 = vadd.f32 %v5741_v8, %v1427_v58 }
 0x209   : > { %v4722_v57 = vpop.f32.mrf.mxu0 }
 0x20a   : > { %7769 = vst [vmem:[#allocation35_spill] sm:$0xff] %v6005_v6  ;;  %v1533_v59 = vsel %vm1433_vm1, %v6005_v6, 0.0 }
 0x20b   : > { %1699 = vadd.xlane.f32.xlu1 %v1698_v53 }
 0x20f   : > { %1531 = vadd.xlane.f32.xlu1 %v1530_v63 }
 0x210   : > { %v1436_v15 = vpop.xlane.xlu0 %1435 }
 0x211   : > { %v1537_v23 = vmul.f32 0.015625, %v1436_v15 }
 0x213   : > { %1534 = vadd.xlane.f32.xlu1 %v1533_v59  ;;  %v1741_v46 = vmul.f32 %v1537_v23, %v1537_v23 }
 0x214   : > { %v1439_v18 = vpop.xlane.xlu1 %1438  ;;  %v1607_v32 = vpop.xlane.xlu0 %1606 }
 0x215   : > { %v6009_v29 = vmul.f32 0.015625, %v1439_v18  ;;  %v1707_v57 = vmul.f32 0.015625, %v1607_v32 }
 0x217   : > { %v1775_v53 = vsub.f32 %v1707_v57, %v1741_v46  ;;  %v1742_v58 = vmul.f32 %v6009_v29, %v6009_v29 }
 0x218   : > { %v1610_v50 = vpop.xlane.xlu1 %1609  ;;  %v1442_v45 = vpop.xlane.xlu0 %1441 }
 0x219   : > { %v1809_v8 = vmax.f32 %v1775_v53, 0.0  ;;  %v1708_v63 = vmul.f32 0.015625, %v1610_v50  ;;  %v6013_v49 = vmul.f32 0.015625, %v1442_v45 }
 0x21b   : > { %v1877_v38 = vadd.f32 1e-05, %v1809_v8  ;;  %v1776_v42 = vsub.f32 %v1708_v63, %v1742_v58  ;;  %v1743_v15 = vmul.f32 %v6013_v49, %v6013_v49 }
 0x21c   : > { %v1445_v59 = vpop.xlane.xlu1 %1444  ;;  %v1613_v37 = vpop.xlane.xlu0 %1612 }
 0x21d   : > { %4930 = vrsqrt.f32 %v1877_v38  ;;  %v1810_v18 = vmax.f32 %v1776_v42, 0.0  ;;  %v6017_v32 = vmul.f32 0.015625, %v1445_v59  ;;  %v1709_v46 = vmul.f32 0.015625, %v1613_v37 }
 0x21f   : > { %v1878_v57 = vadd.f32 1e-05, %v1810_v18  ;;  %v1777_v41 = vsub.f32 %v1709_v46, %v1743_v15  ;;  %v1744_v53 = vmul.f32 %v6017_v32, %v6017_v32 }
 0x220   : > { %v1616_v50 = vpop.xlane.xlu1 %1615  ;;  %v1448_v45 = vpop.xlane.xlu0 %1447 }
 0x221   : > { %4932 = vrsqrt.f32 %v1878_v57  ;;  %v1811_v8 = vmax.f32 %v1777_v41, 0.0  ;;  %v1710_v58 = vmul.f32 0.015625, %v1616_v50  ;;  %v6021_v63 = vmul.f32 0.015625, %v1448_v45  ;;  %v4839_v45 = vld [vmem:[%s7686_s8 + $0x38] sm:$0xff]  }
 0x222   : > { %v1843_v57 = vsub.f32 %v5744_v55, %v1537_v23 }
 0x223   : > { %v1879_v28 = vadd.f32 1e-05, %v1811_v8  ;;  %v1778_v34 = vsub.f32 %v1710_v58, %v1744_v53  ;;  %v1745_v38 = vmul.f32 %v6021_v63, %v6021_v63  ;;  %v4838_v53 = vld [vmem:[%s7686_s8 + $0x78] sm:$0xff]  }
 0x224   : > { %v1451_v42 = vpop.xlane.xlu1 %1450  ;;  %v1619_v59 = vpop.xlane.xlu0 %1618  ;;  %4487 = vmatprep.subr.bf16.mxu1 %v4838_v53  ;;  %v6052_v53 = vld [vmem:[%s7685_s7] ss:$0 sm:$0xff] }
 0x225   : > { %4934 = vrsqrt.f32 %v1879_v28  ;;  %v1812_v37 = vmax.f32 %v1778_v34, 0.0  ;;  %v6025_v15 = vmul.f32 0.015625, %v1451_v42  ;;  %v1711_v18 = vmul.f32 0.015625, %v1619_v59  ;;  %v6041_v59 = vld [vmem:[%s7684_s6] ss:$0 sm:$0xff]  ;;  %4488 = vmatpush3.bf16.msra.mxu1 %v4839_v45 }
 0x227   : > { %v1880_v46 = vadd.f32 1e-05, %v1812_v37  ;;  %v1779_v27 = vsub.f32 %v1711_v18, %v1745_v38  ;;  %v1746_v28 = vmul.f32 %v6025_v15, %v6025_v15 }
 0x228   : > { %v1622_v41 = vpop.xlane.xlu1 %1621  ;;  %v1454_v50 = vpop.xlane.xlu0 %1453 }
 0x229   : > { %4936 = vrsqrt.f32 %v1880_v46  ;;  %v1813_v34 = vmax.f32 %v1779_v27, 0.0  ;;  %v1712_v8 = vmul.f32 0.015625, %v1622_v41  ;;  %v6036_v38 = vmul.f32 0.015625, %v1454_v50 }
 0x22a   : > { %v4931_v58 = vpop.eup %4930  ;;  %v1844_v27 = vsub.f32 %v5751_v1, %v6009_v29  ;;  %v4841_v1 = vld [vmem:[%s7686_s8 + $0x30] sm:$0xff]  }
 0x22b   : > { %v1945_v55 = vmul.f32 %v4931_v58, %v1843_v57  ;;  %v1881_v23 = vadd.f32 1e-05, %v1813_v34  ;;  %v1780_v42 = vsub.f32 %v1712_v8, %v1746_v28  ;;  %v1747_v37 = vmul.f32 %v6036_v38, %v6036_v38  ;;  %v4840_v34 = vld [vmem:[%s7686_s8 + $0x70] sm:$0xff]  }
 0x22c   : > { %v1457_v18 = vpop.xlane.xlu1 %1456  ;;  %v1625_v46 = vpop.xlane.xlu0 %1624  ;;  %4489 = vmatprep.subr.bf16.mxu1 %v4840_v34 }
 0x22d   : > { %v1814_v41 = vmax.f32 %v1780_v42, 0.0  ;;  %v6047_v50 = vmul.f32 0.015625, %v1457_v18  ;;  %v1713_v57 = vmul.f32 0.015625, %v1625_v46  ;;  %4938 = vrsqrt.f32 %v1881_v23  ;;  %4490 = vmatpush3.bf16.msra.mxu1 %v4841_v1 }
 0x22e   : > { %v4933_v28 = vpop.eup %4932  ;;  %v1985_v45 = vmul.f32 %v6041_v59, %v1945_v55  ;;  %v1845_v55 = vsub.f32 %v5759_v44, %v6013_v49 }
 0x22f   : > { %v1946_v29 = vmul.f32 %v4933_v28, %v1844_v27  ;;  %v1882_v8 = vadd.f32 1e-05, %v1814_v41  ;;  %v1748_v58 = vmul.f32 %v6047_v50, %v6047_v50  ;;  %v1781_v42 = vsub.f32 %v1713_v57, %v1747_v37 }
 0x230   : > { %v1628_v18 = vpop.xlane.xlu1 %1627  ;;  %v1460_v46 = vpop.xlane.xlu0 %1459  ;;  %v2025_v23 = vadd.f32 %v6052_v53, %v1985_v45 }
 0x231   : > { %v1714_v33 = vmul.f32 0.015625, %v1628_v18  ;;  %v6066_v16 = vmul.f32 0.015625, %v1460_v46  ;;  %v1986_v22 = vmul.f32 %v6041_v59, %v1946_v29  ;;  %4940 = vrsqrt.f32 %v1882_v8 }
 0x232   : > { %v4935_v27 = vpop.eup %4934  ;;  %v1815_v41 = vmax.f32 %v1781_v42, 0.0  ;;  %v2059_v14 = vmax.f32 %v2025_v23, 0.0  ;;  %v1604_v42 = vmul.f32 %v6005_v6, %v6005_v6  ;;  %v4843_v23 = vld [vmem:[%s7686_s8 + $0x28] sm:$0xff]  }
 0x233   : > { %v1782_v28 = vsub.f32 %v1714_v33, %v1748_v58  ;;  %v1749_v37 = vmul.f32 %v6066_v16, %v6066_v16  ;;  %v1947_v57 = vmul.f32 %v4935_v27, %v1845_v55  ;;  %v2026_v49 = vadd.f32 %v6052_v53, %v1986_v22  ;;  %v4842_v22 = vld [vmem:[%s7686_s8 + $0x68] sm:$0xff]  }
 0x234   : > { %v1463_v45 = vpop.xlane.xlu1 %1462  ;;  %v1631_v34 = vpop.xlane.xlu0 %1630  ;;  %v1846_v33 = vsub.f32 %v5767_v39, %v6017_v32  ;;  %v1603_v58 = vmul.f32 %v6000_v51, %v6000_v51  ;;  %v1883_v55 = vadd.f32 1e-05, %v1815_v41  ;;  %v2097_v32 = vmul.f32 0.0, %v2059_v14  ;;  %4491 = vmatprep.subr.bf16.mxu1 %v4842_v22 }
 0x235   : > { %v1816_v44 = vmax.f32 %v1782_v28, 0.0  ;;  %v6072_v18 = vmul.f32 0.015625, %v1463_v45  ;;  %v1715_v46 = vmul.f32 0.015625, %v1631_v34  ;;  %v1987_v1 = vmul.f32 %v6041_v59, %v1947_v57  ;;  %4492 = vmatpush3.bf16.msra.mxu1 %v4843_v23 }
 0x236   : > { %v4937_v29 = vpop.eup %4936  ;;  %v2060_v8 = vmax.f32 %v2026_v49, 0.0  ;;  %v6097_v14 = vsel %vm1433_vm1, %v1604_v42, 0.0  ;;  %4942 = vrsqrt.f32 %v1883_v55 }
 0x237   : > { %v1750_v27 = vmul.f32 %v6072_v18, %v6072_v18  ;;  %v1783_v39 = vsub.f32 %v1715_v46, %v1749_v37  ;;  %v1884_v28 = vadd.f32 1e-05, %v1816_v44  ;;  %v1948_v34 = vmul.f32 %v4937_v29, %v1846_v33  ;;  %v4844_v44 = vld [vmem:[%s7686_s8 + $0x60] sm:$0xff]  }
 0x238   : > { %v1634_v57 = vpop.xlane.xlu1 %1633  ;;  %v1466_v45 = vpop.xlane.xlu0 %1465  ;;  %v2027_v49 = vadd.f32 %v6052_v53, %v1987_v1  ;;  %v2098_v21 = vmul.f32 0.0, %v2060_v8  ;;  %v6094_v37 = vsel %vm1433_vm1, %v1603_v58, 0.0  ;;  %v4845_v46 = vld [vmem:[%s7686_s8 + $0x20] sm:$0xff]   ;;  %v4846_v1 = vld [vmem:[%s7686_s8 + $0x58] sm:$0xff]   ;;  %4493 = vmatprep.subr.bf16.mxu1 %v4844_v44 }
 0x239   : > { %v1817_v5 = vmax.f32 %v1783_v39, 0.0  ;;  %v1716_v9 = vmul.f32 0.015625, %v1634_v57  ;;  %v6090_v4 = vmul.f32 0.015625, %v1466_v45  ;;  %v1988_v41 = vmul.f32 %v6041_v59, %v1948_v34  ;;  %4494 = vmatpush3.bf16.msra.mxu1 %v4845_v46 }
 0x23a   : > { %v2099_v51 = vpack.c.bf16 %v2098_v21, %v2097_v32  ;;  %v4939_v29 = vpop.eup %4938  ;;  %v1847_v21 = vsub.f32 %v5775_v56, %v6021_v63  ;;  %4944 = vrsqrt.f32 %v1884_v28  ;;  %v2061_v23 = vmax.f32 %v2027_v49, 0.0  ;;  %v4847_v56 = vld [vmem:[%s7686_s8 + $0x18] sm:$0xff]   ;;  %4495 = vmatprep.subr.bf16.mxu1 %v4846_v1 }
 0x23b   : > { %v1784_v33 = vsub.f32 %v1716_v9, %v1750_v27  ;;  %v1751_v8 = vmul.f32 %v6090_v4, %v6090_v4  ;;  %v2028_v22 = vadd.f32 %v6052_v53, %v1988_v41  ;;  %v1885_v32 = vadd.f32 1e-05, %v1817_v5  ;;  %v4848_v5 = vld [vmem:[%s7686_s8 + $0x50] sm:$0xff]  }
 0x23c   : > { %v1469_v58 = vpop.xlane.xlu1 %1468  ;;  %v1637_v42 = vpop.xlane.xlu0 %1636  ;;  %v2117_v39 = vshrl.u32 %v2099_v51, 16  ;;  %v2120_v27 = vshll.u32 %v2099_v51, 16  ;;  %v1949_v28 = vmul.f32 %v4939_v29, %v1847_v21  ;;  %v1848_v41 = vsub.f32 %v5783_v3, %v6025_v15 }
 0x23d   : > { %v1818_v57 = vmax.f32 %v1784_v33, 0.0  ;;  %v6113_v45 = vmul.f32 0.015625, %v1469_v58  ;;  %v1717_v34 = vmul.f32 0.015625, %v1637_v42  ;;  %v2062_v63 = vmax.f32 %v2028_v22, 0.0  ;;  %4496 = vmatpush3.bf16.msra.mxu1 %v4847_v56 }
 0x23e   : > { %v2119_v55 = vrot.slane %v2117_v39, 7  ;;  %v4941_v49 = vpop.eup %4940  ;;  %4946 = vrsqrt.f32 %v1885_v32  ;;  %4497 = vmatprep.subr.bf16.mxu1 %v4848_v5 }
 0x23f   : > { %v1752_v46 = vmul.f32 %v6113_v45, %v6113_v45  ;;  %v1785_v33 = vsub.f32 %v1717_v34, %v1751_v8  ;;  %v1886_v58 = vadd.f32 1e-05, %v1818_v57  ;;  %v2100_v1 = vpack.c.bf16 %v2062_v63, %v2061_v23  ;;  %v4849_v8 = vld [vmem:[%s7686_s8 + $0x10] sm:$0xff]   ;;  %v4850_v63 = vld [vmem:[%s7686_s8 + $0x48] sm:$0xff]  }
 0x240   : > { %v1640_v51 = vpop.xlane.xlu1 %1639  ;;  %v1472_v29 = vpop.xlane.xlu0 %1471  ;;  %v2122_v21 = vor.u32 %v2120_v27, %v2119_v55  ;;  %v6135_v42 = vsel %vm6117_vm4, %v2119_v55, 0  ;;  %v1989_v34 = vmul.f32 %v6041_v59, %v1949_v28 }
 0x241   : > { %7772 = vst [vmem:[#allocation36_spill] sm:$0xff] %v6135_v42  ;;  %v1819_v15 = vmax.f32 %v1785_v33, 0.0  ;;  %v1718_v22 = vmul.f32 0.015625, %v1640_v51  ;;  %v6139_v39 = vmul.f32 0.015625, %v1472_v29  ;;  %v2124_v57 = vshrl.u32 %v2100_v1, 16  ;;  %4498 = vmatpush3.bf16.msra.mxu1 %v4849_v8 }
 0x242   : > { %v6146_v23 = vsel %vm6117_vm4, 0, %v2122_v21  ;;  %v2315_v27 = vshll.u32 %v6135_v42, 16  ;;  %v1950_v33 = vmul.f32 %v4941_v49, %v1848_v41  ;;  %4948 = vrsqrt.f32 %v1886_v58  ;;  %4499 = vmatprep.subr.bf16.mxu1 %v4850_v63 }
 0x243   : > { %7773 = vst [vmem:[#allocation37_spill] sm:$0xff] %v6146_v23  ;;  %v1786_v55 = vsub.f32 %v1718_v22, %v1752_v46  ;;  %v1753_v56 = vmul.f32 %v6139_v39, %v6139_v39  ;;  %v2126_v29 = vrot.slane %v2124_v57, 7  ;;  %v2127_v21 = vshll.u32 %v2100_v1, 16  ;;  %v4851_v46 = vld [vmem:[%s7686_s8 + $0x8] sm:$0xff]   ;;  %v4852_v1 = vld [vmem:[%s7686_s8 + $0x40] sm:$0xff]  }
 0x244   : > { %v1475_v32 = vpop.xlane.xlu1 %1474  ;;  %v1643_v51 = vpop.xlane.xlu0 %1642  ;;  %v2310_v3 = vshll.u32 %v6146_v23, 16  ;;  %v1887_v28 = vadd.f32 1e-05, %v1819_v15  ;;  %v2308_v49 = vshrl.u32 %v6146_v23, 16  ;;  %v1990_v42 = vmul.f32 %v6041_v59, %v1950_v33 }
 0x245   : > { %v1820_v5 = vmax.f32 %v1786_v55, 0.0  ;;  %v6156_v44 = vmul.f32 0.015625, %v1475_v32  ;;  %v1719_v6 = vmul.f32 0.015625, %v1643_v51  ;;  %v2129_v22 = vor.u32 %v2127_v21, %v2126_v29  ;;  %v4943_v32 = vpop.eup %4942  ;;  %4500 = vmatpush3.bf16.msra.mxu1 %v4851_v46 }
 0x246   : > { %v2312_v41 = vrot.slane %v2310_v3, 1  ;;  %v6164_v58 = vsel %vm6117_vm4, %v2126_v29, 0  ;;  %v2317_v55 = vrot.slane %v2315_v27, 1  ;;  %4950 = vrsqrt.f32 %v1887_v28  ;;  %4501 = vmatprep.subr.bf16.mxu1 %v4852_v1 }
 0x247   : > { %7774 = vst [vmem:[#allocation38_spill] sm:$0xff] %v6164_v58  ;;  %v1888_v15 = vadd.f32 1e-05, %v1820_v5  ;;  %v1754_v8 = vmul.f32 %v6156_v44, %v6156_v44  ;;  %v1787_v57 = vsub.f32 %v1719_v6, %v1753_v56  ;;  %v6173_v3 = vsel %vm6117_vm4, 0, %v2129_v22  ;;  %v4945_v23 = vpop.eup %4944  ;;  %v4853_v56 = vld [vmem:[%s7686_s8] sm:$0xff]  }
 0x248   : > { %v1646_v51 = vpop.xlane.xlu1 %1645  ;;  %7775 = vst [vmem:[#allocation39_spill] sm:$0xff] %v6173_v3  ;;  %v1478_v21 = vpop.xlane.xlu0 %1477  ;;  %v2313_v29 = vor.u32 %v2312_v41, %v2308_v49  ;;  %v2327_v63 = vshll.u32 %v6164_v58, 16  ;;  %2613 = vrot.lane.b32.xlu0 %v6173_v3, %s5097_s19  ;;  %v2029_v6 = vadd.f32 %v6052_v53, %v1989_v34  ;;  %v1851_v27 = vsub.f32 %v5807_v2, %v6066_v16 }
 0x249   : > { %v1821_v5 = vmax.f32 %v1787_v57, 0.0  ;;  %v1720_v54 = vmul.f32 0.015625, %v1646_v51  ;;  %v6185_v22 = vmul.f32 0.015625, %v1478_v21  ;;  %v2322_v28 = vshll.u32 %v6173_v3, 16  ;;  %4502 = vmatpush3.bf16.msra.mxu1 %v4853_v56 }
 0x24a   : > { %v2318_v33 = vsel %vm2306_vm5, %v2313_v29, %v2317_v55  ;;  %4952 = vrsqrt.f32 %v1888_v15  ;;  %v2320_v34 = vshrl.u32 %v6173_v3, 16  ;;  %v2329_v2 = vrot.slane %v2327_v63, 1 }
 0x24b   : > { %v1889_v49 = vadd.f32 1e-05, %v1821_v5  ;;  %v1788_v41 = vsub.f32 %v1720_v54, %v1754_v8  ;;  %2499 = vrot.lane.b32.xlu1 %v2318_v33, %s5097_s19  ;;  %v1755_v46 = vmul.f32 %v6185_v22, %v6185_v22  ;;  %v2324_v16 = vrot.slane %v2322_v28, 1  ;;  %v4947_v28 = vpop.eup %4946 }
 0x24c   : > { %v1481_v57 = vpop.xlane.xlu1 %1480  ;;  %v1649_v51 = vpop.xlane.xlu0 %1648  ;;  %v2030_v21 = vadd.f32 %v6052_v53, %v1990_v42  ;;  %v2063_v15 = vmax.f32 %v2029_v6, 0.0  ;;  %v7776_v5 = vsub.f32 %v5791_v13, %v6036_v38  ;;  %v7777_v58 = vsub.f32 %v5799_v25, %v6047_v50 }
 0x24d   : > { %v1822_v55 = vmax.f32 %v1788_v41, 0.0  ;;  %v6194_v29 = vmul.f32 0.015625, %v1481_v57  ;;  %v1721_v1 = vmul.f32 0.015625, %v1649_v51  ;;  %v2325_v54 = vor.u32 %v2324_v16, %v2320_v34 }
 0x24e   : > { %v2064_v8 = vmax.f32 %v2030_v21, 0.0  ;;  %v1951_v33 = vmul.f32 %v4943_v32, %v7776_v5  ;;  %v1952_v3 = vmul.f32 %v4945_v23, %v7777_v58  ;;  %v1852_v42 = vsub.f32 %v5815_v17, %v6072_v18 }
 0x24f   : > { %v1853_v63 = vsub.f32 %v5823_v12, %v6090_v4  ;;  %4954 = vrsqrt.f32 %v1889_v49  ;;  %v1756_v6 = vmul.f32 %v6194_v29, %v6194_v29  ;;  %v1789_v56 = vsub.f32 %v1721_v1, %v1755_v46  ;;  %v4949_v50 = vpop.eup %4948 }
 0x250   : > { %v6209_v41 = vsel %vm2306_vm5, %v2325_v54, %v2329_v2  ;;  %v1652_v13 = vpop.xlane.xlu1 %1651  ;;  %v2101_v38 = vpack.c.bf16 %v2064_v8, %v2063_v15  ;;  %v1484_v32 = vpop.xlane.xlu0 %1483  ;;  %v1991_v25 = vmul.f32 %v6041_v59, %v1951_v33  ;;  %v1854_v17 = vsub.f32 %v5831_v30, %v6113_v45 }
 0x251   : > { %7778 = vst [vmem:[#allocation40_spill] sm:$0xff] %v6209_v41  ;;  %v1890_v18 = vadd.f32 1e-05, %v1822_v55  ;;  %2501 = vrot.lane.b32.xlu1 %v6209_v41, %s5097_s19  ;;  %v1722_v4 = vmul.f32 0.015625, %v1652_v13  ;;  %v1992_v12 = vmul.f32 %v6041_v59, %v1952_v3  ;;  %v1855_v23 = vsub.f32 %v5839_v40, %v6139_v39 }
 0x252   : > { %v2131_v58 = vshrl.u32 %v2101_v38, 16  ;;  %v6219_v49 = vmul.f32 0.015625, %v1484_v32  ;;  %v2031_v34 = vadd.f32 %v6052_v53, %v1991_v25  ;;  %v1953_v46 = vmul.f32 %v4947_v28, %v1851_v27 }
 0x253   : > { %v1823_v30 = vmax.f32 %v1789_v56, 0.0  ;;  %v1790_v45 = vsub.f32 %v1722_v4, %v1756_v6  ;;  %v2134_v16 = vshll.u32 %v2101_v38, 16  ;;  %v2032_v55 = vadd.f32 %v6052_v53, %v1992_v12  ;;  %v4951_v54 = vpop.eup %4950 }
 0x254   : > { %v2133_v51 = vrot.slane %v2131_v58, 7  ;;  %v1757_v2 = vmul.f32 %v6219_v49, %v6219_v49  ;;  %v1487_v3 = vpop.xlane.xlu1 %1486  ;;  %v1655_v21 = vpop.xlane.xlu0 %1654  ;;  %4956 = vrsqrt.f32 %v1890_v18  ;;  %v2065_v33 = vmax.f32 %v2031_v34, 0.0 }
 0x255   : > { %v6229_v15 = vmul.f32 0.015625, %v1487_v3  ;;  %v1723_v27 = vmul.f32 0.015625, %v1655_v21  ;;  %v1824_v8 = vmax.f32 %v1790_v45, 0.0  ;;  %v2066_v28 = vmax.f32 %v2032_v55, 0.0 }
 0x256   : > { %v2136_v5 = vor.u32 %v2134_v16, %v2133_v51  ;;  %v1954_v6 = vmul.f32 %v4949_v50, %v1852_v42  ;;  %v1891_v56 = vadd.f32 1e-05, %v1823_v30  ;;  %v6235_v38 = vsel %vm6117_vm4, %v2133_v51, 0 }
 0x257   : > { %v1758_v13 = vmul.f32 %v6229_v15, %v6229_v15  ;;  %7779 = vst [vmem:[#allocation41_spill] sm:$0xff] %v6235_v38  ;;  %v4953_v32 = vpop.eup %4952  ;;  %v1791_v4 = vsub.f32 %v1723_v27, %v1757_v2  ;;  %v2102_v42 = vpack.c.bf16 %v2066_v28, %v2065_v33  ;;  %v1955_v50 = vmul.f32 %v4951_v54, %v1853_v63 }
 0x258   : > { %v6241_v18 = vsel %vm6117_vm4, 0, %v2136_v5  ;;  %v1658_v12 = vpop.xlane.xlu1 %1657  ;;  %v1490_v58 = vpop.xlane.xlu0 %1489  ;;  %v1993_v45 = vmul.f32 %v6041_v59, %v1953_v46  ;;  %v1892_v51 = vadd.f32 1e-05, %v1824_v8  ;;  %v2339_v21 = vshll.u32 %v6235_v38, 16 }
 0x259   : > { %2615 = vrot.lane.b32.xlu0 %v6241_v18, %s5097_s19  ;;  %v1724_v30 = vmul.f32 0.015625, %v1658_v12  ;;  %v1825_v16 = vmax.f32 %v1791_v4, 0.0  ;;  %v6248_v3 = vmul.f32 0.015625, %v1490_v58  ;;  %4958 = vrsqrt.f32 %v1891_v56 }
 0x25a   : > { %v2334_v55 = vshll.u32 %v6241_v18, 16  ;;  %v2138_v63 = vshrl.u32 %v2102_v42, 16  ;;  %v1956_v54 = vmul.f32 %v4953_v32, %v1854_v17  ;;  %v1994_v56 = vmul.f32 %v6041_v59, %v1954_v6 }
 0x25b   : > { %v1792_v2 = vsub.f32 %v1724_v30, %v1758_v13  ;;  %v1893_v33 = vadd.f32 1e-05, %v1825_v16  ;;  %v1759_v46 = vmul.f32 %v6248_v3, %v6248_v3  ;;  %4960 = vrsqrt.f32 %v1892_v51 }
 0x25c   : > { %v4955_v27 = vpop.eup %4954  ;;  %v1493_v8 = vpop.xlane.xlu1 %1492  ;;  %v2332_v13 = vshrl.u32 %v6241_v18, 16  ;;  %v2341_v30 = vrot.slane %v2339_v21, 1  ;;  %v2033_v17 = vadd.f32 %v6052_v53, %v1993_v45  ;;  %v2336_v5 = vrot.slane %v2334_v55, 1 }
 0x25d   : > { %v1661_v28 = vpop.xlane.xlu0 %1660  ;;  %v1826_v4 = vmax.f32 %v1792_v2, 0.0  ;;  %v6256_v12 = vmul.f32 0.015625, %v1493_v8  ;;  %v2140_v34 = vrot.slane %v2138_v63, 7  ;;  %v6266_v2 = vmul.f32 %v4955_v27, %v1855_v23 }
 0x25e   : > { %v1725_v58 = vmul.f32 0.015625, %v1661_v28  ;;  %v2141_v51 = vshll.u32 %v2102_v42, 16  ;;  %v2034_v25 = vadd.f32 %v6052_v53, %v1994_v56  ;;  %4962 = vrsqrt.f32 %v1893_v33 }
 0x25f   : > { %v1894_v32 = vadd.f32 1e-05, %v1826_v4  ;;  %v1760_v16 = vmul.f32 %v6256_v12, %v6256_v12  ;;  %v2067_v4 = vmax.f32 %v2033_v17, 0.0  ;;  %v1995_v63 = vmul.f32 %v6041_v59, %v1955_v50 }
 0x260   : > { %v1793_v8 = vsub.f32 %v1725_v58, %v1759_v46  ;;  %v1664_v28 = vpop.xlane.xlu1 %1663  ;;  %v2068_v55 = vmax.f32 %v2034_v25, 0.0  ;;  %v1996_v40 = vmul.f32 %v6041_v59, %v1956_v54  ;;  %v2337_v23 = vor.u32 %v2336_v5, %v2332_v13 }
 0x261   : > { %v1496_v6 = vpop.xlane.xlu0 %1495  ;;  %v1726_v21 = vmul.f32 0.015625, %v1664_v28  ;;  %v4957_v1 = vpop.eup %4956  ;;  %4964 = vrsqrt.f32 %v1894_v32  ;;  %v2143_v27 = vor.u32 %v2141_v51, %v2140_v34  ;;  %v2035_v17 = vadd.f32 %v6052_v53, %v1995_v63 }
 0x262   : > { %v6269_v45 = vmul.f32 0.015625, %v1496_v6  ;;  %v1827_v57 = vmax.f32 %v1793_v8, 0.0  ;;  %v2103_v56 = vpack.c.bf16 %v2068_v55, %v2067_v4  ;;  %v2036_v50 = vadd.f32 %v6052_v53, %v1996_v40 }
 0x263   : > { %v1794_v39 = vsub.f32 %v1726_v21, %v1760_v16  ;;  %v7780_v54 = vsub.f32 %v5847_v48, %v6156_v44  ;;  %v2069_v44 = vmax.f32 %v2035_v17, 0.0  ;;  %v7781_v17 = vsub.f32 %v5855_v19, %v6185_v22 }
 0x264   : > { %v1895_v46 = vadd.f32 1e-05, %v1827_v57  ;;  %v1761_v42 = vmul.f32 %v6269_v45, %v6269_v45  ;;  %v1499_v33 = vpop.xlane.xlu1 %1498  ;;  %v2145_v32 = vshrl.u32 %v2103_v56, 16  ;;  %v2148_v51 = vshll.u32 %v2103_v56, 16 }
 0x265   : > { %v1667_v58 = vpop.xlane.xlu0 %1666  ;;  %v1828_v28 = vmax.f32 %v1794_v39, 0.0  ;;  %v6276_v8 = vmul.f32 0.015625, %v1499_v33  ;;  %v6282_v5 = vmul.f32 %v4957_v1, %v7780_v54  ;;  %v2070_v1 = vmax.f32 %v2036_v50, 0.0 }
 0x266   : > { %v1727_v25 = vmul.f32 0.015625, %v1667_v58  ;;  %4966 = vrsqrt.f32 %v1895_v46  ;;  %v4959_v21 = vpop.eup %4958  ;;  %v2147_v48 = vrot.slane %v2145_v32, 7  ;;  %v6293_v33 = vsel %vm2306_vm5, %v2337_v23, %v2341_v30 }
 0x267   : > { %v1896_v16 = vadd.f32 1e-05, %v1828_v28  ;;  %v1762_v6 = vmul.f32 %v6276_v8, %v6276_v8  ;;  %v6297_v46 = vsel %vm6117_vm4, 0, %v2143_v27  ;;  %v2104_v28 = vpack.c.bf16 %v2070_v1, %v2069_v44 }
 0x268   : > { %v1795_v4 = vsub.f32 %v1727_v25, %v1761_v42  ;;  %v1670_v55 = vpop.xlane.xlu1 %1669  ;;  %v2150_v42 = vor.u32 %v2148_v51, %v2147_v48  ;;  %v4961_v25 = vpop.eup %4960  ;;  %v6304_v50 = vmul.f32 %v4959_v21, %v7781_v17  ;;  %v6308_v30 = vsel %vm6117_vm4, %v2140_v34, 0 }
 0x269   : > { %v1502_v63 = vpop.xlane.xlu0 %1501  ;;  %v1728_v39 = vmul.f32 0.015625, %v1670_v55  ;;  %4968 = vrsqrt.f32 %v1896_v16  ;;  %v6318_v19 = vsel %vm6117_vm4, %v2147_v48, 0  ;;  %v2152_v22 = vshrl.u32 %v2104_v28, 16 }
 0x26a   : > { %v1829_v58 = vmax.f32 %v1795_v4, 0.0  ;;  %v6299_v56 = vmul.f32 0.015625, %v1502_v63  ;;  %v6314_v51 = vsel %vm6117_vm4, 0, %v2150_v42  ;;  %7782 = vst [vmem:[#allocation42_spill] sm:$0xff] %v6318_v19  ;;  %v7783_v55 = vsub.f32 %v5863_v47, %v6194_v29 }
 0x26b   : > { %v1796_v54 = vsub.f32 %v1728_v39, %v1762_v6  ;;  %v4963_v4 = vpop.eup %4962  ;;  %v2358_v1 = vshll.u32 %v6314_v51, 16  ;;  %v2154_v39 = vrot.slane %v2152_v22, 7  ;;  %v2344_v42 = vshrl.u32 %v6297_v46, 16 }
 0x26c   : > { %v1763_v23 = vmul.f32 %v6299_v56, %v6299_v56  ;;  %v1505_v27 = vpop.xlane.xlu1 %1504  ;;  %v1897_v16 = vadd.f32 1e-05, %v1829_v58  ;;  %v6325_v63 = vmul.f32 %v4961_v25, %v7783_v55  ;;  %v2363_v58 = vshll.u32 %v6318_v19, 16 }
 0x26d   : > { %v1673_v32 = vpop.xlane.xlu0 %1672  ;;  %v1830_v6 = vmax.f32 %v1796_v54, 0.0  ;;  %v6320_v21 = vmul.f32 0.015625, %v1505_v27  ;;  %v2346_v17 = vshll.u32 %v6297_v46, 16  ;;  %v6337_v55 = vsel %vm6117_vm4, %v2154_v39, 0 }
 0x26e   : > { %v1729_v34 = vmul.f32 0.015625, %v1673_v32  ;;  %v4965_v54 = vpop.eup %4964  ;;  %v2155_v32 = vshll.u32 %v2104_v28, 16  ;;  %4970 = vrsqrt.f32 %v1897_v16  ;;  %v1865_v22 = vsub.f32 %v5919_v60, %v6299_v56 }
 0x26f   : > { %v1764_v48 = vmul.f32 %v6320_v21, %v6320_v21  ;;  %v1898_v27 = vadd.f32 1e-05, %v1830_v6  ;;  %v2360_v40 = vrot.slane %v2358_v1, 1  ;;  %v7784_v13 = vsub.f32 %v5871_v0, %v6219_v49 }
 0x270   : > { %v1797_v47 = vsub.f32 %v1729_v34, %v1763_v23  ;;  %v1676_v29 = vpop.xlane.xlu1 %1675  ;;  %v2356_v23 = vshrl.u32 %v6314_v51, 16  ;;  %v2157_v28 = vor.u32 %v2155_v32, %v2154_v39  ;;  %v2365_v19 = vrot.slane %v2363_v58, 1 }
 0x271   : > { %v1508_v25 = vpop.xlane.xlu0 %1507  ;;  %v1730_v44 = vmul.f32 0.015625, %v1676_v29  ;;  %v6344_v57 = vmul.f32 %v4963_v4, %v7784_v13  ;;  %v2375_v16 = vshll.u32 %v6337_v55, 16  ;;  %v7785_v29 = vsub.f32 %v5879_v20, %v6229_v15 }
 0x272   : > { %v6346_v6 = vmul.f32 0.015625, %v1508_v25  ;;  %v1831_v34 = vmax.f32 %v1797_v47, 0.0  ;;  %4972 = vrsqrt.f32 %v1898_v27  ;;  %v6359_v4 = vsel %vm6117_vm4, 0, %v2157_v28 }
 0x273   : > { %v1798_v41 = vsub.f32 %v1730_v44, %v1764_v48  ;;  %v4967_v38 = vpop.eup %4966  ;;  %v6353_v1 = vmul.f32 %v4965_v54, %v7785_v29  ;;  %v2361_v58 = vor.u32 %v2360_v40, %v2356_v23  ;;  %v1866_v20 = vsub.f32 %v5927_v7, %v6320_v21 }
 0x274   : > { %v1765_v0 = vmul.f32 %v6346_v6, %v6346_v6  ;;  %v1511_v49 = vpop.xlane.xlu1 %1510  ;;  %v1867_v15 = vsub.f32 %v5935_v31, %v6346_v6  ;;  %v2370_v54 = vshll.u32 %v6359_v4, 16  ;;  %v2348_v27 = vrot.slane %v2346_v17, 1 }
 0x275   : > { %v1679_v13 = vpop.xlane.xlu0 %1678  ;;  %v1832_v44 = vmax.f32 %v1798_v41, 0.0  ;;  %1705 = vadd.xlane.f32.xlu1 %v6097_v14  ;;  %v6362_v39 = vmul.f32 0.015625, %v1511_v49  ;;  %v7786_v47 = vsub.f32 %v5887_v52, %v6248_v3  ;;  %v1899_v41 = vadd.f32 1e-05, %v1831_v34 }
 0x276   : > { %v1731_v48 = vmul.f32 0.015625, %v1679_v13  ;;  %v2377_v32 = vrot.slane %v2375_v16, 1  ;;  %v4969_v40 = vpop.eup %4968  ;;  %v2351_v13 = vshll.u32 %v6308_v30, 16  ;;  %v1997_v17 = vmul.f32 %v6041_v59, %v6266_v2 }
 0x277   : > { %v6372_v25 = vmul.f32 %v4967_v38, %v7786_v47  ;;  %v1766_v14 = vmul.f32 %v6362_v39, %v6362_v39  ;;  %v1900_v23 = vadd.f32 1e-05, %v1832_v44  ;;  %v6381_v38 = vsel %vm2306_vm5, %v2361_v58, %v2365_v19 }
 0x278   : > { %1702 = vadd.xlane.f32.xlu0 %v6094_v37  ;;  %v1799_v28 = vsub.f32 %v1731_v48, %v1765_v0  ;;  %v1682_v29 = vpop.xlane.xlu1 %1681  ;;  %v2372_v3 = vrot.slane %v2370_v54, 1  ;;  %v1998_v34 = vmul.f32 %v6041_v59, %v6282_v5  ;;  %v2368_v37 = vshrl.u32 %v6359_v4, 16 }
 0x279   : > { %v1514_v49 = vpop.xlane.xlu0 %1513  ;;  %v1732_v52 = vmul.f32 0.015625, %v1682_v29  ;;  %v2037_v0 = vadd.f32 %v6052_v53, %v1997_v17  ;;  %4974 = vrsqrt.f32 %v1899_v41  ;;  %v2349_v48 = vor.u32 %v2348_v27, %v2344_v42 }
 0x27a   : > { %v1833_v16 = vmax.f32 %v1799_v28, 0.0  ;;  %v6385_v47 = vmul.f32 0.015625, %v1514_v49  ;;  %v2038_v2 = vadd.f32 %v6052_v53, %v1998_v34  ;;  %v7787_v19 = vsub.f32 %v5895_v10, %v6256_v12 }
 0x27b   : > { %v1800_v44 = vsub.f32 %v1732_v52, %v1766_v14  ;;  %4976 = vrsqrt.f32 %v1900_v23  ;;  %v2353_v29 = vrot.slane %v2351_v13, 1  ;;  %v2373_v41 = vor.u32 %v2372_v3, %v2368_v37  ;;  %v4971_v42 = vpop.eup %4970 }
 0x27c   : > { %v6393_v58 = vmul.f32 %v4969_v40, %v7787_v19  ;;  %v1767_v5 = vmul.f32 %v6385_v47, %v6385_v47  ;;  %v1517_v54 = vpop.xlane.xlu1 %1516  ;;  %v2072_v14 = vmax.f32 %v2038_v2, 0.0  ;;  %v1901_v27 = vadd.f32 1e-05, %v1833_v16 }
 0x27d   : > { %v1685_v28 = vpop.xlane.xlu0 %1684  ;;  %v6397_v49 = vmul.f32 0.015625, %v1517_v54  ;;  %v2071_v52 = vmax.f32 %v2037_v0, 0.0  ;;  %v1999_v10 = vmul.f32 %v6041_v59, %v6304_v50  ;;  %v2000_v12 = vmul.f32 %v6041_v59, %v6325_v63 }
 0x27e   : > { %v1733_v17 = vmul.f32 0.015625, %v1685_v28  ;;  %v1868_v40 = vsub.f32 %v5943_v11, %v6362_v39  ;;  %v1834_v23 = vmax.f32 %v1800_v44, 0.0  ;;  %v6408_v34 = vsel %vm2306_vm5, %v2349_v48, %v2353_v29 }
 0x27f   : > { %v1768_v13 = vmul.f32 %v6397_v49, %v6397_v49  ;;  %v2105_v0 = vpack.c.bf16 %v2072_v14, %v2071_v52  ;;  %v2039_v2 = vadd.f32 %v6052_v53, %v1999_v10  ;;  %v2040_v50 = vadd.f32 %v6052_v53, %v2000_v12  ;;  %v4973_v19 = vpop.eup %4972 }
 0x280   : > { %v1801_v3 = vsub.f32 %v1733_v17, %v1767_v5  ;;  %v1688_v37 = vpop.xlane.xlu1 %1687  ;;  %v7788_v63 = vsub.f32 %v5903_v36, %v6269_v45  ;;  %v6420_v48 = vsel %vm2306_vm5, %v2373_v41, %v2377_v32  ;;  %4978 = vrsqrt.f32 %v1901_v27 }
 0x281   : > { %v1520_v16 = vpop.xlane.xlu0 %1519  ;;  %v1734_v28 = vmul.f32 0.015625, %v1688_v37  ;;  %v2159_v17 = vshrl.u32 %v2105_v0, 16  ;;  %v1902_v14 = vadd.f32 1e-05, %v1834_v23  ;;  %v2073_v10 = vmax.f32 %v2039_v2, 0.0 }
 0x282   : > { %v6415_v54 = vmul.f32 %v4971_v42, %v7788_v63  ;;  %v1835_v5 = vmax.f32 %v1801_v3, 0.0  ;;  %v6422_v29 = vmul.f32 0.015625, %v1520_v16  ;;  %v2074_v12 = vmax.f32 %v2040_v50, 0.0 }
 0x283   : > { %v1802_v52 = vsub.f32 %v1734_v28, %v1768_v13  ;;  %v2161_v63 = vrot.slane %v2159_v17, 7  ;;  %v2162_v44 = vshll.u32 %v2105_v0, 16  ;;  %v2001_v32 = vmul.f32 %v6041_v59, %v6344_v57 }
 0x284   : > { %v1769_v36 = vmul.f32 %v6422_v29, %v6422_v29  ;;  %v1523_v45 = vpop.xlane.xlu1 %1522  ;;  %v7789_v41 = vsub.f32 %v5911_v24, %v6276_v8  ;;  %v1903_v3 = vadd.f32 1e-05, %v1835_v5  ;;  %v2106_v13 = vpack.c.bf16 %v2074_v12, %v2073_v10 }
 0x285   : > { %v1691_v42 = vpop.xlane.xlu0 %1690  ;;  %v1836_v37 = vmax.f32 %v1802_v52, 0.0  ;;  %v6433_v16 = vmul.f32 0.015625, %v1523_v45  ;;  %v2164_v2 = vor.u32 %v2162_v44, %v2161_v63  ;;  %v2002_v0 = vmul.f32 %v6041_v59, %v6353_v1 }
 0x286   : > { %v6431_v27 = vmul.f32 %v4973_v19, %v7789_v41  ;;  %v1735_v23 = vmul.f32 0.015625, %v1691_v42  ;;  %2503 = vrot.lane.b32.xlu1 %v6293_v33, %s5097_s19  ;;  %4980 = vrsqrt.f32 %v1902_v14  ;;  %v1870_v57 = vsub.f32 %v5959_v62, %v6397_v49  ;;  %v4975_v50 = vpop.eup %4974 }
 0x287   : > { %v6445_v8 = vsel %vm6117_vm4, %v2161_v63, 0  ;;  %v1770_v19 = vmul.f32 %v6433_v16, %v6433_v16  ;;  %v6451_v1 = vsel %vm6117_vm4, 0, %v2164_v2  ;;  %v2166_v5 = vshrl.u32 %v2106_v13, 16 }
 0x288   : > { %v1803_v28 = vsub.f32 %v1735_v23, %v1769_v36  ;;  %v1694_v44 = vpop.xlane.xlu1 %1693  ;;  %v4977_v17 = vpop.eup %4976  ;;  %4982 = vrsqrt.f32 %v1903_v3  ;;  %v2382_v52 = vshll.u32 %v6451_v1, 16  ;;  %v2041_v10 = vadd.f32 %v6052_v53, %v2001_v32 }
 0x289   : > { %v1736_v14 = vmul.f32 0.015625, %v1694_v44  ;;  %v1904_v12 = vadd.f32 1e-05, %v1836_v37  ;;  %v2168_v42 = vrot.slane %v2166_v5, 7  ;;  %v2169_v36 = vshll.u32 %v2106_v13, 16 }
 0x28a   : > { %2507 = vrot.lane.b32.xlu1 %v6381_v38, %s5097_s19  ;;  %v1697_v45 = vpop.xlane.xlu0 %1696  ;;  %v2042_v63 = vadd.f32 %v6052_v53, %v2002_v0  ;;  %v1837_v41 = vmax.f32 %v1803_v28, 0.0  ;;  %v2380_v23 = vshrl.u32 %v6451_v1, 16  ;;  %v2384_v2 = vrot.slane %v2382_v52, 1 }
 0x28b   : > { %v2387_v3 = vshll.u32 %v6445_v8, 16  ;;  %v6463_v44 = vmul.f32 %v4975_v50, %v1865_v22  ;;  %v6468_v32 = vmul.f32 %v4977_v17, %v1866_v20  ;;  %v1804_v37 = vsub.f32 %v1736_v14, %v1770_v19 }
 0x28c   : > { %v1526_v13 = vpop.xlane.xlu1 %1525  ;;  %v2171_v5 = vor.u32 %v2169_v36, %v2168_v42  ;;  %v1737_v28 = vmul.f32 0.015625, %v1697_v45  ;;  %v2385_v24 = vor.u32 %v2384_v2, %v2380_v23  ;;  %v6474_v52 = vsel %vm6117_vm4, %v2168_v42, 0  ;;  %v6505_v23 = vld [vmem:[%s7684_s6] ss:$0 sm:$0xff] }
 0x28d   : > { %v6470_v0 = vmul.f32 0.015625, %v1526_v13  ;;  %4984 = vrsqrt.f32 %v1904_v12  ;;  %v2076_v60 = vmax.f32 %v2042_v63, 0.0  ;;  %v2003_v56 = vmul.f32 %v6041_v59, %v6372_v25  ;;  %v4979_v21 = vpop.eup %4978 }
 0x28e   : > { %2617 = vrot.lane.b32.xlu0 %v6297_v46, %s5097_s19  ;;  %2509 = vrot.lane.b32.xlu1 %v6420_v48, %s5097_s19  ;;  %v6482_v7 = vsel %vm6117_vm4, 0, %v2171_v5  ;;  %v1905_v22 = vadd.f32 1e-05, %v1837_v41  ;;  %v2389_v50 = vrot.slane %v2387_v3, 1  ;;  %v2075_v19 = vmax.f32 %v2041_v10, 0.0 }
 0x28f   : > { %v1771_v20 = vmul.f32 %v6470_v0, %v6470_v0  ;;  %v1872_v17 = vsub.f32 %v5975_v61, %v6433_v16  ;;  %v1838_v14 = vmax.f32 %v1804_v37, 0.0  ;;  %v2394_v45 = vshll.u32 %v6482_v7, 16 }
 0x290   : > { %v1529_v12 = vpop.xlane.xlu1 %1528  ;;  %v2399_v42 = vshll.u32 %v6474_v52, 16  ;;  %v6495_v59 = vsel %vm2306_vm5, %v2385_v24, %v2389_v50  ;;  %v2107_v25 = vpack.c.bf16 %v2076_v60, %v2075_v19  ;;  %v2392_v10 = vshrl.u32 %v6482_v7, 16  ;;  %v6517_v19 = vld [vmem:[%s7685_s7] ss:$0 sm:$0xff] }
 0x291   : > { %v1805_v36 = vsub.f32 %v1737_v28, %v1771_v20  ;;  %v6492_v63 = vmul.f32 0.015625, %v1529_v12  ;;  %v2396_v41 = vrot.slane %v2394_v45, 1  ;;  %v2004_v2 = vmul.f32 %v6505_v23, %v6393_v58 }
 0x292   : > { %2619 = vrot.lane.b32.xlu0 %v6314_v51, %s5097_s19  ;;  %2511 = vrot.lane.b32.xlu1 %v6495_v59, %s5097_s19  ;;  %v2043_v24 = vadd.f32 %v6052_v53, %v2003_v56  ;;  %4986 = vrsqrt.f32 %v1905_v22  ;;  %v2173_v37 = vshrl.u32 %v2107_v25, 16  ;;  %v2005_v13 = vmul.f32 %v6505_v23, %v6415_v54 }
 0x293   : > { %v1772_v3 = vmul.f32 %v6492_v63, %v6492_v63  ;;  %v4981_v5 = vpop.eup %4980  ;;  %v1906_v28 = vadd.f32 1e-05, %v1838_v14  ;;  %v2397_v20 = vor.u32 %v2396_v41, %v2392_v10  ;;  %v2401_v50 = vrot.slane %v2399_v42, 1 }
 0x294   : > { %v1700_v60 = vpop.xlane.xlu1 %1699  ;;  %v2044_v53 = vadd.f32 %v6517_v19, %v2004_v2  ;;  %v1839_v58 = vmax.f32 %v1805_v36, 0.0  ;;  %v2175_v22 = vrot.slane %v2173_v37, 7  ;;  %v2176_v12 = vshll.u32 %v2107_v25, 16 }
 0x295   : > { %v1738_v56 = vmul.f32 0.015625, %v1700_v60  ;;  %v4983_v45 = vpop.eup %4982  ;;  %v6523_v54 = vsel %vm2306_vm5, %v2397_v20, %v2401_v50  ;;  %v2077_v14 = vmax.f32 %v2043_v24, 0.0  ;;  %v2006_v10 = vmul.f32 %v6505_v23, %v6431_v27 }
 0x296   : > { %2505 = vrot.lane.b32.xlu0 %v6408_v34, %s5097_s19  ;;  %v2078_v42 = vmax.f32 %v2044_v53, 0.0  ;;  %v1969_v41 = vmul.f32 %v4979_v21, %v1867_v15  ;;  %2513 = vrot.lane.b32.xlu1 %v6523_v54, %s5097_s19  ;;  %v2178_v25 = vor.u32 %v2176_v12, %v2175_v22  ;;  %v2045_v2 = vadd.f32 %v6517_v19, %v2005_v13 }
 0x297   : > { %v1806_v36 = vsub.f32 %v1738_v56, %v1772_v3  ;;  %4988 = vrsqrt.f32 %v1906_v28  ;;  %v6535_v37 = vsel %vm6117_vm4, %v2175_v22, 0  ;;  %v2046_v60 = vadd.f32 %v6517_v19, %v2006_v10 }
 0x298   : > { %v2108_v24 = vpack.c.bf16 %v2078_v42, %v2077_v14  ;;  %v1907_v27 = vadd.f32 1e-05, %v1839_v58  ;;  %v6540_v31 = vsel %vm6117_vm4, 0, %v2178_v25  ;;  %v2411_v6 = vshll.u32 %v6535_v37, 16 }
 0x299   : > { %v1840_v20 = vmax.f32 %v1806_v36, 0.0  ;;  %v1970_v15 = vmul.f32 %v4981_v5, %v1868_v40  ;;  %v7790_v21 = vsub.f32 %v5951_v35, %v6385_v47  ;;  %v2406_v13 = vshll.u32 %v6540_v31, 16 }
 0x29a   : > { %2621 = vrot.lane.b32.xlu0 %v6359_v4, %s5097_s19  ;;  %v2180_v28 = vshrl.u32 %v2108_v24, 16  ;;  %v4985_v50 = vpop.eup %4984  ;;  %v2404_v58 = vshrl.u32 %v6540_v31, 16  ;;  %v2183_v56 = vshll.u32 %v2108_v24, 16  ;;  %v2079_v22 = vmax.f32 %v2045_v2, 0.0 }
 0x29b   : > { %v1971_v3 = vmul.f32 %v4983_v45, %v7790_v21  ;;  %v1908_v53 = vadd.f32 1e-05, %v1840_v20  ;;  %v2408_v12 = vrot.slane %v2406_v13, 1  ;;  %v2080_v11 = vmax.f32 %v2046_v60, 0.0 }
 0x29c   : > { %v2182_v14 = vrot.slane %v2180_v28, 7  ;;  %v2007_v39 = vmul.f32 %v6505_v23, %v6463_v44  ;;  %4990 = vrsqrt.f32 %v1907_v27  ;;  %v2413_v35 = vrot.slane %v2411_v6, 1 }
 0x29d   : > { %v2008_v47 = vmul.f32 %v6505_v23, %v6468_v32  ;;  %v2009_v40 = vmul.f32 %v6505_v23, %v1969_v41  ;;  %v2409_v5 = vor.u32 %v2408_v12, %v2404_v58  ;;  %v2109_v10 = vpack.c.bf16 %v2080_v11, %v2079_v22 }
 0x29e   : > { %2623 = vrot.lane.b32.xlu0 %v6451_v1, %s5097_s19  ;;  %v2185_v45 = vor.u32 %v2183_v56, %v2182_v14  ;;  %v6562_v42 = vsel %vm6117_vm4, %v2182_v14, 0  ;;  %v1972_v44 = vmul.f32 %v4985_v50, %v1870_v57  ;;  %4992 = vrsqrt.f32 %v1908_v53 }
 0x29f   : > { %v2423_v36 = vshll.u32 %v6562_v42, 16  ;;  %v2047_v32 = vadd.f32 %v6517_v19, %v2007_v39  ;;  %v4987_v41 = vpop.eup %4986  ;;  %v6570_v25 = vsel %vm2306_vm5, %v2409_v5, %v2413_v35  ;;  %v2187_v24 = vshrl.u32 %v2109_v10, 16 }
 0x2a0   : > { %v6574_v2 = vsel %vm6117_vm4, 0, %v2185_v45  ;;  %v2190_v60 = vshll.u32 %v2109_v10, 16  ;;  %2515 = vrot.lane.b32.xlu1 %v6570_v25, %s5097_s19  ;;  %v2048_v27 = vadd.f32 %v6517_v19, %v2008_v47  ;;  %v2010_v21 = vmul.f32 %v6505_v23, %v1970_v15 }
 0x2a1   : > { %v2416_v62 = vshrl.u32 %v6574_v2, 16  ;;  %v2418_v49 = vshll.u32 %v6574_v2, 16  ;;  %v2425_v57 = vrot.slane %v2423_v36, 1  ;;  %v2189_v20 = vrot.slane %v2187_v24, 7 }
 0x2a2   : > { %2625 = vrot.lane.b32.xlu0 %v6482_v7, %s5097_s19  ;;  %v2081_v6 = vmax.f32 %v2047_v32, 0.0  ;;  %v2049_v13 = vadd.f32 %v6517_v19, %v2009_v40  ;;  %v2082_v50 = vmax.f32 %v2048_v27, 0.0  ;;  %v2011_v53 = vmul.f32 %v6505_v23, %v1971_v3  ;;  %v6597_v3 = vld [vmem:[%s7686_s8 + $0x98] sm:$0xff]  }
 0x2a3   : > { %v2420_v28 = vrot.slane %v2418_v49, 1  ;;  %v2012_v58 = vmul.f32 %v6505_v23, %v1972_v44  ;;  %v2192_v56 = vor.u32 %v2190_v60, %v2189_v20  ;;  %v6589_v22 = vsel %vm6117_vm4, %v2189_v20, 0  ;;  %v7792_v32 = vld [vmem:[#allocation33_spill] sm:$0xff]  ;;  %4723 = vmatprep.subr.bf16.mxu1 %v6597_v3 }
 0x2a4   : > { %v2050_v12 = vadd.f32 %v6517_v19, %v2010_v21  ;;  %v2083_v14 = vmax.f32 %v2049_v13, 0.0  ;;  %v4989_v11 = vpop.eup %4988  ;;  %v2435_v15 = vshll.u32 %v6589_v22, 16  ;;  %v2110_v35 = vpack.c.bf16 %v2082_v50, %v2081_v6 }
 0x2a5   : > { %v2421_v39 = vor.u32 %v2420_v28, %v2416_v62  ;;  %v2051_v47 = vadd.f32 %v6517_v19, %v2011_v53  ;;  %v6603_v40 = vsel %vm6117_vm4, 0, %v2192_v56  ;;  %v2052_v45 = vadd.f32 %v6517_v19, %v2012_v58 }
 0x2a6   : > { %2627 = vrot.lane.b32.xlu0 %v6540_v31, %s5097_s19  ;;  %v2084_v5 = vmax.f32 %v2050_v12, 0.0  ;;  %v7791_v10 = vsub.f32 %v5967_v26, %v6422_v29  ;;  %v1873_v36 = vsub.f32 %v5984_v43, %v6470_v0  ;;  %v1874_v24 = vsub.f32 %v7792_v32, %v6492_v63 }
 0x2a7   : > { %v6614_v60 = vsel %vm2306_vm5, %v2421_v39, %v2425_v57  ;;  %v2430_v62 = vshll.u32 %v6603_v40, 16  ;;  %v2428_v49 = vshrl.u32 %v6603_v40, 16  ;;  %v2194_v26 = vshrl.u32 %v2110_v35, 16 }
 0x2a8   : > { %v1973_v44 = vmul.f32 %v4987_v41, %v7791_v10  ;;  %2517 = vrot.lane.b32.xlu1 %v6614_v60, %s5097_s19  ;;  %v2111_v29 = vpack.c.bf16 %v2084_v5, %v2083_v14  ;;  %v2085_v41 = vmax.f32 %v2051_v47, 0.0  ;;  %v2086_v43 = vmax.f32 %v2052_v45, 0.0 }
 0x2a9   : > { %v2432_v27 = vrot.slane %v2430_v62, 1  ;;  %v1974_v0 = vmul.f32 %v4989_v11, %v1872_v17  ;;  %v4991_v57 = vpop.eup %4990  ;;  %v2437_v20 = vrot.slane %v2435_v15, 1  ;;  %v2196_v6 = vrot.slane %v2194_v26, 7 }
 0x2aa   : > { %v2013_v63 = vmul.f32 %v6505_v23, %v1973_v44  ;;  %2629 = vrot.lane.b32.xlu0 %v6574_v2, %s5097_s19  ;;  %v2197_v21 = vshll.u32 %v2110_v35, 16  ;;  %v2201_v13 = vshrl.u32 %v2111_v29, 16  ;;  %v2204_v50 = vshll.u32 %v2111_v29, 16 }
 0x2ab   : > { %v2433_v28 = vor.u32 %v2432_v27, %v2428_v49  ;;  %v2112_v53 = vpack.c.bf16 %v2086_v43, %v2085_v41  ;;  %v2014_v58 = vmul.f32 %v6505_v23, %v1974_v0  ;;  %v4993_v56 = vpop.eup %4992  ;;  %v6630_v61 = vsel %vm6117_vm4, %v2196_v6, 0 }
 0x2ac   : > { %v2199_v12 = vor.u32 %v2197_v21, %v2196_v6  ;;  %v2203_v16 = vrot.slane %v2201_v13, 7  ;;  %v2053_v17 = vadd.f32 %v6517_v19, %v2013_v63  ;;  %v2447_v11 = vshll.u32 %v6630_v61, 16  ;;  %v6665_v6 = vpop.xlane.xlu1 %1531 }
 0x2ad   : > { %v6634_v14 = vsel %vm2306_vm5, %v2433_v28, %v2437_v20  ;;  %v2208_v39 = vshrl.u32 %v2112_v53, 16  ;;  %v1975_v15 = vmul.f32 %v4991_v57, %v1873_v36  ;;  %v2054_v45 = vadd.f32 %v6517_v19, %v2014_v58 }
 0x2ae   : > { %2519 = vrot.lane.b32.xlu1 %v6634_v14, %s5097_s19  ;;  %v6641_v35 = vsel %vm6117_vm4, 0, %v2199_v12  ;;  %2631 = vrot.lane.b32.xlu0 %v6603_v40, %s5097_s19  ;;  %v2206_v47 = vor.u32 %v2204_v50, %v2203_v16  ;;  %v6647_v5 = vsel %vm6117_vm4, %v2203_v16, 0  ;;  %v2211_v36 = vshll.u32 %v2112_v53, 16 }
 0x2af   : > { %v2442_v10 = vshll.u32 %v6641_v35, 16  ;;  %v2459_v44 = vshll.u32 %v6647_v5, 16  ;;  %v1976_v32 = vmul.f32 %v4993_v56, %v1874_v24  ;;  %v2210_v49 = vrot.slane %v2208_v39, 7 }
 0x2b0   : > { %v6654_v62 = vsel %vm6117_vm4, 0, %v2206_v47  ;;  %v2087_v26 = vmax.f32 %v2053_v17, 0.0  ;;  %v2088_v29 = vmax.f32 %v2054_v45, 0.0  ;;  %v2440_v41 = vshrl.u32 %v6641_v35, 16 }
 0x2b1   : > { %v2444_v27 = vrot.slane %v2442_v10, 1  ;;  %v2449_v43 = vrot.slane %v2447_v11, 1  ;;  %v2454_v0 = vshll.u32 %v6654_v62, 16  ;;  %v2213_v63 = vor.u32 %v2211_v36, %v2210_v49 }
 0x2b2   : > { %2633 = vrot.lane.b32.xlu0 %v6641_v35, %s5097_s19  ;;  %v6662_v24 = vsel %vm6117_vm4, %v2210_v49, 0  ;;  %v2113_v57 = vpack.c.bf16 %v2088_v29, %v2087_v26  ;;  %v2015_v20 = vmul.f32 %v6505_v23, %v1975_v15  ;;  %v2452_v13 = vshrl.u32 %v6654_v62, 16 }
 0x2b3   : > { %v2445_v21 = vor.u32 %v2444_v27, %v2440_v41  ;;  %v2456_v28 = vrot.slane %v2454_v0, 1  ;;  %v2016_v50 = vmul.f32 %v6505_v23, %v1976_v32  ;;  %v2461_v53 = vrot.slane %v2459_v44, 1  ;;  %v7793_v32 = vld [vmem:[#allocation37_spill] sm:$0xff] }
 0x2b4   : > { %v6671_v58 = vsel %vm6117_vm4, 0, %v2213_v63  ;;  %v2215_v56 = vshrl.u32 %v2113_v57, 16  ;;  %v2055_v12 = vadd.f32 %v6517_v19, %v2015_v20  ;;  %v2471_v39 = vshll.u32 %v6662_v24, 16 }
 0x2b5   : > { %v6675_v16 = vsel %vm2306_vm5, %v2445_v21, %v2449_v43  ;;  %v2457_v17 = vor.u32 %v2456_v28, %v2452_v13  ;;  %v2466_v11 = vshll.u32 %v6671_v58, 16  ;;  %v2218_v47 = vshll.u32 %v2113_v57, 16  ;;  %v6693_v43 = vpop.xlane.xlu1 %1534  ;;  %v7794_v57 = vld [vmem:[#allocation36_spill] sm:$0xff] }
 0x2b6   : > { %2521 = vrot.lane.b32.xlu1 %v6675_v16, %s5097_s19  ;;  %2635 = vrot.lane.b32.xlu0 %v6654_v62, %s5097_s19  ;;  %v2217_v15 = vrot.slane %v2215_v56, 7  ;;  %v2056_v45 = vadd.f32 %v6517_v19, %v2016_v50  ;;  %v2464_v44 = vshrl.u32 %v6671_v58, 16  ;;  %v2564_v49 = vrot.slane %v7793_v32, 1 }
 0x2b7   : > { %v6685_v10 = vsel %vm2306_vm5, %v2457_v17, %v2461_v53  ;;  %v2468_v36 = vrot.slane %v2466_v11, 1  ;;  %v2089_v41 = vmax.f32 %v2055_v12, 0.0  ;;  %v2473_v63 = vrot.slane %v2471_v39, 1 }
 0x2b8   : > { %v2220_v26 = vor.u32 %v2218_v47, %v2217_v15  ;;  %v6691_v29 = vsel %vm6117_vm4, %v2217_v15, 0  ;;  %v2090_v27 = vmax.f32 %v2056_v45, 0.0  ;;  %v2565_v20 = vrot.slane %v7794_v57, 1 }
 0x2b9   : > { %v2469_v0 = vor.u32 %v2468_v36, %v2464_v44  ;;  %v2483_v53 = vshll.u32 %v6691_v29, 16 }
 0x2ba   : > { %2523 = vrot.lane.b32.xlu1 %v6685_v10, %s5097_s19  ;;  %2637 = vrot.lane.b32.xlu0 %v6671_v58, %s5097_s19  ;;  %v6702_v21 = vsel %vm6117_vm4, 0, %v2220_v26  ;;  %v2114_v13 = vpack.c.bf16 %v2090_v27, %v2089_v41  ;;  %v2614_v56 = vpop.permute.xlu0 %2613  ;;  %v2566_v12 = vsel %vm2563_vm6, %v2564_v49, %v2565_v20  ;;  %v7795_v20 = vld [vmem:[#allocation39_spill] sm:$0xff] }
 0x2bb   : > { %v6705_v28 = vsel %vm2306_vm5, %v2469_v0, %v2473_v63  ;;  %v2478_v50 = vshll.u32 %v6702_v21, 16  ;;  %v2707_v11 = vsel %vm1433_vm1, %v2566_v12, %v2614_v56  ;;  %v2476_v39 = vshrl.u32 %v6702_v21, 16 }
 0x2bc   : > { %v2222_v17 = vshrl.u32 %v2114_v13, 16  ;;  %3016 = vmatprep.mubr.bf16.mxu1 %v2707_v11  ;;  %v2225_v44 = vshll.u32 %v2114_v13, 16  ;;  %v2485_v26 = vrot.slane %v2483_v53, 1  ;;  %v2582_v0 = vrot.slane %v6451_v1, 1  ;;  %v7796_v11 = vld [vmem:[#allocation38_spill] sm:$0xff] }
 0x2bd   : > { %v2480_v15 = vrot.slane %v2478_v50, 1  ;;  %v2500_v47 = vpop.permute.xlu1 %2499  ;;  %v2567_v13 = vrot.slane %v7795_v20, 1  ;;  %v2583_v50 = vrot.slane %v6445_v8, 1  ;;  %v2586_v56 = vrot.slane %v6474_v52, 1 }
 0x2be   : > { %2525 = vrot.lane.b32.xlu1 %v6705_v28, %s5097_s19  ;;  %2639 = vrot.lane.b32.xlu0 %v6702_v21, %s5097_s19  ;;  %v2224_v45 = vrot.slane %v2222_v17, 7  ;;  %v2658_v36 = vsel %vm1433_vm1, %v7793_v32, %v2500_v47  ;;  %v4855_v32 = vld [vmem:[%s7686_s8 + $0x90] sm:$0xff]   ;;  %v2588_v12 = vrot.slane %v6540_v31, 1  ;;  %v2589_v52 = vrot.slane %v6535_v37, 1 }
 0x2bf   : > { %v2481_v49 = vor.u32 %v2480_v15, %v2476_v39  ;;  %3017 = vmatmul.mubr.bf16.vlgmr.msra.gmra.mxu1 %v2658_v36  ;;  %v2568_v39 = vrot.slane %v7796_v11, 1  ;;  %v6745_v15 = vsel %vm2563_vm6, %v2582_v0, %v2583_v50  ;;  %v2598_v50 = vrot.slane %v6630_v61, 1 }
 0x2c0   : > { %v2227_v41 = vor.u32 %v2225_v44, %v2224_v45  ;;  %v2304_v27 = vsel %vm6117_vm4, %v2224_v45, 0  ;;  %4724 = vmatpush3.bf16.msra.mxu1 %v6597_v3  ;;  %v2585_v3 = vrot.slane %v6482_v7, 1  ;;  %v2591_v44 = vrot.slane %v6574_v2, 1 }
 0x2c1   : > { %v6723_v63 = vsel %vm2306_vm5, %v2481_v49, %v2485_v26  ;;  %v2495_v57 = vshll.u32 %v2304_v27, 16  ;;  %4725 = vmatprep.subr.bf16.mxu1 %v4855_v32  ;;  %v2592_v49 = vrot.slane %v6562_v42, 1  ;;  %v2594_v26 = vrot.slane %v6603_v40, 1 }
 0x2c2   : > { %2527 = vrot.lane.b32.xlu1 %v6723_v63, %s5097_s19  ;;  %v6734_v53 = vsel %vm6117_vm4, 0, %v2227_v41  ;;  %v6748_v45 = vsel %vm2563_vm6, %v2585_v3, %v2586_v56  ;;  %v2595_v41 = vrot.slane %v6589_v22, 1  ;;  %v6756_v0 = vsel %vm2563_vm6, %v2588_v12, %v2589_v52 }
 0x2c3   : > { %2641 = vrot.lane.b32.xlu0 %v6734_v53, %s5097_s19  ;;  %v2488_v8 = vshrl.u32 %v6734_v53, 16  ;;  %v2490_v17 = vshll.u32 %v6734_v53, 16  ;;  %v2497_v47 = vrot.slane %v2495_v57, 1  ;;  %v2597_v57 = vrot.slane %v6641_v35, 1 }
 0x2c4   : > { %4726 = vmatpush3.bf16.msra.mxu1 %v4855_v32  ;;  %v2600_v3 = vrot.slane %v6654_v62, 1  ;;  %v6762_v56 = vsel %vm2563_vm6, %v2591_v44, %v2592_v49  ;;  %v6765_v32 = vsel %vm2563_vm6, %v2594_v26, %v2595_v41  ;;  %v2601_v42 = vrot.slane %v6647_v5, 1  ;;  %v2502_v5 = vpop.permute.xlu1 %2501 }
 0x2c5   : > { %v2492_v36 = vrot.slane %v2490_v17, 1  ;;  %v6769_v22 = vsel %vm2563_vm6, %v2597_v57, %v2598_v50  ;;  %v2603_v12 = vrot.slane %v6671_v58, 1  ;;  %v2604_v17 = vrot.slane %v6662_v24, 1 }
 0x2c6   : > { %v2606_v61 = vrot.slane %v6702_v21, 1  ;;  %v2607_v52 = vrot.slane %v6691_v29, 1  ;;  %v2609_v44 = vrot.slane %v6734_v53, 1  ;;  %v2610_v24 = vrot.slane %v2304_v27, 1  ;;  %v4856_v27 = vld [vmem:[%s7686_s8 + $0x88] sm:$0xff]  }
 0x2c7   : > { %v2493_v37 = vor.u32 %v2492_v36, %v2488_v8  ;;  %v6778_v8 = vsel %vm2563_vm6, %v2600_v3, %v2601_v42  ;;  %v6785_v36 = vsel %vm2563_vm6, %v2603_v12, %v2604_v17  ;;  %v2569_v26 = vsel %vm2563_vm6, %v2567_v13, %v2568_v39  ;;  %4727 = vmatprep.subr.bf16.mxu1 %v4856_v27 }
 0x2c8   : > { %v6793_v29 = vsel %vm2563_vm6, %v2609_v44, %v2610_v24  ;;  %v2661_v57 = vsel %vm1433_vm1, %v7795_v20, %v2502_v5  ;;  %4728 = vmatpush3.bf16.msra.mxu1 %v4856_v27  ;;  %v1570_v13 = vmul.f32 0.015625, %v6693_v43  ;;  %v2570_v17 = vrot.slane %v6241_v18, 1  ;;  %v4857_v44 = vld [vmem:[%s7686_s8 + $0x80] sm:$0xff]   ;;  %v7797_v24 = vld [vmem:[#allocation41_spill] sm:$0xff] }
 0x2c9   : > { %v6775_v11 = vsel %vm2306_vm5, %v2493_v37, %v2497_v47  ;;  %v6789_v47 = vsel %vm2563_vm6, %v2606_v61, %v2607_v52  ;;  %v1569_v37 = vmul.f32 0.015625, %v6665_v6  ;;  %4729 = vmatprep.subr.bf16.mxu1 %v4857_v44  ;;  %v2573_v27 = vrot.slane %v6297_v46, 1 }
 0x2ca   : > { %2529 = vrot.lane.b32.xlu1 %v6775_v11, %s5097_s19  ;;  %v1774_v50 = vmul.f32 %v1570_v13, %v1570_v13 }
 0x2cb   : > { %v2616_v49 = vpop.permute.xlu0 %2615  ;;  %v1773_v61 = vmul.f32 %v1569_v37, %v1569_v37 }
 0x2cc   : > { %v2711_v41 = vsel %vm1433_vm1, %v2569_v26, %v2616_v49  ;;  %v2571_v49 = vrot.slane %v7797_v24, 1  ;;  %4730 = vmatpush3.bf16.msra.mxu1 %v4857_v44  ;;  %v7798_v44 = vld [vmem:[#allocation42_spill] sm:$0xff] }
 0x2cd   : > { %3024 = vmatprep.mubr.bf16.mxu1 %v2711_v41 }
 0x2ce   : > { %3025 = vmatmul.mubr.bf16.gmra.mxu1 %v2661_v57  ;;  %v2572_v6 = vsel %vm2563_vm6, %v2570_v17, %v2571_v49 }
 0x2fe   : > { %v1706_v39 = vpop.xlane.xlu1 %1705 }
 0x2ff   : > { %v1740_v3 = vmul.f32 0.015625, %v1706_v39 }
 0x301   : > { %v1703_v42 = vpop.xlane.xlu0 %1702  ;;  %v1808_v12 = vsub.f32 %v1740_v3, %v1774_v50  ;;  %v2574_v3 = vrot.slane %v6308_v30, 1 }
 0x302   : > { %v1739_v20 = vmul.f32 0.015625, %v1703_v42  ;;  %v2504_v52 = vpop.permute.xlu1 %2503 }
 0x303   : > { %v1842_v5 = vmax.f32 %v1808_v12, 0.0  ;;  %v2664_v57 = vsel %vm1433_vm1, %v6241_v18, %v2504_v52 }
 0x304   : > { %v1807_v43 = vsub.f32 %v1739_v20, %v1773_v61  ;;  %v2575_v61 = vsel %vm2563_vm6, %v2573_v27, %v2574_v3  ;;  %v2576_v20 = vrot.slane %v6314_v51, 1 }
 0x305   : > { %v1910_v26 = vadd.f32 1e-05, %v1842_v5  ;;  %v2618_v41 = vpop.permute.xlu0 %2617  ;;  %v2577_v5 = vrot.slane %v7798_v44, 1 }
 0x306   : > { %v1841_v39 = vmax.f32 %v1807_v43, 0.0  ;;  %v2715_v50 = vsel %vm1433_vm1, %v2572_v6, %v2618_v41  ;;  %v7799_v43 = vld [vmem:[#allocation35_spill] sm:$0xff]  ;;  %v2579_v41 = vrot.slane %v6359_v4, 1 }
 0x307   : > { %4994 = vrsqrt.f32 %v1910_v26  ;;  %3032 = vmatprep.mubr.bf16.mxu1 %v2715_v50  ;;  %v2578_v30 = vsel %vm2563_vm6, %v2576_v20, %v2577_v5  ;;  %v1876_v26 = vsub.f32 %v7799_v43, %v1570_v13 }
 0x308   : > { %v1909_v42 = vadd.f32 1e-05, %v1841_v39  ;;  %3033 = vmatmul.mubr.bf16.gmra.mxu1 %v2664_v57  ;;  %v2508_v57 = vpop.permute.xlu1 %2507  ;;  %v2580_v39 = vrot.slane %v6337_v55, 1 }
 0x309   : > { %v2620_v12 = vpop.permute.xlu0 %2619 }
 0x30a   : > { %4996 = vrsqrt.f32 %v1909_v42  ;;  %v2719_v17 = vsel %vm1433_vm1, %v2575_v61, %v2620_v12  ;;  %v2670_v12 = vsel %vm1433_vm1, %v6314_v51, %v2508_v57  ;;  %v2581_v61 = vsel %vm2563_vm6, %v2579_v41, %v2580_v39 }
 0x30b   : > { %3040 = vmatprep.mubr.bf16.mxu1 %v2719_v17 }
 0x30d   : > { %v2506_v18 = vpop.permute.xlu0 %2505 }
 0x30e   : > { %v2667_v52 = vsel %vm1433_vm1, %v6297_v46, %v2506_v18  ;;  %v7800_v46 = vld [vmem:[#allocation34_spill] sm:$0xff] }
 0x30f   : > { %v1875_v3 = vsub.f32 %v7800_v46, %v1569_v37 }
 0x310   : > { %3041 = vmatmul.mubr.bf16.gmra.mxu1 %v2667_v52  ;;  %v2510_v52 = vpop.permute.xlu1 %2509 }
 0x311   : > { %v2622_v24 = vpop.permute.xlu0 %2621  ;;  %v2673_v51 = vsel %vm1433_vm1, %v6359_v4, %v2510_v52 }
 0x312   : > { %v2723_v49 = vsel %vm1433_vm1, %v2578_v30, %v2622_v24 }
 0x313   : > { %3048 = vmatprep.mubr.bf16.mxu1 %v2723_v49 }
 0x314   : > { %v4995_v6 = vpop.eup %4994 }
 0x315   : > { %v2624_v27 = vpop.permute.xlu0 %2623  ;;  %v1978_v50 = vmul.f32 %v4995_v6, %v1876_v26  ;;  %v2512_v26 = vpop.permute.xlu1 %2511 }
 0x316   : > { %v2727_v13 = vsel %vm1433_vm1, %v2581_v61, %v2624_v27  ;;  %v2676_v27 = vsel %vm1433_vm1, %v6451_v1, %v2512_v26 }
 0x317   : > { %v4997_v42 = vpop.eup %4996  ;;  %v2018_v17 = vmul.f32 %v6505_v23, %v1978_v50 }
 0x318   : > { %3049 = vmatmul.mubr.bf16.gmra.mxu1 %v2670_v12  ;;  %v1977_v18 = vmul.f32 %v4997_v42, %v1875_v3 }
 0x319   : > { %3056 = vmatprep.mubr.bf16.mxu1 %v2727_v13  ;;  %v2058_v20 = vadd.f32 %v6517_v19, %v2018_v17  ;;  %v2626_v5 = vpop.permute.xlu0 %2625  ;;  %v2514_v42 = vpop.permute.xlu1 %2513 }
 0x31a   : > { %v2017_v55 = vmul.f32 %v6505_v23, %v1977_v18  ;;  %v2731_v30 = vsel %vm1433_vm1, %v6745_v15, %v2626_v5  ;;  %v2679_v1 = vsel %vm1433_vm1, %v6482_v7, %v2514_v42 }
 0x31b   : > { %v2092_v44 = vmax.f32 %v2058_v20, 0.0 }
 0x31c   : > { %v2057_v37 = vadd.f32 %v6517_v19, %v2017_v55 }
 0x31d   : > { %v2628_v23 = vpop.permute.xlu0 %2627 }
 0x31e   : > { %v2091_v24 = vmax.f32 %v2057_v37, 0.0  ;;  %v2735_v4 = vsel %vm1433_vm1, %v6748_v45, %v2628_v23  ;;  %v2516_v45 = vpop.permute.xlu1 %2515 }
 0x31f   : > { %v2682_v20 = vsel %vm1433_vm1, %v6540_v31, %v2516_v45 }
 0x320   : > { %3057 = vmatmul.mubr.bf16.gmra.mxu1 %v2673_v51  ;;  %v2115_v49 = vpack.c.bf16 %v2092_v44, %v2091_v24 }
 0x321   : > { %3064 = vmatprep.mubr.bf16.mxu1 %v2731_v30  ;;  %v2630_v12 = vpop.permute.xlu0 %2629 }
 0x322   : > { %v2229_v43 = vshrl.u32 %v2115_v49, 16  ;;  %v2232_v6 = vshll.u32 %v2115_v49, 16  ;;  %v2739_v9 = vsel %vm1433_vm1, %v6756_v0, %v2630_v12  ;;  %v2518_v52 = vpop.permute.xlu1 %2517  ;;  %v7801_v12 = vld [vmem:[#allocation40_spill] sm:$0xff] }
 0x323   : > { %v2685_v37 = vsel %vm1433_vm1, %v6574_v2, %v2518_v52 }
 0x324   : > { %v2231_v41 = vrot.slane %v2229_v43, 7 }
 0x325   : > { %v2632_v18 = vpop.permute.xlu0 %2631 }
 0x326   : > { %v2234_v57 = vor.u32 %v2232_v6, %v2231_v41  ;;  %v2305_v19 = vsel %vm6117_vm4, %v2231_v41, 0  ;;  %v2743_v55 = vsel %vm1433_vm1, %v6762_v56, %v2632_v18  ;;  %v2520_v44 = vpop.permute.xlu1 %2519 }
 0x327   : > { %v2653_v50 = vshll.u32 %v2305_v19, 16  ;;  %v2688_v31 = vsel %vm1433_vm1, %v6603_v40, %v2520_v44 }
 0x328   : > { %3065 = vmatmul.mubr.bf16.gmra.mxu1 %v2676_v27  ;;  %v2288_v15 = vsel %vm6117_vm4, 0, %v2234_v57 }
 0x329   : > { %3072 = vmatprep.mubr.bf16.mxu1 %v2735_v4  ;;  %2643 = vrot.lane.b32.xlu0 %v2288_v15, %s5097_s19  ;;  %v2648_v39 = vshll.u32 %v2288_v15, 16  ;;  %v2646_v46 = vshrl.u32 %v2288_v15, 16  ;;  %v2655_v17 = vrot.slane %v2653_v50, 1  ;;  %v2634_v7 = vpop.permute.xlu0 %2633 }
 0x32a   : > { %v2747_v0 = vsel %vm1433_vm1, %v6765_v32, %v2634_v7  ;;  %v2522_v24 = vpop.permute.xlu1 %2521 }
 0x32b   : > { %v2650_v3 = vrot.slane %v2648_v39, 1  ;;  %v2691_v2 = vsel %vm1433_vm1, %v6641_v35, %v2522_v24 }
 0x32d   : > { %v2651_v61 = vor.u32 %v2650_v3, %v2646_v46  ;;  %v2636_v5 = vpop.permute.xlu0 %2635 }
 0x32e   : > { %v2751_v56 = vsel %vm1433_vm1, %v6769_v22, %v2636_v5  ;;  %v2524_v30 = vpop.permute.xlu1 %2523 }
 0x32f   : > { %v6849_v13 = vsel %vm2306_vm5, %v2651_v61, %v2655_v17  ;;  %v2694_v40 = vsel %vm1433_vm1, %v6654_v62, %v2524_v30 }
 0x330   : > { %3073 = vmatmul.mubr.bf16.gmra.mxu1 %v2679_v1 }
 0x331   : > { %3080 = vmatprep.mubr.bf16.mxu1 %v2739_v9  ;;  %v2638_v51 = vpop.permute.xlu0 %2637 }
 0x332   : > { %v2755_v32 = vsel %vm1433_vm1, %v6778_v8, %v2638_v51  ;;  %v2526_v43 = vpop.permute.xlu1 %2525 }
 0x333   : > { %v2697_v35 = vsel %vm1433_vm1, %v6671_v58, %v2526_v43 }
 0x335   : > { %v2640_v49 = vpop.permute.xlu0 %2639 }
 0x336   : > { %v2759_v22 = vsel %vm1433_vm1, %v6785_v36, %v2640_v49  ;;  %v2528_v41 = vpop.permute.xlu1 %2527 }
 0x337   : > { %v2700_v6 = vsel %vm1433_vm1, %v6702_v21, %v2528_v41 }
 0x338   : > { %3081 = vmatmul.mubr.bf16.gmra.mxu1 %v2682_v20 }
 0x339   : > { %3088 = vmatprep.mubr.bf16.mxu1 %v2743_v55  ;;  %v2642_v26 = vpop.permute.xlu0 %2641 }
 0x33a   : > { %v2763_v8 = vsel %vm1433_vm1, %v6789_v47, %v2642_v26 }
 0x33c   : > { %v2530_v46 = vpop.permute.xlu1 %2529 }
 0x33d   : > { %v2703_v42 = vsel %vm1433_vm1, %v6734_v53, %v2530_v46 }
 0x340   : > { %3089 = vmatmul.mubr.bf16.gmra.mxu1 %v2685_v37 }
 0x341   : > { %3096 = vmatprep.mubr.bf16.mxu1 %v2747_v0 }
 0x348   : > { %3097 = vmatmul.mubr.bf16.gmra.mxu1 %v2688_v31 }
 0x349   : > { %3104 = vmatprep.mubr.bf16.mxu1 %v2751_v56 }
 0x350   : > { %3105 = vmatmul.mubr.bf16.gmra.mxu1 %v2691_v2 }
 0x351   : > { %3112 = vmatprep.mubr.bf16.mxu1 %v2755_v32 }
 0x358   : > { %3113 = vmatmul.mubr.bf16.gmra.mxu1 %v2694_v40 }
 0x359   : > { %3120 = vmatprep.mubr.bf16.mxu1 %v2759_v22 }
 0x360   : > { %3121 = vmatmul.mubr.bf16.gmra.mxu1 %v2697_v35 }
 0x361   : > { %3128 = vmatprep.mubr.bf16.mxu1 %v2763_v8 }
 0x368   : > { %3129 = vmatmul.mubr.bf16.gmra.mxu1 %v2700_v6 }
 0x37f   : > { %v4503_v62 = vpop.f32.mrf.mxu1 }
 0x381   : > { %v4504_v23 = vpop.f32.mrf.mxu1 }
 0x382   : > { %v6879_v57 = vadd.f32 %v4504_v23, %v4503_v62 }
 0x383   : > { %v4506_v36 = vpop.f32.mrf.mxu1 }
 0x385   : > { %v4507_v19 = vpop.f32.mrf.mxu1 }
 0x386   : > { %v6881_v27 = vadd.f32 %v4507_v19, %v4506_v36 }
 0x38e   : > { %v4509_v4 = vpop.f32.mrf.mxu1 }
 0x390   : > { %v4510_v58 = vpop.f32.mrf.mxu1 }
 0x391   : > { %v6883_v15 = vadd.f32 %v4510_v58, %v4509_v4 }
 0x392   : > { %v4512_v39 = vpop.f32.mrf.mxu1 }
 0x394   : > { %v4513_v47 = vpop.f32.mrf.mxu1 }
 0x395   : > { %v6885_v50 = vadd.f32 %v4513_v47, %v4512_v39 }
 0x39b   : > { %v2644_v3 = vpop.permute.xlu0 %2643 }
 0x39c   : > { %v2767_v21 = vsel %vm1433_vm1, %v6793_v29, %v2644_v3 }
 0x39d   : > { %3136 = vmatprep.mubr.bf16.mxu1 %v2767_v21 }
 0x39e   : > { %3137 = vmatmul.mubr.bf16.gmra.mxu1 %v2703_v42 }
 0x39f   : > { %4731 = vmatprep.mubr.msk.bf16.mxu1 %vm1433_vm1, %v7801_v12 }
 0x3a6   : > { %4732 = vmatmul.mubr.msk.bf16.vlgmr.msra.gmra.mxu1 %vm1433_vm1, %v6293_v33 }
 0x3a7   : > { %4735 = vmatprep.mubr.msk.bf16.mxu1 %vm1433_vm1, %v6408_v34 }
 0x3ae   : > { %4736 = vmatmul.mubr.msk.bf16.gmra.mxu1 %vm1433_vm1, %v6381_v38 }
 0x3af   : > { %4739 = vmatprep.mubr.msk.bf16.mxu1 %vm1433_vm1, %v6420_v48 }
 0x3b6   : > { %4740 = vmatmul.mubr.msk.bf16.gmra.mxu1 %vm1433_vm1, %v6495_v59 }
 0x3b7   : > { %4743 = vmatprep.mubr.msk.bf16.mxu1 %vm1433_vm1, %v6523_v54 }
 0x3be   : > { %4744 = vmatmul.mubr.msk.bf16.gmra.mxu1 %vm1433_vm1, %v6570_v25 }
 0x3bf   : > { %4747 = vmatprep.mubr.msk.bf16.mxu1 %vm1433_vm1, %v6614_v60 }
 0x3c6   : > { %4748 = vmatmul.mubr.msk.bf16.gmra.mxu1 %vm1433_vm1, %v6634_v14 }
 0x3c7   : > { %4751 = vmatprep.mubr.msk.bf16.mxu1 %vm1433_vm1, %v6675_v16 }
 0x3c8   : > { %v4515_v33 = vpop.f32.mrf.mxu1 }
 0x3ca   : > { %v4516_v38 = vpop.f32.mrf.mxu1 }
 0x3cb   : > { %v6913_v34 = vadd.f32 %v4516_v38, %v4515_v33 }
 0x3cc   : > { %v4518_v48 = vpop.f32.mrf.mxu1 }
 0x3ce   : > { %v4519_v59 = vpop.f32.mrf.mxu1  ;;  %4752 = vmatmul.mubr.msk.bf16.gmra.mxu1 %vm1433_vm1, %v6685_v10 }
 0x3cf   : > { %v6917_v54 = vadd.f32 %v4519_v59, %v4518_v48  ;;  %4755 = vmatprep.mubr.msk.bf16.mxu1 %vm1433_vm1, %v6705_v28 }
 0x3d0   : > { %v4521_v25 = vpop.f32.mrf.mxu1 }
 0x3d2   : > { %v4522_v60 = vpop.f32.mrf.mxu1 }
 0x3d3   : > { %v6921_v14 = vadd.f32 %v4522_v60, %v4521_v25 }
 0x3d4   : > { %v4524_v53 = vpop.f32.mrf.mxu1 }
 0x3d6   : > { %v4525_v16 = vpop.f32.mrf.mxu1  ;;  %4756 = vmatmul.mubr.msk.bf16.gmra.mxu1 %vm1433_vm1, %v6723_v63 }
 0x3d7   : > { %v6925_v29 = vadd.f32 %v4525_v16, %v4524_v53  ;;  %4759 = vmatprep.mubr.msk.bf16.mxu1 %vm1433_vm1, %v6775_v11 }
 0x3d8   : > { %v4527_v10 = vpop.f32.mrf.mxu1 }
 0x3da   : > { %v4528_v61 = vpop.f32.mrf.mxu1 }
 0x3db   : > { %v6929_v17 = vadd.f32 %v4528_v61, %v4527_v10 }
 0x3dc   : > { %v4530_v1 = vpop.f32.mrf.mxu1 }
 0x3de   : > { %v4531_v28 = vpop.f32.mrf.mxu1  ;;  %4760 = vmatmul.mubr.msk.bf16.gmra.mxu1 %vm1433_vm1, %v6849_v13 }
 0x3df   : > { %v6933_v9 = vadd.f32 %v4531_v28, %v4530_v1 }
 0x3e0   : > { %v4533_v45 = vpop.f32.mrf.mxu1 }
 0x3e2   : > { %v4534_v18 = vpop.f32.mrf.mxu1 }
 0x3e3   : > { %v6935_v20 = vadd.f32 %v4534_v18, %v4533_v45 }
 0x3e4   : > { %v4536_v63 = vpop.f32.mrf.mxu1 }
 0x3e6   : > { %v4537_v55 = vpop.f32.mrf.mxu1 }
 0x3e7   : > { %v6937_v52 = vadd.f32 %v4537_v55, %v4536_v63 }
 0x3e8   : > { %v4539_v11 = vpop.f32.mrf.mxu1 }
 0x3ea   : > { %v4540_v7 = vpop.f32.mrf.mxu1 }
 0x3eb   : > { %v6939_v37 = vadd.f32 %v4540_v7, %v4539_v11 }
 0x3ec   : > { %v4542_v0 = vpop.f32.mrf.mxu1 }
 0x3ee   : > { %v4543_v44 = vpop.f32.mrf.mxu1 }
 0x3ef   : > { %v6941_v5 = vadd.f32 %v4543_v44, %v4542_v0  ;;  %v4858_v0 = vld [vmem:[%s7690_s12 + $0x18] sm:$0xff]  }
 0x3f0   : > { %v4545_v31 = vpop.f32.mrf.mxu1  ;;  %4763 = vmatprep.subr.bf16.mxu0 %v4858_v0 }
 0x3f1   : > { %4764 = vmatpush3.bf16.msra.mxu0 %v4858_v0 }
 0x3f2   : > { %v4546_v13 = vpop.f32.mrf.mxu1 }
 0x3f3   : > { %v6943_v56 = vadd.f32 %v4546_v13, %v4545_v31 }
 0x3f4   : > { %v4548_v24 = vpop.f32.mrf.mxu1 }
 0x3f6   : > { %v4549_v51 = vpop.f32.mrf.mxu1 }
 0x3f7   : > { %v6945_v2 = vadd.f32 %v4549_v51, %v4548_v24 }
 0x3f8   : > { %v4551_v32 = vpop.f32.mrf.mxu1 }
 0x3fa   : > { %v4552_v30 = vpop.f32.mrf.mxu1 }
 0x3fb   : > { %v6947_v49 = vadd.f32 %v4552_v30, %v4551_v32  ;;  %v6983_v32 = vld [vmem:[%s7687_s9] ss:$0 sm:$0xff] }
 0x3fc   : > { %v4554_v40 = vpop.f32.mrf.mxu1 }
 0x3fe   : > { %v4555_v22 = vpop.f32.mrf.mxu1 }
 0x3ff   : > { %v6949_v43 = vadd.f32 %v4555_v22, %v4554_v40  ;;  %v3027_v40 = vadd.f32 %v6883_v15, %v6983_v32  ;;  %v3022_v15 = vadd.f32 %v6881_v27, %v6983_v32 }
 0x400   : > { %v4557_v26 = vpop.f32.mrf.mxu1 }
 0x402   : > { %v4558_v35 = vpop.f32.mrf.mxu1 }
 0x403   : > { %v6951_v8 = vadd.f32 %v4558_v35, %v4557_v26  ;;  %v3019_v35 = vadd.f32 %v6879_v57, %v6983_v32 }
 0x404   : > { %v4560_v41 = vpop.f32.mrf.mxu1 }
 0x406   : > { %v4561_v6 = vpop.f32.mrf.mxu1 }
 0x407   : > { %v6953_v62 = vadd.f32 %v4561_v6, %v4560_v41 }
 0x408   : > { %v4563_v23 = vpop.f32.mrf.mxu1 }
 0x40a   : > { %v4564_v36 = vpop.f32.mrf.mxu1 }
 0x40b   : > { %v6955_v19 = vadd.f32 %v4564_v36, %v4563_v23  ;;  %v3030_v36 = vadd.f32 %v6885_v50, %v6983_v32 }
 0x40c   : > { %v4566_v4 = vpop.f32.mrf.mxu1 }
 0x40e   : > { %v4567_v58 = vpop.f32.mrf.mxu1 }
 0x40f   : > { %v6957_v39 = vadd.f32 %v4567_v58, %v4566_v4 }
 0x410   : > { %v4569_v47 = vpop.f32.mrf.mxu1 }
 0x412   : > { %v4570_v46 = vpop.f32.mrf.mxu1 }
 0x413   : > { %v6959_v3 = vadd.f32 %v4570_v46, %v4569_v47 }
 0x414   : > { %v4572_v21 = vpop.f32.mrf.mxu1 }
 0x416   : > { %v4573_v42 = vpop.f32.mrf.mxu1 }
 0x417   : > { %v6961_v12 = vadd.f32 %v4573_v42, %v4572_v21 }
 0x418   : > { %v4575_v33 = vpop.f32.mrf.mxu1 }
 0x41a   : > { %v4576_v38 = vpop.f32.mrf.mxu1 }
 0x41b   : > { %v6963_v48 = vadd.f32 %v4576_v38, %v4575_v33 }
 0x41c   : > { %v4578_v59 = vpop.f32.mrf.mxu1 }
 0x41e   : > { %v4579_v25 = vpop.f32.mrf.mxu1 }
 0x41f   : > { %v6965_v60 = vadd.f32 %v4579_v25, %v4578_v59 }
 0x420   : > { %v4581_v53 = vpop.f32.mrf.mxu1 }
 0x422   : > { %v4582_v16 = vpop.f32.mrf.mxu1 }
 0x423   : > { %v6967_v10 = vadd.f32 %v4582_v16, %v4581_v53  ;;  %v3046_v16 = vadd.f32 %v6925_v29, %v6983_v32 }
 0x424   : > { %v4584_v61 = vpop.f32.mrf.mxu1 }
 0x426   : > { %v4585_v1 = vpop.f32.mrf.mxu1 }
 0x427   : > { %v6969_v28 = vadd.f32 %v4585_v1, %v4584_v61 }
 0x428   : > { %v4587_v45 = vpop.f32.mrf.mxu1 }
 0x42a   : > { %v4588_v18 = vpop.f32.mrf.mxu1 }
 0x42b   : > { %v6971_v63 = vadd.f32 %v4588_v18, %v4587_v45  ;;  %v4859_v45 = vld [vmem:[%s7690_s12 + $0x10] sm:$0xff]   ;;  %v3043_v18 = vadd.f32 %v6921_v14, %v6983_v32 }
 0x42c   : > { %v4590_v55 = vpop.f32.mrf.mxu1  ;;  %4765 = vmatprep.subr.bf16.mxu0 %v4859_v45 }
 0x42d   : > { %4766 = vmatpush3.bf16.msra.mxu0 %v4859_v45 }
 0x42e   : > { %v4591_v11 = vpop.f32.mrf.mxu1 }
 0x42f   : > { %v6973_v7 = vadd.f32 %v4591_v11, %v4590_v55 }
 0x45e   : > { %v4593_v44 = vpop.f32.mrf.mxu1 }
 0x460   : > { %v4594_v31 = vpop.f32.mrf.mxu1 }
 0x461   : > { %v6978_v13 = vadd.f32 %v4594_v31, %v4593_v44  ;;  %v3038_v44 = vadd.f32 %v6917_v54, %v6983_v32 }
 0x462   : > { %v4596_v24 = vpop.f32.mrf.mxu1 }
 0x464   : > { %v4597_v51 = vpop.f32.mrf.mxu1 }
 0x465   : > { %v6985_v30 = vadd.f32 %v4597_v51, %v4596_v24  ;;  %v3035_v24 = vadd.f32 %v6913_v34, %v6983_v32 }
 0x466   : > { %v4733_v22 = vpop.f32.mrf.mxu1 }
 0x467   : > { %v6989_v26 = vadd.f32 %v4733_v22, %v3027_v40 }
 0x468   : > { %v3179_v41 = vpop.f32.mrf.mxu1 }
 0x469   : > { %v6993_v6 = vadd.f32 %v3179_v41, %v3019_v35  ;;  %v3314_v23 = vsel %vm1433_vm1, %v6989_v26, 0.0  ;;  %v3438_v21 = vmul.f32 %v6989_v26, %v6989_v26 }
 0x46a   : > { %3315 = vadd.xlane.f32.xlu0 %v3314_v23  ;;  %v4734_v4 = vpop.f32.mrf.mxu1 }
 0x46b   : > { %v6999_v58 = vadd.f32 %v4734_v4, %v3030_v36  ;;  %v3308_v57 = vsel %vm1433_vm1, %v6993_v6, 0.0  ;;  %v3474_v27 = vsel %vm1433_vm1, %v3438_v21, 0.0  ;;  %v3436_v1 = vmul.f32 %v6993_v6, %v6993_v6 }
 0x46c   : > { %v3182_v47 = vpop.f32.mrf.mxu1 }
 0x46d   : > { %v7003_v46 = vadd.f32 %v3182_v47, %v3022_v15  ;;  %v3439_v33 = vmul.f32 %v6999_v58, %v6999_v58  ;;  %v3317_v61 = vsel %vm1433_vm1, %v6999_v58, 0.0  ;;  %v3468_v31 = vsel %vm1433_vm1, %v3436_v1, 0.0 }
 0x46e   : > { %v4737_v42 = vpop.f32.mrf.mxu1  ;;  %3309 = vadd.xlane.f32.xlu0 %v3308_v57  ;;  %v3062_v57 = vadd.f32 %v6937_v52, %v6983_v32  ;;  %v3054_v52 = vadd.f32 %v6933_v9, %v6983_v32 }
 0x46f   : > { %v3311_v50 = vsel %vm1433_vm1, %v7003_v46, 0.0  ;;  %v3477_v59 = vsel %vm1433_vm1, %v3439_v33, 0.0  ;;  %v3437_v25 = vmul.f32 %v7003_v46, %v7003_v46  ;;  %v7031_v29 = vadd.f32 %v4737_v42, %v3043_v18 }
 0x470   : > { %v3195_v38 = vpop.f32.mrf.mxu1  ;;  %3312 = vadd.xlane.f32.xlu1 %v3311_v50  ;;  %v3059_v50 = vadd.f32 %v6935_v20, %v6983_v32 }
 0x471   : > { %v3471_v11 = vsel %vm1433_vm1, %v3437_v25, 0.0  ;;  %v7042_v22 = vadd.f32 %v3195_v38, %v3035_v24  ;;  %v3326_v35 = vsel %vm1433_vm1, %v7031_v29, 0.0  ;;  %v3442_v36 = vmul.f32 %v7031_v29, %v7031_v29 }
 0x472   : > { %3475 = vadd.xlane.f32.xlu0 %v3474_v27  ;;  %v4738_v53 = vpop.f32.mrf.mxu1 }
 0x473   : > { %v7028_v55 = vadd.f32 %v4738_v53, %v3046_v16  ;;  %v3320_v23 = vsel %vm1433_vm1, %v7042_v22, 0.0  ;;  %v3486_v21 = vsel %vm1433_vm1, %v3442_v36, 0.0  ;;  %v3440_v42 = vmul.f32 %v7042_v22, %v7042_v22 }
 0x474   : > { %3478 = vadd.xlane.f32.xlu1 %v3477_v59  ;;  %v3198_v0 = vpop.f32.mrf.mxu1  ;;  %v3051_v53 = vadd.f32 %v6929_v17, %v6983_v32 }
 0x475   : > { %v7038_v14 = vadd.f32 %v3198_v0, %v3038_v44  ;;  %v3329_v51 = vsel %vm1433_vm1, %v7028_v55, 0.0  ;;  %v3443_v41 = vmul.f32 %v7028_v55, %v7028_v55  ;;  %v3480_v25 = vsel %vm1433_vm1, %v3440_v42, 0.0 }
 0x476   : > { %3318 = vadd.xlane.f32.xlu0 %v3317_v61  ;;  %v4741_v40 = vpop.f32.mrf.mxu1 }
 0x477   : > { %v3323_v54 = vsel %vm1433_vm1, %v7038_v14, 0.0  ;;  %v3489_v4 = vsel %vm1433_vm1, %v3443_v41, 0.0  ;;  %v3441_v15 = vmul.f32 %v7038_v14, %v7038_v14  ;;  %v7067_v59 = vadd.f32 %v4741_v40, %v3059_v50 }
 0x478   : > { %3472 = vadd.xlane.f32.xlu1 %v3471_v11  ;;  %v3211_v34 = vpop.f32.mrf.mxu1 }
 0x479   : > { %v3483_v38 = vsel %vm1433_vm1, %v3441_v15, 0.0  ;;  %v7078_v1 = vadd.f32 %v3211_v34, %v3051_v53  ;;  %v3338_v45 = vsel %vm1433_vm1, %v7067_v59, 0.0  ;;  %v3446_v0 = vmul.f32 %v7067_v59, %v7067_v59 }
 0x47a   : > { %3469 = vadd.xlane.f32.xlu0 %v3468_v31  ;;  %v4742_v47 = vpop.f32.mrf.mxu1  ;;  %v3067_v15 = vadd.f32 %v6939_v37, %v6983_v32 }
 0x47b   : > { %v7064_v33 = vadd.f32 %v4742_v47, %v3062_v57  ;;  %v3332_v11 = vsel %vm1433_vm1, %v7078_v1, 0.0  ;;  %v3498_v40 = vsel %vm1433_vm1, %v3446_v0, 0.0 }
 0x47c   : > { %3330 = vadd.xlane.f32.xlu1 %v3329_v51  ;;  %v3214_v27 = vpop.f32.mrf.mxu1  ;;  %v3078_v51 = vadd.f32 %v6945_v2, %v6983_v32  ;;  %v3070_v2 = vadd.f32 %v6941_v5, %v6983_v32 }
 0x47d   : > { %v7074_v16 = vadd.f32 %v3214_v27, %v3054_v52  ;;  %v3341_v20 = vsel %vm1433_vm1, %v7064_v33, 0.0  ;;  %v3447_v18 = vmul.f32 %v7064_v33, %v7064_v33 }
 0x47e   : > { %3327 = vadd.xlane.f32.xlu0 %v3326_v35  ;;  %v4745_v61 = vpop.f32.mrf.mxu1  ;;  %v3444_v35 = vmul.f32 %v7078_v1, %v7078_v1 }
 0x47f   : > { %v3335_v9 = vsel %vm1433_vm1, %v7074_v16, 0.0  ;;  %v3501_v44 = vsel %vm1433_vm1, %v3447_v18, 0.0  ;;  %v3445_v31 = vmul.f32 %v7074_v16, %v7074_v16  ;;  %v3091_v18 = vadd.f32 %v6951_v8, %v6983_v32 }
 0x480   : > { %3324 = vadd.xlane.f32.xlu1 %v3323_v54  ;;  %v3227_v17 = vpop.f32.mrf.mxu1  ;;  %v3075_v54 = vadd.f32 %v6943_v56, %v6983_v32  ;;  %v3083_v8 = vadd.f32 %v6947_v49, %v6983_v32 }
 0x481   : > { %v3495_v34 = vsel %vm1433_vm1, %v3445_v31, 0.0  ;;  %v3086_v31 = vadd.f32 %v6949_v43, %v6983_v32 }
 0x482   : > { %3321 = vadd.xlane.f32.xlu0 %v3320_v23  ;;  %v4746_v24 = vpop.f32.mrf.mxu1  ;;  %v7103_v36 = vadd.f32 %v4745_v61, %v3075_v54  ;;  %v3094_v61 = vadd.f32 %v6953_v62, %v6983_v32 }
 0x483   : > { %v7100_v41 = vadd.f32 %v4746_v24, %v3078_v51 }
 0x484   : > { %3490 = vadd.xlane.f32.xlu1 %v3489_v4  ;;  %v3230_v23 = vpop.f32.mrf.mxu1  ;;  %v3492_v4 = vsel %vm1433_vm1, %v3444_v35, 0.0  ;;  %v3350_v42 = vsel %vm1433_vm1, %v7103_v36, 0.0  ;;  %v3450_v52 = vmul.f32 %v7103_v36, %v7103_v36 }
 0x485   : > { %v7110_v47 = vadd.f32 %v3230_v23, %v3070_v2  ;;  %v3353_v56 = vsel %vm1433_vm1, %v7100_v41, 0.0  ;;  %v3451_v50 = vmul.f32 %v7100_v41, %v7100_v41 }
 0x486   : > { %3487 = vadd.xlane.f32.xlu0 %v3486_v21  ;;  %v4749_v57 = vpop.f32.mrf.mxu1  ;;  %v7114_v21 = vadd.f32 %v3227_v17, %v3067_v15 }
 0x487   : > { %v3347_v5 = vsel %vm1433_vm1, %v7110_v47, 0.0  ;;  %v3449_v53 = vmul.f32 %v7110_v47, %v7110_v47  ;;  %v7145_v62 = vadd.f32 %v4749_v57, %v3091_v18 }
 0x488   : > { %3484 = vadd.xlane.f32.xlu1 %v3483_v38  ;;  %v3243_v37 = vpop.f32.mrf.mxu1  ;;  %v4860_v38 = vld [vmem:[%s7690_s12 + $0x8] sm:$0xff]   ;;  %v3344_v27 = vsel %vm1433_vm1, %v7114_v21, 0.0 }
 0x489   : > { %4767 = vmatprep.subr.bf16.mxu0 %v4860_v38  ;;  %v7156_v54 = vadd.f32 %v3243_v37, %v3083_v8  ;;  %v3362_v43 = vsel %vm1433_vm1, %v7145_v62, 0.0  ;;  %v3107_v37 = vadd.f32 %v6959_v3, %v6983_v32 }
 0x48a   : > { %3481 = vadd.xlane.f32.xlu0 %v3480_v25  ;;  %v3513_v25 = vsel %vm1433_vm1, %v3451_v50, 0.0  ;;  %4768 = vmatpush3.bf16.msra.mxu0 %v4860_v38 }
 0x48b   : > { %v3356_v2 = vsel %vm1433_vm1, %v7156_v54, 0.0  ;;  %v3452_v50 = vmul.f32 %v7156_v54, %v7156_v54 }
 0x48c   : > { %3342 = vadd.xlane.f32.xlu1 %v3341_v20  ;;  %v4750_v20 = vpop.f32.mrf.mxu1 }
 0x48d   : > { %v7139_v17 = vadd.f32 %v4750_v20, %v3094_v61  ;;  %v3099_v20 = vadd.f32 %v6955_v19, %v6983_v32 }
 0x48e   : > { %3339 = vadd.xlane.f32.xlu0 %v3338_v45  ;;  %v3510_v45 = vsel %vm1433_vm1, %v3450_v52, 0.0  ;;  %v3246_v0 = vpop.f32.mrf.mxu1 }
 0x48f   : > { %v7152_v51 = vadd.f32 %v3246_v0, %v3086_v31  ;;  %v3455_v49 = vmul.f32 %v7139_v17, %v7139_v17 }
 0x490   : > { %3336 = vadd.xlane.f32.xlu1 %v3335_v9  ;;  %v3448_v9 = vmul.f32 %v7114_v21, %v7114_v21  ;;  %v4753_v35 = vpop.f32.mrf.mxu1 }
 0x491   : > { %v3525_v15 = vsel %vm1433_vm1, %v3455_v49, 0.0 }
 0x492   : > { %3333 = vadd.xlane.f32.xlu0 %v3332_v11  ;;  %v3507_v11 = vsel %vm1433_vm1, %v3449_v53, 0.0  ;;  %v3504_v24 = vsel %vm1433_vm1, %v3448_v9, 0.0  ;;  %v3259_v23 = vpop.f32.mrf.mxu1  ;;  %v3516_v53 = vsel %vm1433_vm1, %v3452_v50, 0.0 }
 0x493   : > { %v7192_v9 = vadd.f32 %v3259_v23, %v3099_v20 }
 0x494   : > { %3502 = vadd.xlane.f32.xlu1 %v3501_v44  ;;  %v4861_v44 = vld [vmem:[%s7690_s12] sm:$0xff]   ;;  %v4754_v57 = vpop.f32.mrf.mxu1 }
 0x495   : > { %4769 = vmatprep.subr.bf16.mxu0 %v4861_v44  ;;  %v3368_v0 = vsel %vm1433_vm1, %v7192_v9, 0.0 }
 0x496   : > { %3499 = vadd.xlane.f32.xlu0 %v3498_v40  ;;  %v3365_v40 = vsel %vm1433_vm1, %v7139_v17, 0.0  ;;  %4770 = vmatpush3.bf16.msra.mxu0 %v4861_v44  ;;  %v3262_v52 = vpop.f32.mrf.mxu1 }
 0x498   : > { %3496 = vadd.xlane.f32.xlu1 %v3495_v34  ;;  %v3359_v34 = vsel %vm1433_vm1, %v7152_v51, 0.0 }
 0x49a   : > { %3493 = vadd.xlane.f32.xlu0 %v3492_v4  ;;  %v3454_v4 = vmul.f32 %v7145_v62, %v7145_v62 }
 0x49c   : > { %3354 = vadd.xlane.f32.xlu1 %v3353_v56  ;;  %v3453_v56 = vmul.f32 %v7152_v51, %v7152_v51 }
 0x49e   : > { %3351 = vadd.xlane.f32.xlu0 %v3350_v42  ;;  %v3110_v42 = vadd.f32 %v6961_v12, %v6983_v32  ;;  %v3102_v12 = vadd.f32 %v6957_v39, %v6983_v32 }
 0x4a0   : > { %3348 = vadd.xlane.f32.xlu1 %v3347_v5  ;;  %v3522_v5 = vsel %vm1433_vm1, %v3454_v4, 0.0  ;;  %v7178_v38 = vadd.f32 %v4754_v57, %v3110_v42  ;;  %v7188_v61 = vadd.f32 %v3262_v52, %v3102_v12 }
 0x4a2   : > { %3345 = vadd.xlane.f32.xlu0 %v3344_v27  ;;  %v3519_v27 = vsel %vm1433_vm1, %v3453_v56, 0.0  ;;  %v3377_v3 = vsel %vm1433_vm1, %v7178_v38, 0.0  ;;  %v3371_v39 = vsel %vm1433_vm1, %v7188_v61, 0.0  ;;  %v3115_v56 = vadd.f32 %v6963_v48, %v6983_v32 }
 0x4a4   : > { %3514 = vadd.xlane.f32.xlu1 %v3513_v25  ;;  %v7181_v25 = vadd.f32 %v4753_v35, %v3107_v37 }
 0x4a6   : > { %3511 = vadd.xlane.f32.xlu0 %v3510_v45  ;;  %v4757_v45 = vpop.f32.mrf.mxu1  ;;  %v3374_v18 = vsel %vm1433_vm1, %v7181_v25, 0.0  ;;  %v3458_v44 = vmul.f32 %v7181_v25, %v7181_v25 }
 0x4a8   : > { %3508 = vadd.xlane.f32.xlu1 %v3507_v11  ;;  %v3459_v11 = vmul.f32 %v7178_v38, %v7178_v38  ;;  %v3275_v19 = vpop.f32.mrf.mxu1  ;;  %v3534_v35 = vsel %vm1433_vm1, %v3458_v44, 0.0 }
 0x4aa   : > { %3505 = vadd.xlane.f32.xlu0 %v3504_v24  ;;  %v3537_v31 = vsel %vm1433_vm1, %v3459_v11, 0.0  ;;  %v3457_v24 = vmul.f32 %v7188_v61, %v7188_v61  ;;  %v4758_v8 = vpop.f32.mrf.mxu1 }
 0x4ac   : > { %3366 = vadd.xlane.f32.xlu1 %v3365_v40  ;;  %v3126_v40 = vadd.f32 %v6969_v28, %v6983_v32  ;;  %v3531_v23 = vsel %vm1433_vm1, %v3457_v24, 0.0  ;;  %v3118_v28 = vadd.f32 %v6965_v60, %v6983_v32  ;;  %v3131_v24 = vadd.f32 %v6971_v63, %v6983_v32 }
 0x4ae   : > { %3363 = vadd.xlane.f32.xlu0 %v3362_v43  ;;  %v3456_v43 = vmul.f32 %v7192_v9, %v7192_v9  ;;  %v7214_v49 = vadd.f32 %v4758_v8, %v3126_v40 }
 0x4b0   : > { %3360 = vadd.xlane.f32.xlu1 %v3359_v34  ;;  %v3123_v34 = vadd.f32 %v6967_v10, %v6983_v32  ;;  %v3389_v10 = vsel %vm1433_vm1, %v7214_v49, 0.0  ;;  %v3463_v37 = vmul.f32 %v7214_v49, %v7214_v49 }
 0x4b2   : > { %3357 = vadd.xlane.f32.xlu0 %v3356_v2  ;;  %v3278_v2 = vpop.f32.mrf.mxu1  ;;  %v7217_v4 = vadd.f32 %v4757_v45, %v3123_v34  ;;  %v3549_v12 = vsel %vm1433_vm1, %v3463_v37, 0.0 }
 0x4b3   : > { %v7224_v57 = vadd.f32 %v3278_v2, %v3118_v28 }
 0x4b4   : > { %3526 = vadd.xlane.f32.xlu1 %v3525_v15  ;;  %v3528_v15 = vsel %vm1433_vm1, %v3456_v43, 0.0  ;;  %v4761_v42 = vpop.f32.mrf.mxu1  ;;  %v3386_v50 = vsel %vm1433_vm1, %v7217_v4, 0.0  ;;  %v3462_v52 = vmul.f32 %v7217_v4, %v7217_v4 }
 0x4b5   : > { %v3383_v60 = vsel %vm1433_vm1, %v7224_v57, 0.0 }
 0x4b6   : > { %3523 = vadd.xlane.f32.xlu0 %v3522_v5  ;;  %v7228_v5 = vadd.f32 %v3275_v19, %v3115_v56  ;;  %v3291_v48 = vpop.f32.mrf.mxu1  ;;  %v3546_v45 = vsel %vm1433_vm1, %v3462_v52, 0.0 }
 0x4b7   : > { %v7264_v40 = vadd.f32 %v3291_v48, %v3131_v24 }
 0x4b8   : > { %3520 = vadd.xlane.f32.xlu1 %v3519_v27  ;;  %v3380_v27 = vsel %vm1433_vm1, %v7228_v5, 0.0  ;;  %v4762_v20 = vpop.f32.mrf.mxu1 }
 0x4b9   : > { %v3392_v63 = vsel %vm1433_vm1, %v7264_v40, 0.0 }
 0x4ba   : > { %3517 = vadd.xlane.f32.xlu0 %v3516_v53  ;;  %v3461_v53 = vmul.f32 %v7224_v57, %v7224_v57 }
 0x4bc   : > { %3378 = vadd.xlane.f32.xlu1 %v3377_v3  ;;  %v3142_v3 = vadd.f32 %v6985_v30, %v6983_v32  ;;  %v3543_v19 = vsel %vm1433_vm1, %v3461_v53, 0.0  ;;  %v3134_v30 = vadd.f32 %v6973_v7, %v6983_v32 }
 0x4be   : > { %3375 = vadd.xlane.f32.xlu0 %v3374_v18  ;;  %v3460_v18 = vmul.f32 %v7228_v5, %v7228_v5  ;;  %v7250_v11 = vadd.f32 %v4762_v20, %v3142_v3 }
 0x4c0   : > { %3372 = vadd.xlane.f32.xlu1 %v3371_v39  ;;  %v3139_v39 = vadd.f32 %v6978_v13, %v6983_v32  ;;  %v3401_v13 = vsel %vm1433_vm1, %v7250_v11, 0.0  ;;  %v3464_v32 = vmul.f32 %v7264_v40, %v7264_v40 }
 0x4c2   : > { %3369 = vadd.xlane.f32.xlu0 %v3368_v0  ;;  %v3294_v0 = vpop.f32.mrf.mxu1  ;;  %v7253_v44 = vadd.f32 %v4761_v42, %v3139_v39  ;;  %v3552_v2 = vsel %vm1433_vm1, %v3464_v32, 0.0 }
 0x4c3   : > { %v7260_v8 = vadd.f32 %v3294_v0, %v3134_v30 }
 0x4c4   : > { %3538 = vadd.xlane.f32.xlu1 %v3537_v31  ;;  %v3540_v31 = vsel %vm1433_vm1, %v3460_v18, 0.0  ;;  %v3466_v28 = vmul.f32 %v7253_v44, %v7253_v44 }
 0x4c5   : > { %v3395_v7 = vsel %vm1433_vm1, %v7260_v8, 0.0  ;;  %v3465_v43 = vmul.f32 %v7260_v8, %v7260_v8 }
 0x4c6   : > { %3535 = vadd.xlane.f32.xlu0 %v3534_v35  ;;  %v3398_v35 = vsel %vm1433_vm1, %v7253_v44, 0.0  ;;  %v3558_v56 = vsel %vm1433_vm1, %v3466_v28, 0.0 }
 0x4c7   : > { %v3555_v34 = vsel %vm1433_vm1, %v3465_v43, 0.0 }
 0x4c8   : > { %3532 = vadd.xlane.f32.xlu1 %v3531_v23  ;;  %v3467_v23 = vmul.f32 %v7250_v11, %v7250_v11 }
 0x4ca   : > { %3529 = vadd.xlane.f32.xlu0 %v3528_v15  ;;  %v3561_v15 = vsel %vm1433_vm1, %v3467_v23, 0.0 }
 0x4cc   : > { %3390 = vadd.xlane.f32.xlu1 %v3389_v10 }
 0x4ce   : > { %3387 = vadd.xlane.f32.xlu0 %v3386_v50 }
 0x4d0   : > { %3384 = vadd.xlane.f32.xlu1 %v3383_v60 }
 0x4d2   : > { %3381 = vadd.xlane.f32.xlu0 %v3380_v27 }
 0x4d4   : > { %3550 = vadd.xlane.f32.xlu1 %v3549_v12 }
 0x4d6   : > { %3547 = vadd.xlane.f32.xlu0 %v3546_v45 }
 0x4d8   : > { %3544 = vadd.xlane.f32.xlu1 %v3543_v19 }
 0x4da   : > { %3541 = vadd.xlane.f32.xlu0 %v3540_v31 }
 0x4dc   : > { %3402 = vadd.xlane.f32.xlu1 %v3401_v13 }
 0x4de   : > { %3399 = vadd.xlane.f32.xlu0 %v3398_v35 }
 0x4e0   : > { %3396 = vadd.xlane.f32.xlu1 %v3395_v7 }
 0x4e2   : > { %3393 = vadd.xlane.f32.xlu0 %v3392_v63 }
 0x4e4   : > { %3556 = vadd.xlane.f32.xlu1 %v3555_v34 }
 0x4e6   : > { %3553 = vadd.xlane.f32.xlu0 %v3552_v2 }
 0x4e8   : > { %3562 = vadd.xlane.f32.xlu1 %v3561_v15 }
 0x4ea   : > { %3559 = vadd.xlane.f32.xlu0 %v3558_v56 }
 0x4f3   : > { %v3316_v10 = vpop.xlane.xlu0 %3315 }
 0x4f4   : > { %v3406_v50 = vmul.f32 0.015625, %v3316_v10 }
 0x4f6   : > { %v3598_v48 = vmul.f32 %v3406_v50, %v3406_v50 }
 0x4f7   : > { %v3310_v42 = vpop.xlane.xlu0 %3309 }
 0x4f8   : > { %v7286_v3 = vmul.f32 0.015625, %v3310_v42 }
 0x4f9   : > { %v3313_v60 = vpop.xlane.xlu1 %3312 }
 0x4fa   : > { %v7284_v52 = vmul.f32 0.015625, %v3313_v60  ;;  %v3596_v35 = vmul.f32 %v7286_v3, %v7286_v3 }
 0x4fb   : > { %v3476_v37 = vpop.xlane.xlu0 %3475 }
 0x4fc   : > { %v3566_v27 = vmul.f32 0.015625, %v3476_v37  ;;  %v3597_v39 = vmul.f32 %v7284_v52, %v7284_v52 }
 0x4fd   : > { %v3479_v12 = vpop.xlane.xlu1 %3478 }
 0x4fe   : > { %v3630_v53 = vsub.f32 %v3566_v27, %v3598_v48  ;;  %v3567_v30 = vmul.f32 0.015625, %v3479_v12 }
 0x4ff   : > { %v3319_v20 = vpop.xlane.xlu0 %3318 }
 0x500   : > { %v3662_v45 = vmax.f32 %v3630_v53, 0.0  ;;  %v7288_v18 = vmul.f32 0.015625, %v3319_v20 }
 0x501   : > { %v3473_v19 = vpop.xlane.xlu1 %3472 }
 0x502   : > { %v3726_v0 = vadd.f32 1e-05, %v3662_v45  ;;  %v3599_v31 = vmul.f32 %v7288_v18, %v7288_v18  ;;  %v3565_v24 = vmul.f32 0.015625, %v3473_v19 }
 0x503   : > { %v3470_v13 = vpop.xlane.xlu0 %3469 }
 0x504   : > { %v3631_v7 = vsub.f32 %v3567_v30, %v3599_v31  ;;  %v3629_v43 = vsub.f32 %v3565_v24, %v3597_v39  ;;  %v3564_v63 = vmul.f32 0.015625, %v3470_v13  ;;  %4998 = vrsqrt.f32 %v3726_v0 }
 0x505   : > { %v3331_v32 = vpop.xlane.xlu1 %3330 }
 0x506   : > { %v3663_v34 = vmax.f32 %v3631_v7, 0.0  ;;  %v3661_v23 = vmax.f32 %v3629_v43, 0.0  ;;  %v3628_v2 = vsub.f32 %v3564_v63, %v3596_v35  ;;  %v7296_v37 = vmul.f32 0.015625, %v3331_v32 }
 0x507   : > { %v3328_v28 = vpop.xlane.xlu0 %3327  ;;  %v3694_v32 = vsub.f32 %v6989_v26, %v3406_v50 }
 0x508   : > { %v3727_v15 = vadd.f32 1e-05, %v3663_v34  ;;  %v3725_v56 = vadd.f32 1e-05, %v3661_v23  ;;  %v3660_v10 = vmax.f32 %v3628_v2, 0.0  ;;  %v7298_v27 = vmul.f32 0.015625, %v3328_v28 }
 0x509   : > { %v3325_v42 = vpop.xlane.xlu1 %3324  ;;  %v3603_v53 = vmul.f32 %v7296_v37, %v7296_v37 }
 0x50a   : > { %5000 = vrsqrt.f32 %v3727_v15  ;;  %v3724_v60 = vadd.f32 1e-05, %v3660_v10  ;;  %v7302_v20 = vmul.f32 0.015625, %v3325_v42  ;;  %v3602_v19 = vmul.f32 %v7298_v27, %v7298_v27 }
 0x50b   : > { %5002 = vrsqrt.f32 %v3725_v56  ;;  %v3322_v48 = vpop.xlane.xlu0 %3321 }
 0x50c   : > { %5004 = vrsqrt.f32 %v3724_v60  ;;  %v7306_v31 = vmul.f32 0.015625, %v3322_v48  ;;  %v3601_v35 = vmul.f32 %v7302_v20, %v7302_v20  ;;  %v7316_v60 = vld [vmem:[%s7688_s10] ss:$0 sm:$0xff]  ;;  %v3695_v48 = vsub.f32 %v6999_v58, %v7288_v18 }
 0x50d   : > { %v3491_v12 = vpop.xlane.xlu1 %3490 }
 0x50e   : > { %v3571_v45 = vmul.f32 0.015625, %v3491_v12  ;;  %v3600_v56 = vmul.f32 %v7306_v31, %v7306_v31 }
 0x50f   : > { %v3488_v39 = vpop.xlane.xlu0 %3487 }
 0x510   : > { %v3635_v0 = vsub.f32 %v3571_v45, %v3603_v53  ;;  %v3570_v30 = vmul.f32 0.015625, %v3488_v39 }
 0x511   : > { %v3485_v24 = vpop.xlane.xlu1 %3484  ;;  %v4999_v13 = vpop.eup %4998 }
 0x512   : > { %v3667_v7 = vmax.f32 %v3635_v0, 0.0  ;;  %v3634_v43 = vsub.f32 %v3570_v30, %v3602_v19  ;;  %v3569_v63 = vmul.f32 0.015625, %v3485_v24  ;;  %v3790_v15 = vmul.f32 %v4999_v13, %v3694_v32 }
 0x513   : > { %v3482_v34 = vpop.xlane.xlu0 %3481  ;;  %v3692_v19 = vsub.f32 %v6993_v6, %v7286_v3  ;;  %v3693_v13 = vsub.f32 %v7003_v46, %v7284_v52 }
 0x514   : > { %v3731_v23 = vadd.f32 1e-05, %v3667_v7  ;;  %v3666_v2 = vmax.f32 %v3634_v43, 0.0  ;;  %v3633_v28 = vsub.f32 %v3569_v63, %v3601_v35  ;;  %v3568_v10 = vmul.f32 0.015625, %v3482_v34  ;;  %v7328_v7 = vld [vmem:[%s7689_s11] ss:$0 sm:$0xff] }
 0x515   : > { %v3343_v42 = vpop.xlane.xlu1 %3342  ;;  %v3828_v35 = vmul.f32 %v7316_v60, %v3790_v15 }
 0x516   : > { %5006 = vrsqrt.f32 %v3731_v23  ;;  %v3730_v26 = vadd.f32 1e-05, %v3666_v2  ;;  %v3665_v50 = vmax.f32 %v3633_v28, 0.0  ;;  %v3632_v53 = vsub.f32 %v3568_v10, %v3600_v56 }
 0x517   : > { %v5001_v12 = vpop.eup %5000  ;;  %v3340_v45 = vpop.xlane.xlu0 %3339  ;;  %v7331_v6 = vmul.f32 0.015625, %v3343_v42  ;;  %v3866_v23 = vadd.f32 %v7328_v7, %v3828_v35 }
 0x518   : > { %v5003_v39 = vpop.eup %5002  ;;  %v3791_v0 = vmul.f32 %v5001_v12, %v3695_v48  ;;  %5008 = vrsqrt.f32 %v3730_v26  ;;  %v3729_v30 = vadd.f32 1e-05, %v3665_v50  ;;  %v3664_v58 = vmax.f32 %v3632_v53, 0.0 }
 0x519   : > { %v5005_v24 = vpop.eup %5004  ;;  %v3337_v18 = vpop.xlane.xlu1 %3336  ;;  %v3789_v34 = vmul.f32 %v5003_v39, %v3693_v13  ;;  %v7334_v52 = vmul.f32 0.015625, %v3340_v45  ;;  %v3607_v56 = vmul.f32 %v7331_v6, %v7331_v6 }
 0x51a   : > { %v3829_v43 = vmul.f32 %v7316_v60, %v3791_v0  ;;  %5010 = vrsqrt.f32 %v3729_v30  ;;  %v3788_v3 = vmul.f32 %v5005_v24, %v3692_v19  ;;  %v3728_v63 = vadd.f32 1e-05, %v3664_v58 }
 0x51b   : > { %v3334_v32 = vpop.xlane.xlu0 %3333  ;;  %v3827_v15 = vmul.f32 %v7316_v60, %v3789_v34  ;;  %v7341_v10 = vmul.f32 0.015625, %v3337_v18  ;;  %v3606_v45 = vmul.f32 %v7334_v52, %v7334_v52  ;;  %v3898_v0 = vmax.f32 %v3866_v23, 0.0 }
 0x51c   : > { %v3867_v46 = vadd.f32 %v7328_v7, %v3829_v43  ;;  %5012 = vrsqrt.f32 %v3728_v63  ;;  %v3826_v28 = vmul.f32 %v7316_v60, %v3788_v3  ;;  %v7343_v26 = vmul.f32 0.015625, %v3334_v32 }
 0x51d   : > { %v3503_v2 = vpop.xlane.xlu1 %3502  ;;  %v3865_v53 = vadd.f32 %v7328_v7, %v3827_v15  ;;  %v3605_v35 = vmul.f32 %v7341_v10, %v7341_v10  ;;  %v3699_v32 = vsub.f32 %v7028_v55, %v7296_v37 }
 0x51e   : > { %v3575_v42 = vmul.f32 0.015625, %v3503_v2  ;;  %v3899_v48 = vmax.f32 %v3867_v46, 0.0  ;;  %v3864_v12 = vadd.f32 %v7328_v7, %v3826_v28  ;;  %v3604_v34 = vmul.f32 %v7343_v26, %v7343_v26 }
 0x51f   : > { %v3500_v50 = vpop.xlane.xlu0 %3499  ;;  %v3897_v13 = vmax.f32 %v3865_v53, 0.0 }
 0x520   : > { %v3639_v39 = vsub.f32 %v3575_v42, %v3607_v56  ;;  %v3574_v19 = vmul.f32 0.015625, %v3500_v50  ;;  %v3896_v24 = vmax.f32 %v3864_v12, 0.0  ;;  %v3929_v63 = vpack.c.bf16 %v3899_v48, %v3898_v0 }
 0x521   : > { %v3497_v30 = vpop.xlane.xlu1 %3496  ;;  %v3698_v50 = vsub.f32 %v7031_v29, %v7298_v27  ;;  %v3696_v29 = vsub.f32 %v7042_v22, %v7306_v31 }
 0x522   : > { %v3671_v58 = vmax.f32 %v3639_v39, 0.0  ;;  %v3638_v18 = vsub.f32 %v3574_v19, %v3606_v45  ;;  %v3573_v43 = vmul.f32 0.015625, %v3497_v30  ;;  %v3928_v2 = vpack.c.bf16 %v3897_v13, %v3896_v24 }
 0x523   : > { %v5007_v3 = vpop.eup %5006  ;;  %v3494_v46 = vpop.xlane.xlu0 %3493  ;;  %v3697_v39 = vsub.f32 %v7038_v14, %v7302_v20 }
 0x524   : > { %v3735_v23 = vadd.f32 1e-05, %v3671_v58  ;;  %v3670_v28 = vmax.f32 %v3638_v18, 0.0  ;;  %v3637_v15 = vsub.f32 %v3573_v43, %v3605_v35  ;;  %v3572_v56 = vmul.f32 0.015625, %v3494_v46  ;;  %4771 = vmatprep.mubr.msk.bf16.mxu0 %vm1433_vm1, %v3928_v2 }
 0x525   : > { %v5009_v42 = vpop.eup %5008  ;;  %v3355_v12 = vpop.xlane.xlu1 %3354  ;;  %v3795_v48 = vmul.f32 %v5007_v3, %v3699_v32  ;;  %4772 = vmatmul.mubr.msk.bf16.vlgmr.msra.gmra.mxu0 %vm1433_vm1, %v3929_v63 }
 0x526   : > { %5014 = vrsqrt.f32 %v3735_v23  ;;  %v3734_v53 = vadd.f32 1e-05, %v3670_v28  ;;  %v3669_v55 = vmax.f32 %v3637_v15, 0.0  ;;  %v3636_v37 = vsub.f32 %v3572_v56, %v3604_v34 }
 0x527   : > { %v5011_v45 = vpop.eup %5010  ;;  %v3352_v19 = vpop.xlane.xlu0 %3351  ;;  %v3794_v0 = vmul.f32 %v5009_v42, %v3698_v50  ;;  %v3833_v58 = vmul.f32 %v7316_v60, %v3795_v48  ;;  %v7365_v3 = vmul.f32 0.015625, %v3355_v12 }
 0x528   : > { %5016 = vrsqrt.f32 %v3734_v53  ;;  %v3733_v30 = vadd.f32 1e-05, %v3669_v55  ;;  %v3668_v24 = vmax.f32 %v3636_v37, 0.0  ;;  %v3793_v13 = vmul.f32 %v5011_v45, %v3697_v39 }
 0x529   : > { %v3349_v27 = vpop.xlane.xlu1 %3348  ;;  %v3832_v35 = vmul.f32 %v7316_v60, %v3794_v0  ;;  %v5013_v18 = vpop.eup %5012  ;;  %v7369_v34 = vmul.f32 0.015625, %v3352_v19  ;;  %v3871_v2 = vadd.f32 %v7328_v7, %v3833_v58  ;;  %v3611_v23 = vmul.f32 %v7365_v3, %v7365_v3 }
 0x52a   : > { %5018 = vrsqrt.f32 %v3733_v30  ;;  %v3732_v43 = vadd.f32 1e-05, %v3668_v24  ;;  %v3792_v20 = vmul.f32 %v5013_v18, %v3696_v29  ;;  %v3831_v63 = vmul.f32 %v7316_v60, %v3793_v13 }
 0x52b   : > { %v3346_v14 = vpop.xlane.xlu0 %3345  ;;  %v3870_v32 = vadd.f32 %v7328_v7, %v3832_v35  ;;  %v7376_v28 = vmul.f32 0.015625, %v3349_v27  ;;  %v3610_v48 = vmul.f32 %v7369_v34, %v7369_v34  ;;  %v3903_v19 = vmax.f32 %v3871_v2, 0.0 }
 0x52c   : > { %5020 = vrsqrt.f32 %v3732_v43  ;;  %v3830_v31 = vmul.f32 %v7316_v60, %v3792_v20  ;;  %v3869_v46 = vadd.f32 %v7328_v7, %v3831_v63  ;;  %v7378_v56 = vmul.f32 0.015625, %v3346_v14 }
 0x52d   : > { %v3515_v22 = vpop.xlane.xlu1 %3514  ;;  %v3902_v12 = vmax.f32 %v3870_v32, 0.0  ;;  %v3609_v0 = vmul.f32 %v7376_v28, %v7376_v28  ;;  %v3703_v13 = vsub.f32 %v7064_v33, %v7331_v6 }
 0x52e   : > { %v3579_v15 = vmul.f32 0.015625, %v3515_v22  ;;  %v3868_v50 = vadd.f32 %v7328_v7, %v3830_v31  ;;  %v3901_v39 = vmax.f32 %v3869_v46, 0.0  ;;  %v3608_v35 = vmul.f32 %v7378_v56, %v7378_v56 }
 0x52f   : > { %v3512_v42 = vpop.xlane.xlu0 %3511  ;;  %v3931_v43 = vpack.c.bf16 %v3903_v19, %v3902_v12  ;;  %v3702_v31 = vsub.f32 %v7067_v59, %v7334_v52  ;;  %v3700_v52 = vsub.f32 %v7078_v1, %v7343_v26 }
 0x530   : > { %v3643_v53 = vsub.f32 %v3579_v15, %v3611_v23  ;;  %v3578_v55 = vmul.f32 0.015625, %v3512_v42  ;;  %v3900_v45 = vmax.f32 %v3868_v50, 0.0  ;;  %v3701_v42 = vsub.f32 %v7074_v16, %v7341_v10 }
 0x531   : > { %v3509_v37 = vpop.xlane.xlu1 %3508 }
 0x532   : > { %v3675_v30 = vmax.f32 %v3643_v53, 0.0  ;;  %v3642_v24 = vsub.f32 %v3578_v55, %v3610_v48  ;;  %v3577_v29 = vmul.f32 0.015625, %v3509_v37  ;;  %v3930_v18 = vpack.c.bf16 %v3901_v39, %v3900_v45 }
 0x533   : > { %v5015_v27 = vpop.eup %5014  ;;  %v3506_v58 = vpop.xlane.xlu0 %3505 }
 0x534   : > { %v3739_v14 = vadd.f32 1e-05, %v3675_v30  ;;  %v3674_v20 = vmax.f32 %v3642_v24, 0.0  ;;  %v3641_v63 = vsub.f32 %v3577_v29, %v3609_v0  ;;  %v3576_v32 = vmul.f32 0.015625, %v3506_v58  ;;  %4775 = vmatprep.mubr.msk.bf16.mxu0 %vm1433_vm1, %v3930_v18 }
 0x535   : > { %v5017_v22 = vpop.eup %5016  ;;  %v3367_v46 = vpop.xlane.xlu1 %3366  ;;  %v3799_v2 = vmul.f32 %v5015_v27, %v3703_v13  ;;  %4776 = vmatmul.mubr.msk.bf16.gmra.mxu0 %vm1433_vm1, %v3931_v43 }
 0x536   : > { %5022 = vrsqrt.f32 %v3739_v14  ;;  %v3738_v33 = vadd.f32 1e-05, %v3674_v20  ;;  %v3673_v6 = vmax.f32 %v3641_v63, 0.0  ;;  %v3640_v23 = vsub.f32 %v3576_v32, %v3608_v35 }
 0x537   : > { %v5019_v15 = vpop.eup %5018  ;;  %v3364_v50 = vpop.xlane.xlu0 %3363  ;;  %v3798_v12 = vmul.f32 %v5017_v22, %v3702_v31  ;;  %v3837_v39 = vmul.f32 %v7316_v60, %v3799_v2  ;;  %v7399_v0 = vmul.f32 0.015625, %v3367_v46 }
 0x538   : > { %5024 = vrsqrt.f32 %v3738_v33  ;;  %v3737_v48 = vadd.f32 1e-05, %v3673_v6  ;;  %v3672_v53 = vmax.f32 %v3640_v23, 0.0  ;;  %v3797_v37 = vmul.f32 %v5019_v15, %v3701_v42 }
 0x539   : > { %v5021_v59 = vpop.eup %5020  ;;  %v3361_v55 = vpop.xlane.xlu1 %3360  ;;  %v3836_v45 = vmul.f32 %v7316_v60, %v3798_v12  ;;  %v7403_v29 = vmul.f32 0.015625, %v3364_v50  ;;  %v3875_v13 = vadd.f32 %v7328_v7, %v3837_v39  ;;  %v3615_v35 = vmul.f32 %v7399_v0, %v7399_v0 }
 0x53a   : > { %5026 = vrsqrt.f32 %v3737_v48  ;;  %v3736_v19 = vadd.f32 1e-05, %v3672_v53  ;;  %v3796_v10 = vmul.f32 %v5021_v59, %v3700_v52  ;;  %v3835_v30 = vmul.f32 %v7316_v60, %v3797_v37 }
 0x53b   : > { %v3358_v16 = vpop.xlane.xlu0 %3357  ;;  %v3874_v24 = vadd.f32 %v7328_v7, %v3836_v45  ;;  %v7410_v58 = vmul.f32 0.015625, %v3361_v55  ;;  %v3614_v32 = vmul.f32 %v7403_v29, %v7403_v29  ;;  %v3907_v6 = vmax.f32 %v3875_v13, 0.0 }
 0x53c   : > { %5028 = vrsqrt.f32 %v3736_v19  ;;  %v3834_v26 = vmul.f32 %v7316_v60, %v3796_v10  ;;  %v3873_v27 = vadd.f32 %v7328_v7, %v3835_v30  ;;  %v7412_v43 = vmul.f32 0.015625, %v3358_v16 }
 0x53d   : > { %v3527_v1 = vpop.xlane.xlu1 %3526  ;;  %v3906_v63 = vmax.f32 %v3874_v24, 0.0  ;;  %v3613_v23 = vmul.f32 %v7410_v58, %v7410_v58  ;;  %v3707_v48 = vsub.f32 %v7100_v41, %v7365_v3  ;;  %v3706_v10 = vsub.f32 %v7103_v36, %v7369_v34 }
 0x53e   : > { %v3583_v18 = vmul.f32 0.015625, %v3527_v1  ;;  %v3872_v20 = vadd.f32 %v7328_v7, %v3834_v26  ;;  %v3905_v33 = vmax.f32 %v3873_v27, 0.0  ;;  %v3612_v53 = vmul.f32 %v7412_v43, %v7412_v43 }
 0x53f   : > { %v3524_v14 = vpop.xlane.xlu0 %3523  ;;  %v3933_v55 = vpack.c.bf16 %v3907_v6, %v3906_v63  ;;  %v3705_v27 = vsub.f32 %v7110_v47, %v7376_v28  ;;  %v3704_v34 = vsub.f32 %v7114_v21, %v7378_v56 }
 0x540   : > { %v3647_v22 = vsub.f32 %v3583_v18, %v3615_v35  ;;  %v3582_v31 = vmul.f32 0.015625, %v3524_v14  ;;  %v3904_v2 = vmax.f32 %v3872_v20, 0.0 }
 0x541   : > { %v3521_v46 = vpop.xlane.xlu1 %3520 }
 0x542   : > { %v3679_v15 = vmax.f32 %v3647_v22, 0.0  ;;  %v3646_v42 = vsub.f32 %v3582_v31, %v3614_v32  ;;  %v3581_v50 = vmul.f32 0.015625, %v3521_v46  ;;  %v3932_v52 = vpack.c.bf16 %v3905_v33, %v3904_v2 }
 0x543   : > { %v5023_v12 = vpop.eup %5022  ;;  %v3518_v59 = vpop.xlane.xlu0 %3517 }
 0x544   : > { %v3743_v37 = vadd.f32 1e-05, %v3679_v15  ;;  %v3678_v45 = vmax.f32 %v3646_v42, 0.0  ;;  %v3645_v39 = vsub.f32 %v3581_v50, %v3613_v23  ;;  %v3580_v19 = vmul.f32 0.015625, %v3518_v59  ;;  %4779 = vmatprep.mubr.msk.bf16.mxu0 %vm1433_vm1, %v3932_v52 }
 0x545   : > { %v5025_v16 = vpop.eup %5024  ;;  %v3379_v30 = vpop.xlane.xlu1 %3378  ;;  %v3803_v24 = vmul.f32 %v5023_v12, %v3707_v48  ;;  %4780 = vmatmul.mubr.msk.bf16.gmra.mxu0 %vm1433_vm1, %v3933_v55 }
 0x546   : > { %5030 = vrsqrt.f32 %v3743_v37  ;;  %v3742_v41 = vadd.f32 1e-05, %v3678_v45  ;;  %v3677_v3 = vmax.f32 %v3645_v39, 0.0  ;;  %v3644_v1 = vsub.f32 %v3580_v19, %v3612_v53 }
 0x547   : > { %v5027_v26 = vpop.eup %5026  ;;  %v3376_v13 = vpop.xlane.xlu0 %3375  ;;  %v3802_v35 = vmul.f32 %v5025_v16, %v3706_v10  ;;  %v3841_v22 = vmul.f32 %v7316_v60, %v3803_v24  ;;  %v7433_v46 = vmul.f32 0.015625, %v3379_v30 }
 0x548   : > { %5032 = vrsqrt.f32 %v3742_v41  ;;  %v3741_v18 = vadd.f32 1e-05, %v3677_v3  ;;  %v3676_v14 = vmax.f32 %v3644_v1, 0.0  ;;  %v3801_v63 = vmul.f32 %v5027_v26, %v3705_v27 }
 0x549   : > { %v5029_v36 = vpop.eup %5028  ;;  %v3373_v20 = vpop.xlane.xlu1 %3372  ;;  %v3840_v32 = vmul.f32 %v7316_v60, %v3802_v35  ;;  %v7437_v6 = vmul.f32 0.015625, %v3376_v13  ;;  %v3879_v15 = vadd.f32 %v7328_v7, %v3841_v22  ;;  %v3619_v42 = vmul.f32 %v7433_v46, %v7433_v46 }
 0x54a   : > { %5034 = vrsqrt.f32 %v3741_v18  ;;  %v3740_v31 = vadd.f32 1e-05, %v3676_v14  ;;  %v3800_v28 = vmul.f32 %v5029_v36, %v3704_v34  ;;  %v3839_v2 = vmul.f32 %v7316_v60, %v3801_v63 }
 0x54b   : > { %v3370_v47 = vpop.xlane.xlu0 %3369  ;;  %v3878_v33 = vadd.f32 %v7328_v7, %v3840_v32  ;;  %v7444_v50 = vmul.f32 0.015625, %v3373_v20  ;;  %v3618_v55 = vmul.f32 %v7437_v6, %v7437_v6  ;;  %v3911_v10 = vmax.f32 %v3879_v15, 0.0 }
 0x54c   : > { %5036 = vrsqrt.f32 %v3740_v31  ;;  %v3838_v56 = vmul.f32 %v7316_v60, %v3800_v28  ;;  %v3877_v23 = vadd.f32 %v7328_v7, %v3839_v2  ;;  %v7446_v48 = vmul.f32 0.015625, %v3370_v47 }
 0x54d   : > { %v3539_v21 = vpop.xlane.xlu1 %3538  ;;  %v3910_v52 = vmax.f32 %v3878_v33, 0.0  ;;  %v3617_v30 = vmul.f32 %v7444_v50, %v7444_v50  ;;  %v3711_v26 = vsub.f32 %v7139_v17, %v7399_v0  ;;  %v3710_v32 = vsub.f32 %v7145_v62, %v7403_v29 }
 0x54e   : > { %v3587_v12 = vmul.f32 0.015625, %v3539_v21  ;;  %v3876_v59 = vadd.f32 %v7328_v7, %v3838_v56  ;;  %v3909_v16 = vmax.f32 %v3877_v23, 0.0  ;;  %v3616_v27 = vmul.f32 %v7446_v48, %v7446_v48 }
 0x54f   : > { %v3536_v53 = vpop.xlane.xlu0 %3535  ;;  %v3935_v18 = vpack.c.bf16 %v3911_v10, %v3910_v52  ;;  %v3709_v2 = vsub.f32 %v7152_v51, %v7410_v58  ;;  %v3708_v29 = vsub.f32 %v7156_v54, %v7412_v43 }
 0x550   : > { %v3651_v37 = vsub.f32 %v3587_v12, %v3619_v42  ;;  %v3586_v45 = vmul.f32 0.015625, %v3536_v53  ;;  %v3908_v19 = vmax.f32 %v3876_v59, 0.0 }
 0x551   : > { %v3533_v39 = vpop.xlane.xlu1 %3532 }
 0x552   : > { %v3683_v24 = vmax.f32 %v3651_v37, 0.0  ;;  %v3650_v41 = vsub.f32 %v3586_v45, %v3618_v55  ;;  %v3585_v3 = vmul.f32 0.015625, %v3533_v39  ;;  %v3934_v35 = vpack.c.bf16 %v3909_v16, %v3908_v19 }
 0x553   : > { %v5031_v1 = vpop.eup %5030  ;;  %v3530_v13 = vpop.xlane.xlu0 %3529 }
 0x554   : > { %v3747_v14 = vadd.f32 1e-05, %v3683_v24  ;;  %v3682_v36 = vmax.f32 %v3650_v41, 0.0  ;;  %v3649_v34 = vsub.f32 %v3585_v3, %v3617_v30  ;;  %v3584_v20 = vmul.f32 0.015625, %v3530_v13  ;;  %4783 = vmatprep.mubr.msk.bf16.mxu0 %vm1433_vm1, %v3934_v35 }
 0x555   : > { %v5033_v63 = vpop.eup %5032  ;;  %v3391_v22 = vpop.xlane.xlu1 %3390  ;;  %v3807_v31 = vmul.f32 %v5031_v1, %v3711_v26  ;;  %4784 = vmatmul.mubr.msk.bf16.gmra.mxu0 %vm1433_vm1, %v3935_v18 }
 0x556   : > { %5038 = vrsqrt.f32 %v3747_v14  ;;  %v3746_v17 = vadd.f32 1e-05, %v3682_v36  ;;  %v3681_v0 = vmax.f32 %v3649_v34, 0.0  ;;  %v3648_v47 = vsub.f32 %v3584_v20, %v3616_v27 }
 0x557   : > { %v5035_v28 = vpop.eup %5034  ;;  %v3388_v33 = vpop.xlane.xlu0 %3387  ;;  %v3806_v21 = vmul.f32 %v5033_v63, %v3710_v32  ;;  %v3845_v53 = vmul.f32 %v7316_v60, %v3807_v31  ;;  %v7467_v52 = vmul.f32 0.015625, %v3391_v22  ;;  %v3715_v31 = vsub.f32 %v7178_v38, %v7433_v46 }
 0x558   : > { %5040 = vrsqrt.f32 %v3746_v17  ;;  %v3745_v56 = vadd.f32 1e-05, %v3681_v0  ;;  %v3680_v23 = vmax.f32 %v3648_v47, 0.0  ;;  %v3805_v42 = vmul.f32 %v5035_v28, %v3709_v2 }
 0x559   : > { %v5037_v62 = vpop.eup %5036  ;;  %v3385_v15 = vpop.xlane.xlu1 %3384  ;;  %v3844_v12 = vmul.f32 %v7316_v60, %v3806_v21  ;;  %v7471_v45 = vmul.f32 0.015625, %v3388_v33  ;;  %v3883_v19 = vadd.f32 %v7328_v7, %v3845_v53  ;;  %v3623_v16 = vmul.f32 %v7467_v52, %v7467_v52 }
 0x55a   : > { %5042 = vrsqrt.f32 %v3745_v56  ;;  %v3744_v59 = vadd.f32 1e-05, %v3680_v23  ;;  %v3804_v58 = vmul.f32 %v5037_v62, %v3708_v29  ;;  %v3843_v55 = vmul.f32 %v7316_v60, %v3805_v42 }
 0x55b   : > { %v3382_v51 = vpop.xlane.xlu0 %3381  ;;  %v3882_v37 = vadd.f32 %v7328_v7, %v3844_v12  ;;  %v7478_v10 = vmul.f32 0.015625, %v3385_v15  ;;  %v3622_v26 = vmul.f32 %v7471_v45, %v7471_v45  ;;  %v3915_v36 = vmax.f32 %v3883_v19, 0.0 }
 0x55c   : > { %5044 = vrsqrt.f32 %v3744_v59  ;;  %v3842_v43 = vmul.f32 %v7316_v60, %v3804_v58  ;;  %v3881_v39 = vadd.f32 %v7328_v7, %v3843_v55  ;;  %v7480_v24 = vmul.f32 0.015625, %v3382_v51 }
 0x55d   : > { %v3551_v54 = vpop.xlane.xlu1 %3550  ;;  %v3914_v1 = vmax.f32 %v3882_v37, 0.0  ;;  %v3621_v34 = vmul.f32 %v7478_v10, %v7478_v10  ;;  %v3714_v62 = vsub.f32 %v7181_v25, %v7437_v6  ;;  %v3713_v53 = vsub.f32 %v7188_v61, %v7444_v50 }
 0x55e   : > { %v3591_v30 = vmul.f32 0.015625, %v3551_v54  ;;  %v3880_v3 = vadd.f32 %v7328_v7, %v3842_v43  ;;  %v3913_v14 = vmax.f32 %v3881_v39, 0.0  ;;  %v3620_v17 = vmul.f32 %v7480_v24, %v7480_v24 }
 0x55f   : > { %v3548_v41 = vpop.xlane.xlu0 %3547  ;;  %v3937_v28 = vpack.c.bf16 %v3915_v36, %v3914_v1  ;;  %v3712_v6 = vsub.f32 %v7192_v9, %v7446_v48 }
 0x560   : > { %v3655_v27 = vsub.f32 %v3591_v30, %v3623_v16  ;;  %v3590_v13 = vmul.f32 0.015625, %v3548_v41  ;;  %v3912_v18 = vmax.f32 %v3880_v3, 0.0 }
 0x561   : > { %v3545_v35 = vpop.xlane.xlu1 %3544 }
 0x562   : > { %v3687_v20 = vmax.f32 %v3655_v27, 0.0  ;;  %v3654_v63 = vsub.f32 %v3590_v13, %v3622_v26  ;;  %v3589_v32 = vmul.f32 0.015625, %v3545_v35  ;;  %v3936_v47 = vpack.c.bf16 %v3913_v14, %v3912_v18 }
 0x563   : > { %v5039_v22 = vpop.eup %5038  ;;  %v3542_v0 = vpop.xlane.xlu0 %3541 }
 0x564   : > { %v3751_v2 = vadd.f32 1e-05, %v3687_v20  ;;  %v3686_v33 = vmax.f32 %v3654_v63, 0.0  ;;  %v3653_v21 = vsub.f32 %v3589_v32, %v3621_v34  ;;  %v3588_v56 = vmul.f32 0.015625, %v3542_v0  ;;  %4787 = vmatprep.mubr.msk.bf16.mxu0 %vm1433_vm1, %v3936_v47 }
 0x565   : > { %v5041_v23 = vpop.eup %5040  ;;  %v3403_v29 = vpop.xlane.xlu1 %3402  ;;  %v3811_v15 = vmul.f32 %v5039_v22, %v3715_v31  ;;  %4788 = vmatmul.mubr.msk.bf16.gmra.mxu0 %vm1433_vm1, %v3937_v28 }
 0x566   : > { %5046 = vrsqrt.f32 %v3751_v2  ;;  %v3750_v38 = vadd.f32 1e-05, %v3686_v33  ;;  %v3685_v46 = vmax.f32 %v3653_v21, 0.0  ;;  %v3652_v42 = vsub.f32 %v3588_v56, %v3620_v17 }
 0x567   : > { %v5043_v12 = vpop.eup %5042  ;;  %v3400_v59 = vpop.xlane.xlu0 %3399  ;;  %v3810_v51 = vmul.f32 %v5041_v23, %v3714_v62  ;;  %v3849_v39 = vmul.f32 %v7316_v60, %v3811_v15  ;;  %v7510_v27 = vmul.f32 0.015625, %v3403_v29  ;;  %v3719_v56 = vsub.f32 %v7214_v49, %v7467_v52 }
 0x568   : > { %5048 = vrsqrt.f32 %v3750_v38  ;;  %v3749_v58 = vadd.f32 1e-05, %v3685_v46  ;;  %v3684_v55 = vmax.f32 %v3652_v42, 0.0  ;;  %v3809_v54 = vmul.f32 %v5043_v12, %v3713_v53 }
 0x569   : > { %v5045_v25 = vpop.eup %5044  ;;  %v3397_v37 = vpop.xlane.xlu1 %3396  ;;  %v3848_v43 = vmul.f32 %v7316_v60, %v3810_v51  ;;  %v3887_v26 = vadd.f32 %v7328_v7, %v3849_v39  ;;  %v7514_v18 = vmul.f32 0.015625, %v3400_v59  ;;  %v3627_v47 = vmul.f32 %v7510_v27, %v7510_v27 }
 0x56a   : > { %5050 = vrsqrt.f32 %v3749_v58  ;;  %v3748_v19 = vadd.f32 1e-05, %v3684_v55  ;;  %v7501_v16 = vmul.f32 0.015625, %v3397_v37  ;;  %v3808_v50 = vmul.f32 %v5045_v25, %v3712_v6 }
 0x56b   : > { %v3394_v61 = vpop.xlane.xlu0 %3393  ;;  %v3847_v30 = vmul.f32 %v7316_v60, %v3809_v54  ;;  %v3886_v41 = vadd.f32 %v7328_v7, %v3848_v43  ;;  %v3919_v0 = vmax.f32 %v3887_v26, 0.0  ;;  %v3626_v23 = vmul.f32 %v7514_v18, %v7514_v18 }
 0x56c   : > { %5052 = vrsqrt.f32 %v3748_v19  ;;  %v7505_v3 = vmul.f32 0.015625, %v3394_v61  ;;  %v3846_v48 = vmul.f32 %v7316_v60, %v3808_v50  ;;  %v3625_v13 = vmul.f32 %v7501_v16, %v7501_v16 }
 0x56d   : > { %v3557_v9 = vpop.xlane.xlu1 %3556  ;;  %v3885_v1 = vadd.f32 %v7328_v7, %v3847_v30  ;;  %v3918_v34 = vmax.f32 %v3886_v41, 0.0  ;;  %v3718_v59 = vsub.f32 %v7217_v4, %v7471_v45  ;;  %v3717_v51 = vsub.f32 %v7224_v57, %v7478_v10 }
 0x56e   : > { %v3593_v35 = vmul.f32 0.015625, %v3557_v9  ;;  %v3884_v36 = vadd.f32 %v7328_v7, %v3846_v48  ;;  %v3624_v20 = vmul.f32 %v7505_v3, %v7505_v3  ;;  %v3716_v6 = vsub.f32 %v7228_v5, %v7480_v24 }
 0x56f   : > { %v3554_v14 = vpop.xlane.xlu0 %3553  ;;  %v3917_v17 = vmax.f32 %v3885_v1, 0.0  ;;  %v3939_v15 = vpack.c.bf16 %v3919_v0, %v3918_v34  ;;  %v3720_v34 = vsub.f32 %v7264_v40, %v7505_v3 }
 0x570   : > { %v3657_v63 = vsub.f32 %v3593_v35, %v3625_v13  ;;  %v3592_v32 = vmul.f32 0.015625, %v3554_v14  ;;  %v3916_v31 = vmax.f32 %v3884_v36, 0.0  ;;  %v3721_v13 = vsub.f32 %v7260_v8, %v7501_v16 }
 0x571   : > { %v3563_v22 = vpop.xlane.xlu1 %3562  ;;  %v3722_v8 = vsub.f32 %v7253_v44, %v7514_v18 }
 0x572   : > { %v3689_v28 = vmax.f32 %v3657_v63, 0.0  ;;  %v3656_v2 = vsub.f32 %v3592_v32, %v3624_v20  ;;  %v3595_v33 = vmul.f32 0.015625, %v3563_v22  ;;  %v3938_v29 = vpack.c.bf16 %v3917_v17, %v3916_v31 }
 0x573   : > { %v5047_v21 = vpop.eup %5046  ;;  %v3560_v62 = vpop.xlane.xlu0 %3559  ;;  %v3723_v32 = vsub.f32 %v7250_v11, %v7510_v27 }
 0x574   : > { %v3753_v38 = vadd.f32 1e-05, %v3689_v28  ;;  %v3688_v46 = vmax.f32 %v3656_v2, 0.0  ;;  %v3659_v42 = vsub.f32 %v3595_v33, %v3627_v47  ;;  %v3594_v12 = vmul.f32 0.015625, %v3560_v62  ;;  %4791 = vmatprep.mubr.msk.bf16.mxu0 %vm1433_vm1, %v3938_v29  ;;  %v7564_v29 = vld [vmem:[%s7691_s13] ss:$0 sm:$0xff] }
 0x575   : > { %v5049_v53 = vpop.eup %5048  ;;  %v3815_v49 = vmul.f32 %v5047_v21, %v3719_v56  ;;  %4792 = vmatmul.mubr.msk.bf16.gmra.mxu0 %vm1433_vm1, %v3939_v15 }
 0x576   : > { %5054 = vrsqrt.f32 %v3753_v38  ;;  %v3752_v52 = vadd.f32 1e-05, %v3688_v46  ;;  %v3691_v58 = vmax.f32 %v3659_v42, 0.0  ;;  %v3658_v55 = vsub.f32 %v3594_v12, %v3626_v23  ;;  %v5070_v38 = vld [vmem:[%s5210_s24 + $0x10] sm:$0xff] }
 0x577   : > { %v5051_v25 = vpop.eup %5050  ;;  %v3814_v37 = vmul.f32 %v5049_v53, %v3718_v59  ;;  %v3853_v10 = vmul.f32 %v7316_v60, %v3815_v49  ;;  %v7802_v53 = vld [vmem:[#allocation2_spill] sm:$0xff] }
 0x578   : > { %5056 = vrsqrt.f32 %v3752_v52  ;;  %v3755_v54 = vadd.f32 1e-05, %v3691_v58  ;;  %v3690_v4 = vmax.f32 %v3658_v55, 0.0  ;;  %v3813_v45 = vmul.f32 %v5051_v25, %v3717_v51  ;;  %v7803_v52 = vld [vmem:[#allocation4_spill] sm:$0xff]  ;;  %v7804_v25 = vld [vmem:[#allocation3_spill] sm:$0xff] }
 0x579   : > { %v5053_v43 = vpop.eup %5052  ;;  %v3852_v57 = vmul.f32 %v7316_v60, %v3814_v37  ;;  %v3891_v30 = vadd.f32 %v7328_v7, %v3853_v10 }
 0x57a   : > { %5058 = vrsqrt.f32 %v3755_v54  ;;  %v3754_v39 = vadd.f32 1e-05, %v3690_v4  ;;  %v3812_v19 = vmul.f32 %v5053_v43, %v3716_v6  ;;  %v3851_v61 = vmul.f32 %v7316_v60, %v3813_v45  ;;  %v7805_v45 = vld [vmem:[#allocation7_spill] sm:$0xff] }
 0x57b   : > { %v3890_v50 = vadd.f32 %v7328_v7, %v3852_v57  ;;  %v3923_v26 = vmax.f32 %v3891_v30, 0.0 }
 0x57c   : > { %5060 = vrsqrt.f32 %v3754_v39  ;;  %v3850_v5 = vmul.f32 %v7316_v60, %v3812_v19  ;;  %v3889_v24 = vadd.f32 %v7328_v7, %v3851_v61  ;;  %v7806_v39 = vld [vmem:[#allocation5_spill] sm:$0xff] }
 0x57d   : > { %v3922_v9 = vmax.f32 %v3890_v50, 0.0 }
 0x57e   : > { %v3888_v41 = vadd.f32 %v7328_v7, %v3850_v5  ;;  %v3921_v1 = vmax.f32 %v3889_v24, 0.0  ;;  %v7807_v5 = vld [vmem:[#allocation8_spill] sm:$0xff] }
 0x57f   : > { %v3941_v36 = vpack.c.bf16 %v3923_v26, %v3922_v9 }
 0x580   : > { %v3920_v48 = vmax.f32 %v3888_v41, 0.0  ;;  %v7808_v41 = vld [vmem:[#allocation6_spill] sm:$0xff] }
 0x582   : > { %v3940_v35 = vpack.c.bf16 %v3921_v1, %v3920_v48 }
 0x583   : > { %v5055_v14 = vpop.eup %5054 }
 0x584   : > { %4795 = vmatprep.mubr.msk.bf16.mxu0 %vm1433_vm1, %v3940_v35  ;;  %v3817_v20 = vmul.f32 %v5055_v14, %v3721_v13  ;;  %v7809_v13 = vld [vmem:[#allocation11_spill] sm:$0xff] }
 0x585   : > { %v5057_v63 = vpop.eup %5056  ;;  %4796 = vmatmul.mubr.msk.bf16.gmra.mxu0 %vm1433_vm1, %v3941_v36 }
 0x586   : > { %v3816_v22 = vmul.f32 %v5057_v63, %v3720_v34  ;;  %v3855_v31 = vmul.f32 %v7316_v60, %v3817_v20  ;;  %v7810_v34 = vld [vmem:[#allocation9_spill] sm:$0xff] }
 0x587   : > { %v5059_v17 = vpop.eup %5058 }
 0x588   : > { %v3854_v16 = vmul.f32 %v7316_v60, %v3816_v22  ;;  %v3893_v40 = vadd.f32 %v7328_v7, %v3855_v31  ;;  %v3819_v3 = vmul.f32 %v5059_v17, %v3723_v32  ;;  %v7811_v22 = vld [vmem:[#allocation12_spill] sm:$0xff] }
 0x589   : > { %v5061_v0 = vpop.eup %5060 }
 0x58a   : > { %v3892_v47 = vadd.f32 %v7328_v7, %v3854_v16  ;;  %v3818_v28 = vmul.f32 %v5061_v0, %v3722_v8  ;;  %v3857_v2 = vmul.f32 %v7316_v60, %v3819_v3  ;;  %v3925_v27 = vmax.f32 %v3893_v40, 0.0  ;;  %v7812_v8 = vld [vmem:[#allocation10_spill] sm:$0xff] }
 0x58c   : > { %v3924_v11 = vmax.f32 %v3892_v47, 0.0  ;;  %v3856_v33 = vmul.f32 %v7316_v60, %v3818_v28  ;;  %v3895_v21 = vadd.f32 %v7328_v7, %v3857_v2  ;;  %v7813_v47 = vld [vmem:[#allocation15_spill] sm:$0xff] }
 0x58e   : > { %v3942_v44 = vpack.c.bf16 %v3925_v27, %v3924_v11  ;;  %v3894_v18 = vadd.f32 %v7328_v7, %v3856_v33  ;;  %v3927_v23 = vmax.f32 %v3895_v21, 0.0  ;;  %v7814_v27 = vld [vmem:[#allocation13_spill] sm:$0xff] }
 0x590   : > { %4799 = vmatprep.mubr.msk.bf16.mxu0 %vm1433_vm1, %v3942_v44  ;;  %v3926_v56 = vmax.f32 %v3894_v18, 0.0  ;;  %v7815_v18 = vld [vmem:[#allocation16_spill] sm:$0xff] }
 0x592   : > { %v3943_v62 = vpack.c.bf16 %v3927_v23, %v3926_v56 }
 0x594   : > { %4800 = vmatmul.mubr.msk.bf16.gmra.mxu0 %vm1433_vm1, %v3943_v62  ;;  %v7816_v62 = vld [vmem:[#allocation14_spill] sm:$0xff] }
 0x5e5   : > { %v4773_v15 = vpop.f32.mrf.mxu0 }
 0x5e6   : > { %v4074_v60 = vadd.f32 %v4773_v15, %v7564_v29 }
 0x5e7   : > { %v4065_v7 = vpop.f32.mrf.mxu0 }
 0x5e8   : > { %v4194_v46 = vadd.f32 %v5070_v38, %v4074_v60  ;;  %v4066_v42 = vadd.f32 %v7564_v29, %v4065_v7 }
 0x5e9   : > { %v4774_v12 = vpop.f32.mrf.mxu0 }
 0x5ea   : > { %4226 = vst [vmem:[%s7572_s25 + $0x10] sm:$0xff] %v4194_v46  ;;  %v4192_v59 = vadd.f32 %v4066_v42, %v7802_v53  ;;  %v4077_v51 = vadd.f32 %v4774_v12, %v7564_v29  ;;  %v7817_v46 = vld [vmem:[#allocation19_spill] sm:$0xff] }
 0x5eb   : > { %v4068_v49 = vpop.f32.mrf.mxu0 }
 0x5ec   : > { %4224 = vst [vmem:[%s7572_s25] sm:$0xff] %v4192_v59  ;;  %v4195_v58 = vadd.f32 %v4077_v51, %v7803_v52  ;;  %v4069_v55 = vadd.f32 %v7564_v29, %v4068_v49  ;;  %v7818_v59 = vld [vmem:[#allocation17_spill] sm:$0xff] }
 0x5ee   : > { %4227 = vst [vmem:[%s7572_s25 + $0x18] sm:$0xff] %v4195_v58  ;;  %v4193_v6 = vadd.f32 %v4069_v55, %v7804_v25  ;;  %v7819_v58 = vld [vmem:[#allocation20_spill] sm:$0xff] }
 0x5f0   : > { %4225 = vst [vmem:[%s7572_s25 + $0x8] sm:$0xff] %v4193_v6  ;;  %v7820_v6 = vld [vmem:[#allocation18_spill] sm:$0xff] }
 0x5f5   : > { %v4777_v37 = vpop.f32.mrf.mxu0 }
 0x5f6   : > { %v4090_v54 = vadd.f32 %v4777_v37, %v7564_v29 }
 0x5f7   : > { %v4081_v4 = vpop.f32.mrf.mxu0 }
 0x5f8   : > { %v4198_v43 = vadd.f32 %v4090_v54, %v7805_v45  ;;  %v4082_v57 = vadd.f32 %v7564_v29, %v4081_v4 }
 0x5f9   : > { %v4778_v10 = vpop.f32.mrf.mxu0 }
 0x5fa   : > { %4230 = vst [vmem:[%s7572_s25 + $0x30] sm:$0xff] %v4198_v43  ;;  %v4196_v19 = vadd.f32 %v4082_v57, %v7806_v39  ;;  %v4093_v61 = vadd.f32 %v4778_v10, %v7564_v29  ;;  %v7821_v43 = vld [vmem:[#allocation23_spill] sm:$0xff] }
 0x5fb   : > { %v4084_v50 = vpop.f32.mrf.mxu0 }
 0x5fc   : > { %4228 = vst [vmem:[%s7572_s25 + $0x20] sm:$0xff] %v4196_v19  ;;  %v4199_v24 = vadd.f32 %v4093_v61, %v7807_v5  ;;  %v4085_v30 = vadd.f32 %v7564_v29, %v4084_v50  ;;  %v7822_v19 = vld [vmem:[#allocation21_spill] sm:$0xff] }
 0x5fe   : > { %4231 = vst [vmem:[%s7572_s25 + $0x38] sm:$0xff] %v4199_v24  ;;  %v4197_v9 = vadd.f32 %v4085_v30, %v7808_v41  ;;  %v7823_v24 = vld [vmem:[#allocation24_spill] sm:$0xff] }
 0x600   : > { %4229 = vst [vmem:[%s7572_s25 + $0x28] sm:$0xff] %v4197_v9  ;;  %v7824_v9 = vld [vmem:[#allocation22_spill] sm:$0xff] }
 0x605   : > { %v4781_v48 = vpop.f32.mrf.mxu0 }
 0x606   : > { %v4106_v1 = vadd.f32 %v4781_v48, %v7564_v29 }
 0x607   : > { %v4097_v26 = vpop.f32.mrf.mxu0 }
 0x608   : > { %v4202_v35 = vadd.f32 %v4106_v1, %v7809_v13  ;;  %v4098_v14 = vadd.f32 %v7564_v29, %v4097_v26 }
 0x609   : > { %v4782_v36 = vpop.f32.mrf.mxu0 }
 0x60a   : > { %4234 = vst [vmem:[%s7572_s25 + $0x50] sm:$0xff] %v4202_v35  ;;  %v4200_v20 = vadd.f32 %v4098_v14, %v7810_v34  ;;  %v4109_v63 = vadd.f32 %v4782_v36, %v7564_v29  ;;  %v7825_v35 = vld [vmem:[#allocation27_spill] sm:$0xff] }
 0x60b   : > { %v4100_v32 = vpop.f32.mrf.mxu0 }
 0x60c   : > { %4232 = vst [vmem:[%s7572_s25 + $0x40] sm:$0xff] %v4200_v20  ;;  %v4203_v31 = vadd.f32 %v4109_v63, %v7811_v22  ;;  %v4101_v17 = vadd.f32 %v7564_v29, %v4100_v32  ;;  %v7826_v20 = vld [vmem:[#allocation25_spill] sm:$0xff] }
 0x60e   : > { %4235 = vst [vmem:[%s7572_s25 + $0x58] sm:$0xff] %v4203_v31  ;;  %v4201_v16 = vadd.f32 %v4101_v17, %v7812_v8  ;;  %v7827_v31 = vld [vmem:[#allocation28_spill] sm:$0xff] }
 0x610   : > { %4233 = vst [vmem:[%s7572_s25 + $0x48] sm:$0xff] %v4201_v16  ;;  %v7828_v16 = vld [vmem:[#allocation26_spill] sm:$0xff] }
 0x615   : > { %v4785_v40 = vpop.f32.mrf.mxu0 }
 0x616   : > { %v4122_v3 = vadd.f32 %v4785_v40, %v7564_v29 }
 0x617   : > { %v4113_v0 = vpop.f32.mrf.mxu0 }
 0x618   : > { %v4206_v28 = vadd.f32 %v4122_v3, %v7813_v47  ;;  %v4114_v2 = vadd.f32 %v7564_v29, %v4113_v0 }
 0x619   : > { %v4786_v11 = vpop.f32.mrf.mxu0 }
 0x61a   : > { %4238 = vst [vmem:[%s7572_s25 + $0x70] sm:$0xff] %v4206_v28  ;;  %v4204_v33 = vadd.f32 %v4114_v2, %v7814_v27  ;;  %v4125_v21 = vadd.f32 %v4786_v11, %v7564_v29  ;;  %v7829_v28 = vld [vmem:[#allocation31_spill] sm:$0xff] }
 0x61b   : > { %v4116_v44 = vpop.f32.mrf.mxu0 }
 0x61c   : > { %4236 = vst [vmem:[%s7572_s25 + $0x60] sm:$0xff] %v4204_v33  ;;  %v4207_v56 = vadd.f32 %v4125_v21, %v7815_v18  ;;  %v4117_v23 = vadd.f32 %v7564_v29, %v4116_v44  ;;  %v7830_v33 = vld [vmem:[#allocation29_spill] sm:$0xff] }
 0x61e   : > { %4239 = vst [vmem:[%s7572_s25 + $0x78] sm:$0xff] %v4207_v56  ;;  %v4205_v15 = vadd.f32 %v4117_v23, %v7816_v62  ;;  %v7831_v56 = vld [vmem:[#allocation32_spill] sm:$0xff] }
 0x620   : > { %4237 = vst [vmem:[%s7572_s25 + $0x68] sm:$0xff] %v4205_v15  ;;  %v7832_v15 = vld [vmem:[#allocation30_spill] sm:$0xff] }
 0x625   : > { %v4789_v60 = vpop.f32.mrf.mxu0 }
 0x626   : > { %v4138_v7 = vadd.f32 %v4789_v60, %v7564_v29 }
 0x627   : > { %v4129_v38 = vpop.f32.mrf.mxu0 }
 0x628   : > { %v4210_v42 = vadd.f32 %v4138_v7, %v7817_v46  ;;  %v4130_v12 = vadd.f32 %v7564_v29, %v4129_v38 }
 0x629   : > { %v4790_v53 = vpop.f32.mrf.mxu0 }
 0x62a   : > { %4242 = vst [vmem:[%s7572_s25 + $0x90] sm:$0xff] %v4210_v42  ;;  %v4208_v51 = vadd.f32 %v4130_v12, %v7818_v59  ;;  %v4141_v49 = vadd.f32 %v4790_v53, %v7564_v29 }
 0x62b   : > { %v4132_v52 = vpop.f32.mrf.mxu0 }
 0x62c   : > { %4240 = vst [vmem:[%s7572_s25 + $0x80] sm:$0xff] %v4208_v51  ;;  %v4211_v55 = vadd.f32 %v4141_v49, %v7819_v58  ;;  %v4133_v25 = vadd.f32 %v7564_v29, %v4132_v52 }
 0x62e   : > { %4243 = vst [vmem:[%s7572_s25 + $0x98] sm:$0xff] %v4211_v55  ;;  %v4209_v37 = vadd.f32 %v4133_v25, %v7820_v6 }
 0x630   : > { %4241 = vst [vmem:[%s7572_s25 + $0x88] sm:$0xff] %v4209_v37 }
 0x635   : > { %v4793_v54 = vpop.f32.mrf.mxu0 }
 0x636   : > { %v4154_v4 = vadd.f32 %v4793_v54, %v7564_v29 }
 0x637   : > { %v4145_v45 = vpop.f32.mrf.mxu0 }
 0x638   : > { %v4214_v57 = vadd.f32 %v4154_v4, %v7821_v43  ;;  %v4146_v10 = vadd.f32 %v7564_v29, %v4145_v45 }
 0x639   : > { %v4794_v39 = vpop.f32.mrf.mxu0 }
 0x63a   : > { %4246 = vst [vmem:[%s7572_s25 + $0xb0] sm:$0xff] %v4214_v57  ;;  %v4212_v61 = vadd.f32 %v4146_v10, %v7822_v19  ;;  %v4157_v50 = vadd.f32 %v4794_v39, %v7564_v29 }
 0x63b   : > { %v4148_v5 = vpop.f32.mrf.mxu0 }
 0x63c   : > { %4244 = vst [vmem:[%s7572_s25 + $0xa0] sm:$0xff] %v4212_v61  ;;  %v4215_v30 = vadd.f32 %v4157_v50, %v7823_v24  ;;  %v4149_v41 = vadd.f32 %v7564_v29, %v4148_v5 }
 0x63e   : > { %4247 = vst [vmem:[%s7572_s25 + $0xb8] sm:$0xff] %v4215_v30  ;;  %v4213_v48 = vadd.f32 %v4149_v41, %v7824_v9 }
 0x640   : > { %4245 = vst [vmem:[%s7572_s25 + $0xa8] sm:$0xff] %v4213_v48 }
 0x645   : > { %v4797_v1 = vpop.f32.mrf.mxu0 }
 0x646   : > { %v4170_v26 = vadd.f32 %v4797_v1, %v7564_v29 }
 0x647   : > { %v4161_v13 = vpop.f32.mrf.mxu0 }
 0x648   : > { %v4218_v14 = vadd.f32 %v7825_v35, %v4170_v26  ;;  %v4162_v36 = vadd.f32 %v7564_v29, %v4161_v13 }
 0x649   : > { %v4798_v34 = vpop.f32.mrf.mxu0 }
 0x64a   : > { %4250 = vst [vmem:[%s7572_s25 + $0xd0] sm:$0xff] %v4218_v14  ;;  %v4216_v63 = vadd.f32 %v4162_v36, %v7826_v20  ;;  %v4173_v32 = vadd.f32 %v4798_v34, %v7564_v29 }
 0x64b   : > { %v4164_v22 = vpop.f32.mrf.mxu0 }
 0x64c   : > { %4248 = vst [vmem:[%s7572_s25 + $0xc0] sm:$0xff] %v4216_v63  ;;  %v4219_v17 = vadd.f32 %v7827_v31, %v4173_v32  ;;  %v4165_v8 = vadd.f32 %v7564_v29, %v4164_v22 }
 0x64e   : > { %4251 = vst [vmem:[%s7572_s25 + $0xd8] sm:$0xff] %v4219_v17  ;;  %v4217_v40 = vadd.f32 %v4165_v8, %v7828_v16 }
 0x650   : > { %4249 = vst [vmem:[%s7572_s25 + $0xc8] sm:$0xff] %v4217_v40 }
 0x654   : > { %v4801_v3 = vpop.f32.mrf.mxu0 }
 0x655   : > { %v4186_v0 = vadd.f32 %v4801_v3, %v7564_v29 }
 0x656   : > { %v4177_v47 = vpop.f32.mrf.mxu0 }
 0x657   : > { %v4222_v2 = vadd.f32 %v7829_v28, %v4186_v0  ;;  %v4178_v11 = vadd.f32 %v7564_v29, %v4177_v47 }
 0x658   : > { %v4802_v27 = vpop.f32.mrf.mxu0 }
 0x659   : > { %4254 = vst [vmem:[%s7572_s25 + $0xf0] sm:$0xff] %v4222_v2  ;;  %v4220_v21 = vadd.f32 %v7830_v33, %v4178_v11  ;;  %v4189_v44 = vadd.f32 %v4802_v27, %v7564_v29 }
 0x65a   : > { %v4180_v18 = vpop.f32.mrf.mxu0 }
 0x65b   : > { %4252 = vst [vmem:[%s7572_s25 + $0xe0] sm:$0xff] %v4220_v21  ;;  %v4223_v23 = vadd.f32 %v7831_v56, %v4189_v44  ;;  %v4181_v62 = vadd.f32 %v7564_v29, %v4180_v18 }
 0x65d   : > { %4255 = vst [vmem:[%s7572_s25 + $0xf8] sm:$0xff] %v4223_v23  ;;  %v4221_v60 = vadd.f32 %v7832_v15, %v4181_v62 }
 0x65f   : > { %4253 = vst [vmem:[%s7572_s25 + $0xe8] sm:$0xff] %v4221_v60 }
 0x660 PF: > { %s24_s15 = sadd.s32 1, %s5093_s15   ;;  %s7833_s29 = smov %s5089_s30 }
 0x661   : > { %p21_p5 = scmp.ge.s32.totalorder %s24_s15, 4   ;;  %s7834_s30 = smov %s7836_s16 }
 0x663   :  { %23 = sbr.rel (!%p21_p5) target bundleno = 2 (0x2), region = 109 }

</bundles_post_ra>
